<compile_context>
chip_gen: v6e
topology: v6e:2x2x1
jax: 0.10.0
libtpu: 0.0.40
codegen_flags: <defaults>
</compile_context>

<pallas_src>
import jax
import jax.numpy as jnp
import numpy as np
from jax import lax
from jax.experimental import pallas as pl
from jax.experimental.pallas import tpu as pltpu

N, C, H, W = 2, 2, 16, 16           # batch, channels, spatial (per module observation)
HW = H * W                          # 256
NHW = N * HW                        # 512 lanes per (observation, channel) slab
K = 3                               # conv kernel size
EPS = 1e-5                          # BatchNorm eps (PyTorch default)
WSZ = C * C * K * K                 # 36 conv weights per layer
PARAMS_PER_LAYER = WSZ + 3 * C      # weights + bias + gamma + beta = 42 (bias unused in kernel)
NUM_LAYERS = 3                      # stem conv + 2 residual-block convs
TOTAL_PARAMS = NUM_LAYERS * PARAMS_PER_LAYER


def _make_shift_masks():
    """(K*K, N*HW) f32 validity masks for the 9 conv taps (zero-pad boundary).

    Each 256-lane segment (one HxW plane) repeats the same pattern; tiling over N lets the
    per-channel slab keep N folded into the lane axis (rolls that cross plane boundaries
    only ever land on masked-out positions)."""
    hh = np.arange(H).reshape(H, 1)
    ww = np.arange(W).reshape(1, W)
    masks = np.zeros((K * K, NHW), np.float32)
    for dh in range(K):
        for dw in range(K):
            valid = ((hh + dh - 1 >= 0) & (hh + dh - 1 < H) &
                     (ww + dw - 1 >= 0) & (ww + dw - 1 < W))
            masks[dh * K + dw] = np.tile(valid.reshape(HW), N).astype(np.float32)
    return masks


_SHIFT_MASKS = _make_shift_masks()


def _repr_kernel(params_ref, masks_ref, x_ref, out_ref):
    """params_ref: SMEM (126,) f32 flat parameters.
    masks_ref:  VMEM (9, N*HW) f32 conv-tap validity masks (resident).
    x_ref:      VMEM (C, BB, N*HW) f32 input super-block (channel-major, lane-dense).
    out_ref:    VMEM (C, BB, N*HW) f32 output (also the inter-layer buffer)."""
    inv_cnt = 1.0 / float(NHW)      # BN stats are over (N, H, W) per channel, per observation

    # Hoist the 9 boundary masks once; reused by all 3 layers and both input channels.
    mask_vals = [masks_ref[t:t + 1, :] for t in range(K * K)]

    def layer(src_ref, base, with_residual):
        # Hoist all scalar parameters for this layer out of the tap loops (SMEM reads).
        w = [params_ref[base + i] for i in range(WSZ)]
        gamma = [params_ref[base + WSZ + C + co] for co in range(C)]
        beta = [params_ref[base + WSZ + 2 * C + co] for co in range(C)]

        # Per-input-channel slabs: (BB, N*HW) -- sublane-dense (BB rows), lane-dense (512).
        planes = [src_ref[ci] for ci in range(C)]

        # 3x3 conv: each shifted plane (ci, dh, dw) feeds both output channels; 3 independent
        # partial accumulators per output channel (one per kernel row) expose VALU ILP.
        parts = [[None] * K for _ in range(C)]
        for dh in range(K):
            for dw in range(K):
                t = dh * K + dw
                sh = (dh - 1) * W + (dw - 1)                 # flat source offset
                for ci in range(C):
                    if sh == 0:                              # center tap: always valid
                        shifted = planes[ci]
                    else:
                        # out[i] = in[i + sh], zero outside the 16x16 plane (mask kills
                        # wrap-around and cross-plane reads).
                        shifted = pltpu.roll(planes[ci], shift=(-sh) % NHW, axis=1) * mask_vals[t]
                    for co in range(C):
                        term = w[((co * C + ci) * K + dh) * K + dw] * shifted
                        parts[co][dh] = term if parts[co][dh] is None else parts[co][dh] + term
        accs = [(parts[co][0] + parts[co][1]) + parts[co][2] for co in range(C)]
        # Conv bias intentionally omitted: BN's batch-mean subtraction cancels it exactly.

        # BatchNorm (training-mode batch stats), vectorized over the BB observations in this
        # block: stats are (BB, 1) vectors (safe two-pass, biased variance).
        for co in range(C):
            mean = jnp.sum(accs[co], axis=1, keepdims=True) * inv_cnt
            cent = accs[co] - mean
            var = jnp.sum(cent * cent, axis=1, keepdims=True) * inv_cnt
            y = cent * (lax.rsqrt(var + EPS) * gamma[co]) + beta[co]
            if with_residual:
                y = y + planes[co]            # residual uses the already-loaded input slab
            out_ref[co] = jnp.maximum(y, 0.0)  # dense full-tile store

    layer(x_ref, 0, False)                        # stem: relu(BN(conv(x)))
    layer(out_ref, PARAMS_PER_LAYER, True)        # residual block 1
    layer(out_ref, 2 * PARAMS_PER_LAYER, True)    # residual block 2


def representation_function_pallas_batched(observations, params_flat, block_obs=128):
    """observations: (B, N, C, H, W) f32 -- B independent forward calls of the module.

    Observations are processed in super-blocks of BB per grid step; pick block_obs so that
    B/block_obs is even on v7x (two TensorCores)."""
    B = observations.shape[0]
    if B <= block_obs:
        BB, nblk = B, 1                      # single block == full array dim (tiling-exempt)
    else:
        BB = max(8, (block_obs // 8) * 8)    # (8,128) tiling: BB must be a multiple of 8
        nblk = -(-B // BB)
    Bp = BB * nblk

    # Channel-major, observation-in-sublane, lane-dense layout: (C, B, N*H*W).
    x = jnp.transpose(observations, (2, 0, 1, 3, 4)).reshape(C, B, NHW)
    if Bp != B:
        x = jnp.pad(x, ((0, 0), (0, Bp - B), (0, 0)))   # padded rows are dropped at the end
    masks = jnp.asarray(_SHIFT_MASKS)

    out = pl.pallas_call(
        _repr_kernel,
        out_shape=jax.ShapeDtypeStruct((C, Bp, NHW), jnp.float32),
        grid=(nblk,),
        in_specs=[
            pl.BlockSpec(memory_space=pltpu.MemorySpace.SMEM),      # flat params
            pl.BlockSpec((K * K, NHW), lambda b: (0, 0)),           # boundary masks (resident)
            pl.BlockSpec((C, BB, NHW), lambda b: (0, b, 0)),        # observation super-block
        ],
        out_specs=pl.BlockSpec((C, BB, NHW), lambda b: (0, b, 0)),
        compiler_params=pltpu.CompilerParams(dimension_semantics=("parallel",)),
    )(params_flat, masks, x)

    out = out[:, :B].reshape(C, B, N, H, W)
    return jnp.transpose(out, (1, 2, 0, 3, 4))


def representation_function_pallas(observation, params_flat):
    """observation: (N, C, H, W) float32 (one forward of the PyTorch module)."""
    return representation_function_pallas_batched(observation[None], params_flat)[0]


# ---------------- deterministic synthetic parameters + pure-JAX reference ----------------

def make_params(key):
    layers = []
    flat = []
    for _ in range(NUM_LAYERS):
        key, k1, k2, k3, k4 = jax.random.split(key, 5)
        w = (jax.random.normal(k1, (C, C, K, K), jnp.float32) * 0.5)     # OIHW
        b = jax.random.normal(k2, (C,), jnp.float32) * 0.1
        gamma = 1.0 + 0.1 * jax.random.normal(k3, (C,), jnp.float32)
        beta = 0.1 * jax.random.normal(k4, (C,), jnp.float32)
        layers.append((w, b, gamma, beta))
        flat += [w.reshape(-1), b, gamma, beta]
    return jnp.concatenate(flat).astype(jnp.float32), layers, key


def reference_forward(x, layers):
    def conv_bn(x, w, b, gamma, beta):
        y = lax.conv_general_dilated(
            x, w, (1, 1), "SAME",
            dimension_numbers=("NCHW", "OIHW", "NCHW"),
            precision=lax.Precision.HIGHEST,
        ) + b[None, :, None, None]
        m = y.mean(axis=(0, 2, 3), keepdims=True)
        v = ((y - m) ** 2).mean(axis=(0, 2, 3), keepdims=True)
        return (y - m) / jnp.sqrt(v + EPS) * gamma[None, :, None, None] + beta[None, :, None, None]

    s = jax.nn.relu(conv_bn(x, *layers[0]))
    for l in (1, 2):
        s = jax.nn.relu(conv_bn(s, *layers[l]) + s)
    return s


if __name__ == "__main__":
    params_flat, layers, key = make_params(jax.random.PRNGKey(0))

    # Single observation (exact shape the PyTorch module sees).
    key, kx = jax.random.split(key)
    observation = jax.random.normal(kx, (N, C, H, W), jnp.float32)
    out = jax.block_until_ready(representation_function_pallas(observation, params_flat))
    ref = jax.block_until_ready(reference_forward(observation, layers))
    assert out.shape == (N, C, H, W)
    np.testing.assert_allclose(np.asarray(out), np.asarray(ref), rtol=1e-3, atol=1e-3)

    # Batched throughput path: 256 observations -> 2 super-blocks of 128, grid=(2,) marked
    # "parallel" (balanced across both TensorCores on v7x; single TC on v5e/v6e).
    B = 256
    key, kb = jax.random.split(key)
    obs_batch = jax.random.normal(kb, (B, N, C, H, W), jnp.float32)
    out_b = jax.block_until_ready(representation_function_pallas_batched(obs_batch, params_flat))
    ref_b = jax.block_until_ready(jax.vmap(lambda o: reference_forward(o, layers))(obs_batch))
    np.testing.assert_allclose(np.asarray(out_b), np.asarray(ref_b), rtol=1e-3, atol=1e-3)

    # Ragged batch exercises the pad-to-superblock path (70 obs -> 3 blocks of 32, last padded).
    B2 = 70
    key, kc = jax.random.split(key)
    obs_small = jax.random.normal(kc, (B2, N, C, H, W), jnp.float32)
    out_s = jax.block_until_ready(
        representation_function_pallas_batched(obs_small, params_flat, block_obs=32))
    ref_s = jax.block_until_ready(jax.vmap(lambda o: reference_forward(o, layers))(obs_small))
    np.testing.assert_allclose(np.asarray(out_s), np.asarray(ref_s), rtol=1e-3, atol=1e-3)

    print("KERNEL_OK")
</pallas_src>

<mosaic_0001>
module attributes {stable_mosaic.version = 11 : i64} {
  func.func @_repr_kernel(%arg0: i32, %arg1: memref<126xf32, #tpu.memory_space<smem>>, %arg2: memref<9x512xf32, #tpu.memory_space<vmem>>, %arg3: memref<2x1x512xf32, #tpu.memory_space<vmem>>, %arg4: memref<2x1x512xf32, #tpu.memory_space<vmem>>) attributes {dimension_semantics = [#tpu.dimension_semantics<parallel>], iteration_bounds = array<i64: 1>, scalar_prefetch = 0 : i64, scratch_operands = 0 : i64, tpu.core_type = #tpu.core_type<tc>, window_params = [{transform_indices = @transform_0, window_bounds = array<i64: 126>}, {pipeline_mode = #tpu.pipeline_mode<synchronous>, transform_indices = @transform_1, window_bounds = array<i64: 9, 512>}, {transform_indices = @transform_2, window_bounds = array<i64: 2, 1, 512>}, {transform_indices = @transform_3, window_bounds = array<i64: 2, 1, 512>}]} {
    %c0 = arith.constant 0 : index
    %c0_0 = arith.constant 0 : index
    %0 = vector.load %arg2[%c0, %c0_0] : memref<9x512xf32, #tpu.memory_space<vmem>>, vector<1x512xf32>
    %c1 = arith.constant 1 : index
    %c0_1 = arith.constant 0 : index
    %1 = vector.load %arg2[%c1, %c0_1] : memref<9x512xf32, #tpu.memory_space<vmem>>, vector<1x512xf32>
    %c2 = arith.constant 2 : index
    %c0_2 = arith.constant 0 : index
    %2 = vector.load %arg2[%c2, %c0_2] : memref<9x512xf32, #tpu.memory_space<vmem>>, vector<1x512xf32>
    %c3 = arith.constant 3 : index
    %c0_3 = arith.constant 0 : index
    %3 = vector.load %arg2[%c3, %c0_3] : memref<9x512xf32, #tpu.memory_space<vmem>>, vector<1x512xf32>
    %c5 = arith.constant 5 : index
    %c0_4 = arith.constant 0 : index
    %4 = vector.load %arg2[%c5, %c0_4] : memref<9x512xf32, #tpu.memory_space<vmem>>, vector<1x512xf32>
    %c6 = arith.constant 6 : index
    %c0_5 = arith.constant 0 : index
    %5 = vector.load %arg2[%c6, %c0_5] : memref<9x512xf32, #tpu.memory_space<vmem>>, vector<1x512xf32>
    %c7 = arith.constant 7 : index
    %c0_6 = arith.constant 0 : index
    %6 = vector.load %arg2[%c7, %c0_6] : memref<9x512xf32, #tpu.memory_space<vmem>>, vector<1x512xf32>
    %c8 = arith.constant 8 : index
    %c0_7 = arith.constant 0 : index
    %7 = vector.load %arg2[%c8, %c0_7] : memref<9x512xf32, #tpu.memory_space<vmem>>, vector<1x512xf32>
    %c0_8 = arith.constant 0 : index
    %8 = memref.load %arg1[%c0_8] : memref<126xf32, #tpu.memory_space<smem>>
    %c1_9 = arith.constant 1 : index
    %9 = memref.load %arg1[%c1_9] : memref<126xf32, #tpu.memory_space<smem>>
    %c2_10 = arith.constant 2 : index
    %10 = memref.load %arg1[%c2_10] : memref<126xf32, #tpu.memory_space<smem>>
    %c3_11 = arith.constant 3 : index
    %11 = memref.load %arg1[%c3_11] : memref<126xf32, #tpu.memory_space<smem>>
    %c4 = arith.constant 4 : index
    %12 = memref.load %arg1[%c4] : memref<126xf32, #tpu.memory_space<smem>>
    %c5_12 = arith.constant 5 : index
    %13 = memref.load %arg1[%c5_12] : memref<126xf32, #tpu.memory_space<smem>>
    %c6_13 = arith.constant 6 : index
    %14 = memref.load %arg1[%c6_13] : memref<126xf32, #tpu.memory_space<smem>>
    %c7_14 = arith.constant 7 : index
    %15 = memref.load %arg1[%c7_14] : memref<126xf32, #tpu.memory_space<smem>>
    %c8_15 = arith.constant 8 : index
    %16 = memref.load %arg1[%c8_15] : memref<126xf32, #tpu.memory_space<smem>>
    %c9 = arith.constant 9 : index
    %17 = memref.load %arg1[%c9] : memref<126xf32, #tpu.memory_space<smem>>
    %c10 = arith.constant 10 : index
    %18 = memref.load %arg1[%c10] : memref<126xf32, #tpu.memory_space<smem>>
    %c11 = arith.constant 11 : index
    %19 = memref.load %arg1[%c11] : memref<126xf32, #tpu.memory_space<smem>>
    %c12 = arith.constant 12 : index
    %20 = memref.load %arg1[%c12] : memref<126xf32, #tpu.memory_space<smem>>
    %c13 = arith.constant 13 : index
    %21 = memref.load %arg1[%c13] : memref<126xf32, #tpu.memory_space<smem>>
    %c14 = arith.constant 14 : index
    %22 = memref.load %arg1[%c14] : memref<126xf32, #tpu.memory_space<smem>>
    %c15 = arith.constant 15 : index
    %23 = memref.load %arg1[%c15] : memref<126xf32, #tpu.memory_space<smem>>
    %c16 = arith.constant 16 : index
    %24 = memref.load %arg1[%c16] : memref<126xf32, #tpu.memory_space<smem>>
    %c17 = arith.constant 17 : index
    %25 = memref.load %arg1[%c17] : memref<126xf32, #tpu.memory_space<smem>>
    %c18 = arith.constant 18 : index
    %26 = memref.load %arg1[%c18] : memref<126xf32, #tpu.memory_space<smem>>
    %c19 = arith.constant 19 : index
    %27 = memref.load %arg1[%c19] : memref<126xf32, #tpu.memory_space<smem>>
    %c20 = arith.constant 20 : index
    %28 = memref.load %arg1[%c20] : memref<126xf32, #tpu.memory_space<smem>>
    %c21 = arith.constant 21 : index
    %29 = memref.load %arg1[%c21] : memref<126xf32, #tpu.memory_space<smem>>
    %c22 = arith.constant 22 : index
    %30 = memref.load %arg1[%c22] : memref<126xf32, #tpu.memory_space<smem>>
    %c23 = arith.constant 23 : index
    %31 = memref.load %arg1[%c23] : memref<126xf32, #tpu.memory_space<smem>>
    %c24 = arith.constant 24 : index
    %32 = memref.load %arg1[%c24] : memref<126xf32, #tpu.memory_space<smem>>
    %c25 = arith.constant 25 : index
    %33 = memref.load %arg1[%c25] : memref<126xf32, #tpu.memory_space<smem>>
    %c26 = arith.constant 26 : index
    %34 = memref.load %arg1[%c26] : memref<126xf32, #tpu.memory_space<smem>>
    %c27 = arith.constant 27 : index
    %35 = memref.load %arg1[%c27] : memref<126xf32, #tpu.memory_space<smem>>
    %c28 = arith.constant 28 : index
    %36 = memref.load %arg1[%c28] : memref<126xf32, #tpu.memory_space<smem>>
    %c29 = arith.constant 29 : index
    %37 = memref.load %arg1[%c29] : memref<126xf32, #tpu.memory_space<smem>>
    %c30 = arith.constant 30 : index
    %38 = memref.load %arg1[%c30] : memref<126xf32, #tpu.memory_space<smem>>
    %c31 = arith.constant 31 : index
    %39 = memref.load %arg1[%c31] : memref<126xf32, #tpu.memory_space<smem>>
    %c32 = arith.constant 32 : index
    %40 = memref.load %arg1[%c32] : memref<126xf32, #tpu.memory_space<smem>>
    %c33 = arith.constant 33 : index
    %41 = memref.load %arg1[%c33] : memref<126xf32, #tpu.memory_space<smem>>
    %c34 = arith.constant 34 : index
    %42 = memref.load %arg1[%c34] : memref<126xf32, #tpu.memory_space<smem>>
    %c35 = arith.constant 35 : index
    %43 = memref.load %arg1[%c35] : memref<126xf32, #tpu.memory_space<smem>>
    %c38 = arith.constant 38 : index
    %44 = memref.load %arg1[%c38] : memref<126xf32, #tpu.memory_space<smem>>
    %c39 = arith.constant 39 : index
    %45 = memref.load %arg1[%c39] : memref<126xf32, #tpu.memory_space<smem>>
    %c40 = arith.constant 40 : index
    %46 = memref.load %arg1[%c40] : memref<126xf32, #tpu.memory_space<smem>>
    %c41 = arith.constant 41 : index
    %47 = memref.load %arg1[%c41] : memref<126xf32, #tpu.memory_space<smem>>
    %c0_16 = arith.constant 0 : index
    %c0_17 = arith.constant 0 : index
    %c0_18 = arith.constant 0 : index
    %48 = vector.load %arg3[%c0_16, %c0_17, %c0_18] : memref<2x1x512xf32, #tpu.memory_space<vmem>>, vector<1x1x512xf32>
    %49 = vector.shape_cast %48 : vector<1x1x512xf32> to vector<1x512xf32>
    %c1_19 = arith.constant 1 : index
    %c0_20 = arith.constant 0 : index
    %c0_21 = arith.constant 0 : index
    %50 = vector.load %arg3[%c1_19, %c0_20, %c0_21] : memref<2x1x512xf32, #tpu.memory_space<vmem>>, vector<1x1x512xf32>
    %51 = vector.shape_cast %50 : vector<1x1x512xf32> to vector<1x512xf32>
    %c17_i32 = arith.constant 17 : i32
    %52 = tpu.dynamic_rotate %49 by %c17_i32 dim 1 : vector<1x512xf32>, i32 -> vector<1x512xf32>
    %53 = arith.mulf %52, %0 : vector<1x512xf32>
    %54 = vector.broadcast %8 : f32 to vector<1x512xf32>
    %55 = arith.mulf %54, %53 : vector<1x512xf32>
    %56 = vector.broadcast %26 : f32 to vector<1x512xf32>
    %57 = arith.mulf %56, %53 : vector<1x512xf32>
    %c17_i32_22 = arith.constant 17 : i32
    %58 = tpu.dynamic_rotate %51 by %c17_i32_22 dim 1 : vector<1x512xf32>, i32 -> vector<1x512xf32>
    %59 = arith.mulf %58, %0 : vector<1x512xf32>
    %60 = vector.broadcast %17 : f32 to vector<1x512xf32>
    %61 = arith.mulf %60, %59 : vector<1x512xf32>
    %62 = arith.addf %55, %61 : vector<1x512xf32>
    %63 = vector.broadcast %35 : f32 to vector<1x512xf32>
    %64 = arith.mulf %63, %59 : vector<1x512xf32>
    %65 = arith.addf %57, %64 : vector<1x512xf32>
    %c16_i32 = arith.constant 16 : i32
    %66 = tpu.dynamic_rotate %49 by %c16_i32 dim 1 : vector<1x512xf32>, i32 -> vector<1x512xf32>
    %67 = arith.mulf %66, %1 : vector<1x512xf32>
    %68 = vector.broadcast %9 : f32 to vector<1x512xf32>
    %69 = arith.mulf %68, %67 : vector<1x512xf32>
    %70 = arith.addf %62, %69 : vector<1x512xf32>
    %71 = vector.broadcast %27 : f32 to vector<1x512xf32>
    %72 = arith.mulf %71, %67 : vector<1x512xf32>
    %73 = arith.addf %65, %72 : vector<1x512xf32>
    %c16_i32_23 = arith.constant 16 : i32
    %74 = tpu.dynamic_rotate %51 by %c16_i32_23 dim 1 : vector<1x512xf32>, i32 -> vector<1x512xf32>
    %75 = arith.mulf %74, %1 : vector<1x512xf32>
    %76 = vector.broadcast %18 : f32 to vector<1x512xf32>
    %77 = arith.mulf %76, %75 : vector<1x512xf32>
    %78 = arith.addf %70, %77 : vector<1x512xf32>
    %79 = vector.broadcast %36 : f32 to vector<1x512xf32>
    %80 = arith.mulf %79, %75 : vector<1x512xf32>
    %81 = arith.addf %73, %80 : vector<1x512xf32>
    %c15_i32 = arith.constant 15 : i32
    %82 = tpu.dynamic_rotate %49 by %c15_i32 dim 1 : vector<1x512xf32>, i32 -> vector<1x512xf32>
    %83 = arith.mulf %82, %2 : vector<1x512xf32>
    %84 = vector.broadcast %10 : f32 to vector<1x512xf32>
    %85 = arith.mulf %84, %83 : vector<1x512xf32>
    %86 = arith.addf %78, %85 : vector<1x512xf32>
    %87 = vector.broadcast %28 : f32 to vector<1x512xf32>
    %88 = arith.mulf %87, %83 : vector<1x512xf32>
    %89 = arith.addf %81, %88 : vector<1x512xf32>
    %c15_i32_24 = arith.constant 15 : i32
    %90 = tpu.dynamic_rotate %51 by %c15_i32_24 dim 1 : vector<1x512xf32>, i32 -> vector<1x512xf32>
    %91 = arith.mulf %90, %2 : vector<1x512xf32>
    %92 = vector.broadcast %19 : f32 to vector<1x512xf32>
    %93 = arith.mulf %92, %91 : vector<1x512xf32>
    %94 = arith.addf %86, %93 : vector<1x512xf32>
    %95 = vector.broadcast %37 : f32 to vector<1x512xf32>
    %96 = arith.mulf %95, %91 : vector<1x512xf32>
    %97 = arith.addf %89, %96 : vector<1x512xf32>
    %c1_i32 = arith.constant 1 : i32
    %98 = tpu.dynamic_rotate %49 by %c1_i32 dim 1 : vector<1x512xf32>, i32 -> vector<1x512xf32>
    %99 = arith.mulf %98, %3 : vector<1x512xf32>
    %100 = vector.broadcast %11 : f32 to vector<1x512xf32>
    %101 = arith.mulf %100, %99 : vector<1x512xf32>
    %102 = vector.broadcast %29 : f32 to vector<1x512xf32>
    %103 = arith.mulf %102, %99 : vector<1x512xf32>
    %c1_i32_25 = arith.constant 1 : i32
    %104 = tpu.dynamic_rotate %51 by %c1_i32_25 dim 1 : vector<1x512xf32>, i32 -> vector<1x512xf32>
    %105 = arith.mulf %104, %3 : vector<1x512xf32>
    %106 = vector.broadcast %20 : f32 to vector<1x512xf32>
    %107 = arith.mulf %106, %105 : vector<1x512xf32>
    %108 = arith.addf %101, %107 : vector<1x512xf32>
    %109 = vector.broadcast %38 : f32 to vector<1x512xf32>
    %110 = arith.mulf %109, %105 : vector<1x512xf32>
    %111 = arith.addf %103, %110 : vector<1x512xf32>
    %112 = vector.broadcast %12 : f32 to vector<1x512xf32>
    %113 = arith.mulf %112, %49 : vector<1x512xf32>
    %114 = arith.addf %108, %113 : vector<1x512xf32>
    %115 = vector.broadcast %30 : f32 to vector<1x512xf32>
    %116 = arith.mulf %115, %49 : vector<1x512xf32>
    %117 = arith.addf %111, %116 : vector<1x512xf32>
    %118 = vector.broadcast %21 : f32 to vector<1x512xf32>
    %119 = arith.mulf %118, %51 : vector<1x512xf32>
    %120 = arith.addf %114, %119 : vector<1x512xf32>
    %121 = vector.broadcast %39 : f32 to vector<1x512xf32>
    %122 = arith.mulf %121, %51 : vector<1x512xf32>
    %123 = arith.addf %117, %122 : vector<1x512xf32>
    %c511_i32 = arith.constant 511 : i32
    %124 = tpu.dynamic_rotate %49 by %c511_i32 dim 1 : vector<1x512xf32>, i32 -> vector<1x512xf32>
    %125 = arith.mulf %124, %4 : vector<1x512xf32>
    %126 = vector.broadcast %13 : f32 to vector<1x512xf32>
    %127 = arith.mulf %126, %125 : vector<1x512xf32>
    %128 = arith.addf %120, %127 : vector<1x512xf32>
    %129 = vector.broadcast %31 : f32 to vector<1x512xf32>
    %130 = arith.mulf %129, %125 : vector<1x512xf32>
    %131 = arith.addf %123, %130 : vector<1x512xf32>
    %c511_i32_26 = arith.constant 511 : i32
    %132 = tpu.dynamic_rotate %51 by %c511_i32_26 dim 1 : vector<1x512xf32>, i32 -> vector<1x512xf32>
    %133 = arith.mulf %132, %4 : vector<1x512xf32>
    %134 = vector.broadcast %22 : f32 to vector<1x512xf32>
    %135 = arith.mulf %134, %133 : vector<1x512xf32>
    %136 = arith.addf %128, %135 : vector<1x512xf32>
    %137 = vector.broadcast %40 : f32 to vector<1x512xf32>
    %138 = arith.mulf %137, %133 : vector<1x512xf32>
    %139 = arith.addf %131, %138 : vector<1x512xf32>
    %c497_i32 = arith.constant 497 : i32
    %140 = tpu.dynamic_rotate %49 by %c497_i32 dim 1 : vector<1x512xf32>, i32 -> vector<1x512xf32>
    %141 = arith.mulf %140, %5 : vector<1x512xf32>
    %142 = vector.broadcast %14 : f32 to vector<1x512xf32>
    %143 = arith.mulf %142, %141 : vector<1x512xf32>
    %144 = vector.broadcast %32 : f32 to vector<1x512xf32>
    %145 = arith.mulf %144, %141 : vector<1x512xf32>
    %c497_i32_27 = arith.constant 497 : i32
    %146 = tpu.dynamic_rotate %51 by %c497_i32_27 dim 1 : vector<1x512xf32>, i32 -> vector<1x512xf32>
    %147 = arith.mulf %146, %5 : vector<1x512xf32>
    %148 = vector.broadcast %23 : f32 to vector<1x512xf32>
    %149 = arith.mulf %148, %147 : vector<1x512xf32>
    %150 = arith.addf %143, %149 : vector<1x512xf32>
    %151 = vector.broadcast %41 : f32 to vector<1x512xf32>
    %152 = arith.mulf %151, %147 : vector<1x512xf32>
    %153 = arith.addf %145, %152 : vector<1x512xf32>
    %c496_i32 = arith.constant 496 : i32
    %154 = tpu.dynamic_rotate %49 by %c496_i32 dim 1 : vector<1x512xf32>, i32 -> vector<1x512xf32>
    %155 = arith.mulf %154, %6 : vector<1x512xf32>
    %156 = vector.broadcast %15 : f32 to vector<1x512xf32>
    %157 = arith.mulf %156, %155 : vector<1x512xf32>
    %158 = arith.addf %150, %157 : vector<1x512xf32>
    %159 = vector.broadcast %33 : f32 to vector<1x512xf32>
    %160 = arith.mulf %159, %155 : vector<1x512xf32>
    %161 = arith.addf %153, %160 : vector<1x512xf32>
    %c496_i32_28 = arith.constant 496 : i32
    %162 = tpu.dynamic_rotate %51 by %c496_i32_28 dim 1 : vector<1x512xf32>, i32 -> vector<1x512xf32>
    %163 = arith.mulf %162, %6 : vector<1x512xf32>
    %164 = vector.broadcast %24 : f32 to vector<1x512xf32>
    %165 = arith.mulf %164, %163 : vector<1x512xf32>
    %166 = arith.addf %158, %165 : vector<1x512xf32>
    %167 = vector.broadcast %42 : f32 to vector<1x512xf32>
    %168 = arith.mulf %167, %163 : vector<1x512xf32>
    %169 = arith.addf %161, %168 : vector<1x512xf32>
    %c495_i32 = arith.constant 495 : i32
    %170 = tpu.dynamic_rotate %49 by %c495_i32 dim 1 : vector<1x512xf32>, i32 -> vector<1x512xf32>
    %171 = arith.mulf %170, %7 : vector<1x512xf32>
    %172 = vector.broadcast %16 : f32 to vector<1x512xf32>
    %173 = arith.mulf %172, %171 : vector<1x512xf32>
    %174 = arith.addf %166, %173 : vector<1x512xf32>
    %175 = vector.broadcast %34 : f32 to vector<1x512xf32>
    %176 = arith.mulf %175, %171 : vector<1x512xf32>
    %177 = arith.addf %169, %176 : vector<1x512xf32>
    %c495_i32_29 = arith.constant 495 : i32
    %178 = tpu.dynamic_rotate %51 by %c495_i32_29 dim 1 : vector<1x512xf32>, i32 -> vector<1x512xf32>
    %179 = arith.mulf %178, %7 : vector<1x512xf32>
    %180 = vector.broadcast %25 : f32 to vector<1x512xf32>
    %181 = arith.mulf %180, %179 : vector<1x512xf32>
    %182 = arith.addf %174, %181 : vector<1x512xf32>
    %183 = vector.broadcast %43 : f32 to vector<1x512xf32>
    %184 = arith.mulf %183, %179 : vector<1x512xf32>
    %185 = arith.addf %177, %184 : vector<1x512xf32>
    %186 = arith.addf %94, %136 : vector<1x512xf32>
    %187 = arith.addf %186, %182 : vector<1x512xf32>
    %188 = arith.addf %97, %139 : vector<1x512xf32>
    %189 = arith.addf %188, %185 : vector<1x512xf32>
    %cst = arith.constant dense<0.000000e+00> : vector<1xf32>
    %190 = vector.multi_reduction <add>, %187, %cst [1] : vector<1x512xf32> to vector<1xf32>
    %191 = vector.shape_cast %190 : vector<1xf32> to vector<1x1xf32>
    %cst_30 = arith.constant 0.001953125 : f32
    %192 = vector.broadcast %cst_30 : f32 to vector<1x1xf32>
    %193 = arith.mulf %191, %192 : vector<1x1xf32>
    %194 = vector.broadcast %193 : vector<1x1xf32> to vector<1x512xf32>
    %195 = arith.subf %187, %194 : vector<1x512xf32>
    %196 = arith.mulf %195, %195 : vector<1x512xf32>
    %cst_31 = arith.constant dense<0.000000e+00> : vector<1xf32>
    %197 = vector.multi_reduction <add>, %196, %cst_31 [1] : vector<1x512xf32> to vector<1xf32>
    %198 = vector.shape_cast %197 : vector<1xf32> to vector<1x1xf32>
    %cst_32 = arith.constant 0.001953125 : f32
    %199 = vector.broadcast %cst_32 : f32 to vector<1x1xf32>
    %200 = arith.mulf %198, %199 : vector<1x1xf32>
    %cst_33 = arith.constant 9.99999974E-6 : f32
    %201 = vector.broadcast %cst_33 : f32 to vector<1x1xf32>
    %202 = arith.addf %200, %201 : vector<1x1xf32>
    %203 = math.rsqrt %202 : vector<1x1xf32>
    %204 = vector.broadcast %44 : f32 to vector<1x1xf32>
    %205 = arith.mulf %203, %204 : vector<1x1xf32>
    %206 = vector.broadcast %205 : vector<1x1xf32> to vector<1x512xf32>
    %207 = arith.mulf %195, %206 : vector<1x512xf32>
    %208 = vector.broadcast %46 : f32 to vector<1x512xf32>
    %209 = arith.addf %207, %208 : vector<1x512xf32>
    %cst_34 = arith.constant 0.000000e+00 : f32
    %210 = vector.broadcast %cst_34 : f32 to vector<1x512xf32>
    %211 = arith.maximumf %209, %210 : vector<1x512xf32>
    %c0_35 = arith.constant 0 : index
    %c0_36 = arith.constant 0 : index
    %c0_37 = arith.constant 0 : index
    %212 = vector.load %arg4[%c0_35, %c0_36, %c0_37] : memref<2x1x512xf32, #tpu.memory_space<vmem>>, vector<1x1x512xf32>
    %213 = vector.shape_cast %212 : vector<1x1x512xf32> to vector<1x512xf32>
    %214 = vector.shape_cast %211 : vector<1x512xf32> to vector<1x1x512xf32>
    tpu.vector_store %arg4[%c0_35, %c0_36, %c0_37], %214 {strides = array<i32>} : memref<2x1x512xf32, #tpu.memory_space<vmem>>, vector<1x1x512xf32>,
    %cst_38 = arith.constant dense<0.000000e+00> : vector<1xf32>
    %215 = vector.multi_reduction <add>, %189, %cst_38 [1] : vector<1x512xf32> to vector<1xf32>
    %216 = vector.shape_cast %215 : vector<1xf32> to vector<1x1xf32>
    %cst_39 = arith.constant 0.001953125 : f32
    %217 = vector.broadcast %cst_39 : f32 to vector<1x1xf32>
    %218 = arith.mulf %216, %217 : vector<1x1xf32>
    %219 = vector.broadcast %218 : vector<1x1xf32> to vector<1x512xf32>
    %220 = arith.subf %189, %219 : vector<1x512xf32>
    %221 = arith.mulf %220, %220 : vector<1x512xf32>
    %cst_40 = arith.constant dense<0.000000e+00> : vector<1xf32>
    %222 = vector.multi_reduction <add>, %221, %cst_40 [1] : vector<1x512xf32> to vector<1xf32>
    %223 = vector.shape_cast %222 : vector<1xf32> to vector<1x1xf32>
    %cst_41 = arith.constant 0.001953125 : f32
    %224 = vector.broadcast %cst_41 : f32 to vector<1x1xf32>
    %225 = arith.mulf %223, %224 : vector<1x1xf32>
    %cst_42 = arith.constant 9.99999974E-6 : f32
    %226 = vector.broadcast %cst_42 : f32 to vector<1x1xf32>
    %227 = arith.addf %225, %226 : vector<1x1xf32>
    %228 = math.rsqrt %227 : vector<1x1xf32>
    %229 = vector.broadcast %45 : f32 to vector<1x1xf32>
    %230 = arith.mulf %228, %229 : vector<1x1xf32>
    %231 = vector.broadcast %230 : vector<1x1xf32> to vector<1x512xf32>
    %232 = arith.mulf %220, %231 : vector<1x512xf32>
    %233 = vector.broadcast %47 : f32 to vector<1x512xf32>
    %234 = arith.addf %232, %233 : vector<1x512xf32>
    %cst_43 = arith.constant 0.000000e+00 : f32
    %235 = vector.broadcast %cst_43 : f32 to vector<1x512xf32>
    %236 = arith.maximumf %234, %235 : vector<1x512xf32>
    %c1_44 = arith.constant 1 : index
    %c0_45 = arith.constant 0 : index
    %c0_46 = arith.constant 0 : index
    %237 = vector.load %arg4[%c1_44, %c0_45, %c0_46] : memref<2x1x512xf32, #tpu.memory_space<vmem>>, vector<1x1x512xf32>
    %238 = vector.shape_cast %237 : vector<1x1x512xf32> to vector<1x512xf32>
    %239 = vector.shape_cast %236 : vector<1x512xf32> to vector<1x1x512xf32>
    tpu.vector_store %arg4[%c1_44, %c0_45, %c0_46], %239 {strides = array<i32>} : memref<2x1x512xf32, #tpu.memory_space<vmem>>, vector<1x1x512xf32>,
    %c42 = arith.constant 42 : index
    %240 = memref.load %arg1[%c42] : memref<126xf32, #tpu.memory_space<smem>>
    %c43 = arith.constant 43 : index
    %241 = memref.load %arg1[%c43] : memref<126xf32, #tpu.memory_space<smem>>
    %c44 = arith.constant 44 : index
    %242 = memref.load %arg1[%c44] : memref<126xf32, #tpu.memory_space<smem>>
    %c45 = arith.constant 45 : index
    %243 = memref.load %arg1[%c45] : memref<126xf32, #tpu.memory_space<smem>>
    %c46 = arith.constant 46 : index
    %244 = memref.load %arg1[%c46] : memref<126xf32, #tpu.memory_space<smem>>
    %c47 = arith.constant 47 : index
    %245 = memref.load %arg1[%c47] : memref<126xf32, #tpu.memory_space<smem>>
    %c48 = arith.constant 48 : index
    %246 = memref.load %arg1[%c48] : memref<126xf32, #tpu.memory_space<smem>>
    %c49 = arith.constant 49 : index
    %247 = memref.load %arg1[%c49] : memref<126xf32, #tpu.memory_space<smem>>
    %c50 = arith.constant 50 : index
    %248 = memref.load %arg1[%c50] : memref<126xf32, #tpu.memory_space<smem>>
    %c51 = arith.constant 51 : index
    %249 = memref.load %arg1[%c51] : memref<126xf32, #tpu.memory_space<smem>>
    %c52 = arith.constant 52 : index
    %250 = memref.load %arg1[%c52] : memref<126xf32, #tpu.memory_space<smem>>
    %c53 = arith.constant 53 : index
    %251 = memref.load %arg1[%c53] : memref<126xf32, #tpu.memory_space<smem>>
    %c54 = arith.constant 54 : index
    %252 = memref.load %arg1[%c54] : memref<126xf32, #tpu.memory_space<smem>>
    %c55 = arith.constant 55 : index
    %253 = memref.load %arg1[%c55] : memref<126xf32, #tpu.memory_space<smem>>
    %c56 = arith.constant 56 : index
    %254 = memref.load %arg1[%c56] : memref<126xf32, #tpu.memory_space<smem>>
    %c57 = arith.constant 57 : index
    %255 = memref.load %arg1[%c57] : memref<126xf32, #tpu.memory_space<smem>>
    %c58 = arith.constant 58 : index
    %256 = memref.load %arg1[%c58] : memref<126xf32, #tpu.memory_space<smem>>
    %c59 = arith.constant 59 : index
    %257 = memref.load %arg1[%c59] : memref<126xf32, #tpu.memory_space<smem>>
    %c60 = arith.constant 60 : index
    %258 = memref.load %arg1[%c60] : memref<126xf32, #tpu.memory_space<smem>>
    %c61 = arith.constant 61 : index
    %259 = memref.load %arg1[%c61] : memref<126xf32, #tpu.memory_space<smem>>
    %c62 = arith.constant 62 : index
    %260 = memref.load %arg1[%c62] : memref<126xf32, #tpu.memory_space<smem>>
    %c63 = arith.constant 63 : index
    %261 = memref.load %arg1[%c63] : memref<126xf32, #tpu.memory_space<smem>>
    %c64 = arith.constant 64 : index
    %262 = memref.load %arg1[%c64] : memref<126xf32, #tpu.memory_space<smem>>
    %c65 = arith.constant 65 : index
    %263 = memref.load %arg1[%c65] : memref<126xf32, #tpu.memory_space<smem>>
    %c66 = arith.constant 66 : index
    %264 = memref.load %arg1[%c66] : memref<126xf32, #tpu.memory_space<smem>>
    %c67 = arith.constant 67 : index
    %265 = memref.load %arg1[%c67] : memref<126xf32, #tpu.memory_space<smem>>
    %c68 = arith.constant 68 : index
    %266 = memref.load %arg1[%c68] : memref<126xf32, #tpu.memory_space<smem>>
    %c69 = arith.constant 69 : index
    %267 = memref.load %arg1[%c69] : memref<126xf32, #tpu.memory_space<smem>>
    %c70 = arith.constant 70 : index
    %268 = memref.load %arg1[%c70] : memref<126xf32, #tpu.memory_space<smem>>
    %c71 = arith.constant 71 : index
    %269 = memref.load %arg1[%c71] : memref<126xf32, #tpu.memory_space<smem>>
    %c72 = arith.constant 72 : index
    %270 = memref.load %arg1[%c72] : memref<126xf32, #tpu.memory_space<smem>>
    %c73 = arith.constant 73 : index
    %271 = memref.load %arg1[%c73] : memref<126xf32, #tpu.memory_space<smem>>
    %c74 = arith.constant 74 : index
    %272 = memref.load %arg1[%c74] : memref<126xf32, #tpu.memory_space<smem>>
    %c75 = arith.constant 75 : index
    %273 = memref.load %arg1[%c75] : memref<126xf32, #tpu.memory_space<smem>>
    %c76 = arith.constant 76 : index
    %274 = memref.load %arg1[%c76] : memref<126xf32, #tpu.memory_space<smem>>
    %c77 = arith.constant 77 : index
    %275 = memref.load %arg1[%c77] : memref<126xf32, #tpu.memory_space<smem>>
    %c80 = arith.constant 80 : index
    %276 = memref.load %arg1[%c80] : memref<126xf32, #tpu.memory_space<smem>>
    %c81 = arith.constant 81 : index
    %277 = memref.load %arg1[%c81] : memref<126xf32, #tpu.memory_space<smem>>
    %c82 = arith.constant 82 : index
    %278 = memref.load %arg1[%c82] : memref<126xf32, #tpu.memory_space<smem>>
    %c83 = arith.constant 83 : index
    %279 = memref.load %arg1[%c83] : memref<126xf32, #tpu.memory_space<smem>>
    %c0_47 = arith.constant 0 : index
    %c0_48 = arith.constant 0 : index
    %c0_49 = arith.constant 0 : index
    %280 = vector.load %arg4[%c0_47, %c0_48, %c0_49] : memref<2x1x512xf32, #tpu.memory_space<vmem>>, vector<1x1x512xf32>
    %281 = vector.shape_cast %280 : vector<1x1x512xf32> to vector<1x512xf32>
    %c1_50 = arith.constant 1 : index
    %c0_51 = arith.constant 0 : index
    %c0_52 = arith.constant 0 : index
    %282 = vector.load %arg4[%c1_50, %c0_51, %c0_52] : memref<2x1x512xf32, #tpu.memory_space<vmem>>, vector<1x1x512xf32>
    %283 = vector.shape_cast %282 : vector<1x1x512xf32> to vector<1x512xf32>
    %c17_i32_53 = arith.constant 17 : i32
    %284 = tpu.dynamic_rotate %281 by %c17_i32_53 dim 1 : vector<1x512xf32>, i32 -> vector<1x512xf32>
    %285 = arith.mulf %284, %0 : vector<1x512xf32>
    %286 = vector.broadcast %240 : f32 to vector<1x512xf32>
    %287 = arith.mulf %286, %285 : vector<1x512xf32>
    %288 = vector.broadcast %258 : f32 to vector<1x512xf32>
    %289 = arith.mulf %288, %285 : vector<1x512xf32>
    %c17_i32_54 = arith.constant 17 : i32
    %290 = tpu.dynamic_rotate %283 by %c17_i32_54 dim 1 : vector<1x512xf32>, i32 -> vector<1x512xf32>
    %291 = arith.mulf %290, %0 : vector<1x512xf32>
    %292 = vector.broadcast %249 : f32 to vector<1x512xf32>
    %293 = arith.mulf %292, %291 : vector<1x512xf32>
    %294 = arith.addf %287, %293 : vector<1x512xf32>
    %295 = vector.broadcast %267 : f32 to vector<1x512xf32>
    %296 = arith.mulf %295, %291 : vector<1x512xf32>
    %297 = arith.addf %289, %296 : vector<1x512xf32>
    %c16_i32_55 = arith.constant 16 : i32
    %298 = tpu.dynamic_rotate %281 by %c16_i32_55 dim 1 : vector<1x512xf32>, i32 -> vector<1x512xf32>
    %299 = arith.mulf %298, %1 : vector<1x512xf32>
    %300 = vector.broadcast %241 : f32 to vector<1x512xf32>
    %301 = arith.mulf %300, %299 : vector<1x512xf32>
    %302 = arith.addf %294, %301 : vector<1x512xf32>
    %303 = vector.broadcast %259 : f32 to vector<1x512xf32>
    %304 = arith.mulf %303, %299 : vector<1x512xf32>
    %305 = arith.addf %297, %304 : vector<1x512xf32>
    %c16_i32_56 = arith.constant 16 : i32
    %306 = tpu.dynamic_rotate %283 by %c16_i32_56 dim 1 : vector<1x512xf32>, i32 -> vector<1x512xf32>
    %307 = arith.mulf %306, %1 : vector<1x512xf32>
    %308 = vector.broadcast %250 : f32 to vector<1x512xf32>
    %309 = arith.mulf %308, %307 : vector<1x512xf32>
    %310 = arith.addf %302, %309 : vector<1x512xf32>
    %311 = vector.broadcast %268 : f32 to vector<1x512xf32>
    %312 = arith.mulf %311, %307 : vector<1x512xf32>
    %313 = arith.addf %305, %312 : vector<1x512xf32>
    %c15_i32_57 = arith.constant 15 : i32
    %314 = tpu.dynamic_rotate %281 by %c15_i32_57 dim 1 : vector<1x512xf32>, i32 -> vector<1x512xf32>
    %315 = arith.mulf %314, %2 : vector<1x512xf32>
    %316 = vector.broadcast %242 : f32 to vector<1x512xf32>
    %317 = arith.mulf %316, %315 : vector<1x512xf32>
    %318 = arith.addf %310, %317 : vector<1x512xf32>
    %319 = vector.broadcast %260 : f32 to vector<1x512xf32>
    %320 = arith.mulf %319, %315 : vector<1x512xf32>
    %321 = arith.addf %313, %320 : vector<1x512xf32>
    %c15_i32_58 = arith.constant 15 : i32
    %322 = tpu.dynamic_rotate %283 by %c15_i32_58 dim 1 : vector<1x512xf32>, i32 -> vector<1x512xf32>
    %323 = arith.mulf %322, %2 : vector<1x512xf32>
    %324 = vector.broadcast %251 : f32 to vector<1x512xf32>
    %325 = arith.mulf %324, %323 : vector<1x512xf32>
    %326 = arith.addf %318, %325 : vector<1x512xf32>
    %327 = vector.broadcast %269 : f32 to vector<1x512xf32>
    %328 = arith.mulf %327, %323 : vector<1x512xf32>
    %329 = arith.addf %321, %328 : vector<1x512xf32>
    %c1_i32_59 = arith.constant 1 : i32
    %330 = tpu.dynamic_rotate %281 by %c1_i32_59 dim 1 : vector<1x512xf32>, i32 -> vector<1x512xf32>
    %331 = arith.mulf %330, %3 : vector<1x512xf32>
    %332 = vector.broadcast %243 : f32 to vector<1x512xf32>
    %333 = arith.mulf %332, %331 : vector<1x512xf32>
    %334 = vector.broadcast %261 : f32 to vector<1x512xf32>
    %335 = arith.mulf %334, %331 : vector<1x512xf32>
    %c1_i32_60 = arith.constant 1 : i32
    %336 = tpu.dynamic_rotate %283 by %c1_i32_60 dim 1 : vector<1x512xf32>, i32 -> vector<1x512xf32>
    %337 = arith.mulf %336, %3 : vector<1x512xf32>
    %338 = vector.broadcast %252 : f32 to vector<1x512xf32>
    %339 = arith.mulf %338, %337 : vector<1x512xf32>
    %340 = arith.addf %333, %339 : vector<1x512xf32>
    %341 = vector.broadcast %270 : f32 to vector<1x512xf32>
    %342 = arith.mulf %341, %337 : vector<1x512xf32>
    %343 = arith.addf %335, %342 : vector<1x512xf32>
    %344 = vector.broadcast %244 : f32 to vector<1x512xf32>
    %345 = arith.mulf %344, %281 : vector<1x512xf32>
    %346 = arith.addf %340, %345 : vector<1x512xf32>
    %347 = vector.broadcast %262 : f32 to vector<1x512xf32>
    %348 = arith.mulf %347, %281 : vector<1x512xf32>
    %349 = arith.addf %343, %348 : vector<1x512xf32>
    %350 = vector.broadcast %253 : f32 to vector<1x512xf32>
    %351 = arith.mulf %350, %283 : vector<1x512xf32>
    %352 = arith.addf %346, %351 : vector<1x512xf32>
    %353 = vector.broadcast %271 : f32 to vector<1x512xf32>
    %354 = arith.mulf %353, %283 : vector<1x512xf32>
    %355 = arith.addf %349, %354 : vector<1x512xf32>
    %c511_i32_61 = arith.constant 511 : i32
    %356 = tpu.dynamic_rotate %281 by %c511_i32_61 dim 1 : vector<1x512xf32>, i32 -> vector<1x512xf32>
    %357 = arith.mulf %356, %4 : vector<1x512xf32>
    %358 = vector.broadcast %245 : f32 to vector<1x512xf32>
    %359 = arith.mulf %358, %357 : vector<1x512xf32>
    %360 = arith.addf %352, %359 : vector<1x512xf32>
    %361 = vector.broadcast %263 : f32 to vector<1x512xf32>
    %362 = arith.mulf %361, %357 : vector<1x512xf32>
    %363 = arith.addf %355, %362 : vector<1x512xf32>
    %c511_i32_62 = arith.constant 511 : i32
    %364 = tpu.dynamic_rotate %283 by %c511_i32_62 dim 1 : vector<1x512xf32>, i32 -> vector<1x512xf32>
    %365 = arith.mulf %364, %4 : vector<1x512xf32>
    %366 = vector.broadcast %254 : f32 to vector<1x512xf32>
    %367 = arith.mulf %366, %365 : vector<1x512xf32>
    %368 = arith.addf %360, %367 : vector<1x512xf32>
    %369 = vector.broadcast %272 : f32 to vector<1x512xf32>
    %370 = arith.mulf %369, %365 : vector<1x512xf32>
    %371 = arith.addf %363, %370 : vector<1x512xf32>
    %c497_i32_63 = arith.constant 497 : i32
    %372 = tpu.dynamic_rotate %281 by %c497_i32_63 dim 1 : vector<1x512xf32>, i32 -> vector<1x512xf32>
    %373 = arith.mulf %372, %5 : vector<1x512xf32>
    %374 = vector.broadcast %246 : f32 to vector<1x512xf32>
    %375 = arith.mulf %374, %373 : vector<1x512xf32>
    %376 = vector.broadcast %264 : f32 to vector<1x512xf32>
    %377 = arith.mulf %376, %373 : vector<1x512xf32>
    %c497_i32_64 = arith.constant 497 : i32
    %378 = tpu.dynamic_rotate %283 by %c497_i32_64 dim 1 : vector<1x512xf32>, i32 -> vector<1x512xf32>
    %379 = arith.mulf %378, %5 : vector<1x512xf32>
    %380 = vector.broadcast %255 : f32 to vector<1x512xf32>
    %381 = arith.mulf %380, %379 : vector<1x512xf32>
    %382 = arith.addf %375, %381 : vector<1x512xf32>
    %383 = vector.broadcast %273 : f32 to vector<1x512xf32>
    %384 = arith.mulf %383, %379 : vector<1x512xf32>
    %385 = arith.addf %377, %384 : vector<1x512xf32>
    %c496_i32_65 = arith.constant 496 : i32
    %386 = tpu.dynamic_rotate %281 by %c496_i32_65 dim 1 : vector<1x512xf32>, i32 -> vector<1x512xf32>
    %387 = arith.mulf %386, %6 : vector<1x512xf32>
    %388 = vector.broadcast %247 : f32 to vector<1x512xf32>
    %389 = arith.mulf %388, %387 : vector<1x512xf32>
    %390 = arith.addf %382, %389 : vector<1x512xf32>
    %391 = vector.broadcast %265 : f32 to vector<1x512xf32>
    %392 = arith.mulf %391, %387 : vector<1x512xf32>
    %393 = arith.addf %385, %392 : vector<1x512xf32>
    %c496_i32_66 = arith.constant 496 : i32
    %394 = tpu.dynamic_rotate %283 by %c496_i32_66 dim 1 : vector<1x512xf32>, i32 -> vector<1x512xf32>
    %395 = arith.mulf %394, %6 : vector<1x512xf32>
    %396 = vector.broadcast %256 : f32 to vector<1x512xf32>
    %397 = arith.mulf %396, %395 : vector<1x512xf32>
    %398 = arith.addf %390, %397 : vector<1x512xf32>
    %399 = vector.broadcast %274 : f32 to vector<1x512xf32>
    %400 = arith.mulf %399, %395 : vector<1x512xf32>
    %401 = arith.addf %393, %400 : vector<1x512xf32>
    %c495_i32_67 = arith.constant 495 : i32
    %402 = tpu.dynamic_rotate %281 by %c495_i32_67 dim 1 : vector<1x512xf32>, i32 -> vector<1x512xf32>
    %403 = arith.mulf %402, %7 : vector<1x512xf32>
    %404 = vector.broadcast %248 : f32 to vector<1x512xf32>
    %405 = arith.mulf %404, %403 : vector<1x512xf32>
    %406 = arith.addf %398, %405 : vector<1x512xf32>
    %407 = vector.broadcast %266 : f32 to vector<1x512xf32>
    %408 = arith.mulf %407, %403 : vector<1x512xf32>
    %409 = arith.addf %401, %408 : vector<1x512xf32>
    %c495_i32_68 = arith.constant 495 : i32
    %410 = tpu.dynamic_rotate %283 by %c495_i32_68 dim 1 : vector<1x512xf32>, i32 -> vector<1x512xf32>
    %411 = arith.mulf %410, %7 : vector<1x512xf32>
    %412 = vector.broadcast %257 : f32 to vector<1x512xf32>
    %413 = arith.mulf %412, %411 : vector<1x512xf32>
    %414 = arith.addf %406, %413 : vector<1x512xf32>
    %415 = vector.broadcast %275 : f32 to vector<1x512xf32>
    %416 = arith.mulf %415, %411 : vector<1x512xf32>
    %417 = arith.addf %409, %416 : vector<1x512xf32>
    %418 = arith.addf %326, %368 : vector<1x512xf32>
    %419 = arith.addf %418, %414 : vector<1x512xf32>
    %420 = arith.addf %329, %371 : vector<1x512xf32>
    %421 = arith.addf %420, %417 : vector<1x512xf32>
    %cst_69 = arith.constant dense<0.000000e+00> : vector<1xf32>
    %422 = vector.multi_reduction <add>, %419, %cst_69 [1] : vector<1x512xf32> to vector<1xf32>
    %423 = vector.shape_cast %422 : vector<1xf32> to vector<1x1xf32>
    %cst_70 = arith.constant 0.001953125 : f32
    %424 = vector.broadcast %cst_70 : f32 to vector<1x1xf32>
    %425 = arith.mulf %423, %424 : vector<1x1xf32>
    %426 = vector.broadcast %425 : vector<1x1xf32> to vector<1x512xf32>
    %427 = arith.subf %419, %426 : vector<1x512xf32>
    %428 = arith.mulf %427, %427 : vector<1x512xf32>
    %cst_71 = arith.constant dense<0.000000e+00> : vector<1xf32>
    %429 = vector.multi_reduction <add>, %428, %cst_71 [1] : vector<1x512xf32> to vector<1xf32>
    %430 = vector.shape_cast %429 : vector<1xf32> to vector<1x1xf32>
    %cst_72 = arith.constant 0.001953125 : f32
    %431 = vector.broadcast %cst_72 : f32 to vector<1x1xf32>
    %432 = arith.mulf %430, %431 : vector<1x1xf32>
    %cst_73 = arith.constant 9.99999974E-6 : f32
    %433 = vector.broadcast %cst_73 : f32 to vector<1x1xf32>
    %434 = arith.addf %432, %433 : vector<1x1xf32>
    %435 = math.rsqrt %434 : vector<1x1xf32>
    %436 = vector.broadcast %276 : f32 to vector<1x1xf32>
    %437 = arith.mulf %435, %436 : vector<1x1xf32>
    %438 = vector.broadcast %437 : vector<1x1xf32> to vector<1x512xf32>
    %439 = arith.mulf %427, %438 : vector<1x512xf32>
    %440 = vector.broadcast %278 : f32 to vector<1x512xf32>
    %441 = arith.addf %439, %440 : vector<1x512xf32>
    %442 = arith.addf %441, %281 : vector<1x512xf32>
    %cst_74 = arith.constant 0.000000e+00 : f32
    %443 = vector.broadcast %cst_74 : f32 to vector<1x512xf32>
    %444 = arith.maximumf %442, %443 : vector<1x512xf32>
    %c0_75 = arith.constant 0 : index
    %c0_76 = arith.constant 0 : index
    %c0_77 = arith.constant 0 : index
    %445 = vector.load %arg4[%c0_75, %c0_76, %c0_77] : memref<2x1x512xf32, #tpu.memory_space<vmem>>, vector<1x1x512xf32>
    %446 = vector.shape_cast %445 : vector<1x1x512xf32> to vector<1x512xf32>
    %447 = vector.shape_cast %444 : vector<1x512xf32> to vector<1x1x512xf32>
    tpu.vector_store %arg4[%c0_75, %c0_76, %c0_77], %447 {strides = array<i32>} : memref<2x1x512xf32, #tpu.memory_space<vmem>>, vector<1x1x512xf32>,
    %cst_78 = arith.constant dense<0.000000e+00> : vector<1xf32>
    %448 = vector.multi_reduction <add>, %421, %cst_78 [1] : vector<1x512xf32> to vector<1xf32>
    %449 = vector.shape_cast %448 : vector<1xf32> to vector<1x1xf32>
    %cst_79 = arith.constant 0.001953125 : f32
    %450 = vector.broadcast %cst_79 : f32 to vector<1x1xf32>
    %451 = arith.mulf %449, %450 : vector<1x1xf32>
    %452 = vector.broadcast %451 : vector<1x1xf32> to vector<1x512xf32>
    %453 = arith.subf %421, %452 : vector<1x512xf32>
    %454 = arith.mulf %453, %453 : vector<1x512xf32>
    %cst_80 = arith.constant dense<0.000000e+00> : vector<1xf32>
    %455 = vector.multi_reduction <add>, %454, %cst_80 [1] : vector<1x512xf32> to vector<1xf32>
    %456 = vector.shape_cast %455 : vector<1xf32> to vector<1x1xf32>
    %cst_81 = arith.constant 0.001953125 : f32
    %457 = vector.broadcast %cst_81 : f32 to vector<1x1xf32>
    %458 = arith.mulf %456, %457 : vector<1x1xf32>
    %cst_82 = arith.constant 9.99999974E-6 : f32
    %459 = vector.broadcast %cst_82 : f32 to vector<1x1xf32>
    %460 = arith.addf %458, %459 : vector<1x1xf32>
    %461 = math.rsqrt %460 : vector<1x1xf32>
    %462 = vector.broadcast %277 : f32 to vector<1x1xf32>
    %463 = arith.mulf %461, %462 : vector<1x1xf32>
    %464 = vector.broadcast %463 : vector<1x1xf32> to vector<1x512xf32>
    %465 = arith.mulf %453, %464 : vector<1x512xf32>
    %466 = vector.broadcast %279 : f32 to vector<1x512xf32>
    %467 = arith.addf %465, %466 : vector<1x512xf32>
    %468 = arith.addf %467, %283 : vector<1x512xf32>
    %cst_83 = arith.constant 0.000000e+00 : f32
    %469 = vector.broadcast %cst_83 : f32 to vector<1x512xf32>
    %470 = arith.maximumf %468, %469 : vector<1x512xf32>
    %c1_84 = arith.constant 1 : index
    %c0_85 = arith.constant 0 : index
    %c0_86 = arith.constant 0 : index
    %471 = vector.load %arg4[%c1_84, %c0_85, %c0_86] : memref<2x1x512xf32, #tpu.memory_space<vmem>>, vector<1x1x512xf32>
    %472 = vector.shape_cast %471 : vector<1x1x512xf32> to vector<1x512xf32>
    %473 = vector.shape_cast %470 : vector<1x512xf32> to vector<1x1x512xf32>
    tpu.vector_store %arg4[%c1_84, %c0_85, %c0_86], %473 {strides = array<i32>} : memref<2x1x512xf32, #tpu.memory_space<vmem>>, vector<1x1x512xf32>,
    %c84 = arith.constant 84 : index
    %474 = memref.load %arg1[%c84] : memref<126xf32, #tpu.memory_space<smem>>
    %c85 = arith.constant 85 : index
    %475 = memref.load %arg1[%c85] : memref<126xf32, #tpu.memory_space<smem>>
    %c86 = arith.constant 86 : index
    %476 = memref.load %arg1[%c86] : memref<126xf32, #tpu.memory_space<smem>>
    %c87 = arith.constant 87 : index
    %477 = memref.load %arg1[%c87] : memref<126xf32, #tpu.memory_space<smem>>
    %c88 = arith.constant 88 : index
    %478 = memref.load %arg1[%c88] : memref<126xf32, #tpu.memory_space<smem>>
    %c89 = arith.constant 89 : index
    %479 = memref.load %arg1[%c89] : memref<126xf32, #tpu.memory_space<smem>>
    %c90 = arith.constant 90 : index
    %480 = memref.load %arg1[%c90] : memref<126xf32, #tpu.memory_space<smem>>
    %c91 = arith.constant 91 : index
    %481 = memref.load %arg1[%c91] : memref<126xf32, #tpu.memory_space<smem>>
    %c92 = arith.constant 92 : index
    %482 = memref.load %arg1[%c92] : memref<126xf32, #tpu.memory_space<smem>>
    %c93 = arith.constant 93 : index
    %483 = memref.load %arg1[%c93] : memref<126xf32, #tpu.memory_space<smem>>
    %c94 = arith.constant 94 : index
    %484 = memref.load %arg1[%c94] : memref<126xf32, #tpu.memory_space<smem>>
    %c95 = arith.constant 95 : index
    %485 = memref.load %arg1[%c95] : memref<126xf32, #tpu.memory_space<smem>>
    %c96 = arith.constant 96 : index
    %486 = memref.load %arg1[%c96] : memref<126xf32, #tpu.memory_space<smem>>
    %c97 = arith.constant 97 : index
    %487 = memref.load %arg1[%c97] : memref<126xf32, #tpu.memory_space<smem>>
    %c98 = arith.constant 98 : index
    %488 = memref.load %arg1[%c98] : memref<126xf32, #tpu.memory_space<smem>>
    %c99 = arith.constant 99 : index
    %489 = memref.load %arg1[%c99] : memref<126xf32, #tpu.memory_space<smem>>
    %c100 = arith.constant 100 : index
    %490 = memref.load %arg1[%c100] : memref<126xf32, #tpu.memory_space<smem>>
    %c101 = arith.constant 101 : index
    %491 = memref.load %arg1[%c101] : memref<126xf32, #tpu.memory_space<smem>>
    %c102 = arith.constant 102 : index
    %492 = memref.load %arg1[%c102] : memref<126xf32, #tpu.memory_space<smem>>
    %c103 = arith.constant 103 : index
    %493 = memref.load %arg1[%c103] : memref<126xf32, #tpu.memory_space<smem>>
    %c104 = arith.constant 104 : index
    %494 = memref.load %arg1[%c104] : memref<126xf32, #tpu.memory_space<smem>>
    %c105 = arith.constant 105 : index
    %495 = memref.load %arg1[%c105] : memref<126xf32, #tpu.memory_space<smem>>
    %c106 = arith.constant 106 : index
    %496 = memref.load %arg1[%c106] : memref<126xf32, #tpu.memory_space<smem>>
    %c107 = arith.constant 107 : index
    %497 = memref.load %arg1[%c107] : memref<126xf32, #tpu.memory_space<smem>>
    %c108 = arith.constant 108 : index
    %498 = memref.load %arg1[%c108] : memref<126xf32, #tpu.memory_space<smem>>
    %c109 = arith.constant 109 : index
    %499 = memref.load %arg1[%c109] : memref<126xf32, #tpu.memory_space<smem>>
    %c110 = arith.constant 110 : index
    %500 = memref.load %arg1[%c110] : memref<126xf32, #tpu.memory_space<smem>>
    %c111 = arith.constant 111 : index
    %501 = memref.load %arg1[%c111] : memref<126xf32, #tpu.memory_space<smem>>
    %c112 = arith.constant 112 : index
    %502 = memref.load %arg1[%c112] : memref<126xf32, #tpu.memory_space<smem>>
    %c113 = arith.constant 113 : index
    %503 = memref.load %arg1[%c113] : memref<126xf32, #tpu.memory_space<smem>>
    %c114 = arith.constant 114 : index
    %504 = memref.load %arg1[%c114] : memref<126xf32, #tpu.memory_space<smem>>
    %c115 = arith.constant 115 : index
    %505 = memref.load %arg1[%c115] : memref<126xf32, #tpu.memory_space<smem>>
    %c116 = arith.constant 116 : index
    %506 = memref.load %arg1[%c116] : memref<126xf32, #tpu.memory_space<smem>>
    %c117 = arith.constant 117 : index
    %507 = memref.load %arg1[%c117] : memref<126xf32, #tpu.memory_space<smem>>
    %c118 = arith.constant 118 : index
    %508 = memref.load %arg1[%c118] : memref<126xf32, #tpu.memory_space<smem>>
    %c119 = arith.constant 119 : index
    %509 = memref.load %arg1[%c119] : memref<126xf32, #tpu.memory_space<smem>>
    %c122 = arith.constant 122 : index
    %510 = memref.load %arg1[%c122] : memref<126xf32, #tpu.memory_space<smem>>
    %c123 = arith.constant 123 : index
    %511 = memref.load %arg1[%c123] : memref<126xf32, #tpu.memory_space<smem>>
    %c124 = arith.constant 124 : index
    %512 = memref.load %arg1[%c124] : memref<126xf32, #tpu.memory_space<smem>>
    %c125 = arith.constant 125 : index
    %513 = memref.load %arg1[%c125] : memref<126xf32, #tpu.memory_space<smem>>
    %c0_87 = arith.constant 0 : index
    %c0_88 = arith.constant 0 : index
    %c0_89 = arith.constant 0 : index
    %514 = vector.load %arg4[%c0_87, %c0_88, %c0_89] : memref<2x1x512xf32, #tpu.memory_space<vmem>>, vector<1x1x512xf32>
    %515 = vector.shape_cast %514 : vector<1x1x512xf32> to vector<1x512xf32>
    %c1_90 = arith.constant 1 : index
    %c0_91 = arith.constant 0 : index
    %c0_92 = arith.constant 0 : index
    %516 = vector.load %arg4[%c1_90, %c0_91, %c0_92] : memref<2x1x512xf32, #tpu.memory_space<vmem>>, vector<1x1x512xf32>
    %517 = vector.shape_cast %516 : vector<1x1x512xf32> to vector<1x512xf32>
    %c17_i32_93 = arith.constant 17 : i32
    %518 = tpu.dynamic_rotate %515 by %c17_i32_93 dim 1 : vector<1x512xf32>, i32 -> vector<1x512xf32>
    %519 = arith.mulf %518, %0 : vector<1x512xf32>
    %520 = vector.broadcast %474 : f32 to vector<1x512xf32>
    %521 = arith.mulf %520, %519 : vector<1x512xf32>
    %522 = vector.broadcast %492 : f32 to vector<1x512xf32>
    %523 = arith.mulf %522, %519 : vector<1x512xf32>
    %c17_i32_94 = arith.constant 17 : i32
    %524 = tpu.dynamic_rotate %517 by %c17_i32_94 dim 1 : vector<1x512xf32>, i32 -> vector<1x512xf32>
    %525 = arith.mulf %524, %0 : vector<1x512xf32>
    %526 = vector.broadcast %483 : f32 to vector<1x512xf32>
    %527 = arith.mulf %526, %525 : vector<1x512xf32>
    %528 = arith.addf %521, %527 : vector<1x512xf32>
    %529 = vector.broadcast %501 : f32 to vector<1x512xf32>
    %530 = arith.mulf %529, %525 : vector<1x512xf32>
    %531 = arith.addf %523, %530 : vector<1x512xf32>
    %c16_i32_95 = arith.constant 16 : i32
    %532 = tpu.dynamic_rotate %515 by %c16_i32_95 dim 1 : vector<1x512xf32>, i32 -> vector<1x512xf32>
    %533 = arith.mulf %532, %1 : vector<1x512xf32>
    %534 = vector.broadcast %475 : f32 to vector<1x512xf32>
    %535 = arith.mulf %534, %533 : vector<1x512xf32>
    %536 = arith.addf %528, %535 : vector<1x512xf32>
    %537 = vector.broadcast %493 : f32 to vector<1x512xf32>
    %538 = arith.mulf %537, %533 : vector<1x512xf32>
    %539 = arith.addf %531, %538 : vector<1x512xf32>
    %c16_i32_96 = arith.constant 16 : i32
    %540 = tpu.dynamic_rotate %517 by %c16_i32_96 dim 1 : vector<1x512xf32>, i32 -> vector<1x512xf32>
    %541 = arith.mulf %540, %1 : vector<1x512xf32>
    %542 = vector.broadcast %484 : f32 to vector<1x512xf32>
    %543 = arith.mulf %542, %541 : vector<1x512xf32>
    %544 = arith.addf %536, %543 : vector<1x512xf32>
    %545 = vector.broadcast %502 : f32 to vector<1x512xf32>
    %546 = arith.mulf %545, %541 : vector<1x512xf32>
    %547 = arith.addf %539, %546 : vector<1x512xf32>
    %c15_i32_97 = arith.constant 15 : i32
    %548 = tpu.dynamic_rotate %515 by %c15_i32_97 dim 1 : vector<1x512xf32>, i32 -> vector<1x512xf32>
    %549 = arith.mulf %548, %2 : vector<1x512xf32>
    %550 = vector.broadcast %476 : f32 to vector<1x512xf32>
    %551 = arith.mulf %550, %549 : vector<1x512xf32>
    %552 = arith.addf %544, %551 : vector<1x512xf32>
    %553 = vector.broadcast %494 : f32 to vector<1x512xf32>
    %554 = arith.mulf %553, %549 : vector<1x512xf32>
    %555 = arith.addf %547, %554 : vector<1x512xf32>
    %c15_i32_98 = arith.constant 15 : i32
    %556 = tpu.dynamic_rotate %517 by %c15_i32_98 dim 1 : vector<1x512xf32>, i32 -> vector<1x512xf32>
    %557 = arith.mulf %556, %2 : vector<1x512xf32>
    %558 = vector.broadcast %485 : f32 to vector<1x512xf32>
    %559 = arith.mulf %558, %557 : vector<1x512xf32>
    %560 = arith.addf %552, %559 : vector<1x512xf32>
    %561 = vector.broadcast %503 : f32 to vector<1x512xf32>
    %562 = arith.mulf %561, %557 : vector<1x512xf32>
    %563 = arith.addf %555, %562 : vector<1x512xf32>
    %c1_i32_99 = arith.constant 1 : i32
    %564 = tpu.dynamic_rotate %515 by %c1_i32_99 dim 1 : vector<1x512xf32>, i32 -> vector<1x512xf32>
    %565 = arith.mulf %564, %3 : vector<1x512xf32>
    %566 = vector.broadcast %477 : f32 to vector<1x512xf32>
    %567 = arith.mulf %566, %565 : vector<1x512xf32>
    %568 = vector.broadcast %495 : f32 to vector<1x512xf32>
    %569 = arith.mulf %568, %565 : vector<1x512xf32>
    %c1_i32_100 = arith.constant 1 : i32
    %570 = tpu.dynamic_rotate %517 by %c1_i32_100 dim 1 : vector<1x512xf32>, i32 -> vector<1x512xf32>
    %571 = arith.mulf %570, %3 : vector<1x512xf32>
    %572 = vector.broadcast %486 : f32 to vector<1x512xf32>
    %573 = arith.mulf %572, %571 : vector<1x512xf32>
    %574 = arith.addf %567, %573 : vector<1x512xf32>
    %575 = vector.broadcast %504 : f32 to vector<1x512xf32>
    %576 = arith.mulf %575, %571 : vector<1x512xf32>
    %577 = arith.addf %569, %576 : vector<1x512xf32>
    %578 = vector.broadcast %478 : f32 to vector<1x512xf32>
    %579 = arith.mulf %578, %515 : vector<1x512xf32>
    %580 = arith.addf %574, %579 : vector<1x512xf32>
    %581 = vector.broadcast %496 : f32 to vector<1x512xf32>
    %582 = arith.mulf %581, %515 : vector<1x512xf32>
    %583 = arith.addf %577, %582 : vector<1x512xf32>
    %584 = vector.broadcast %487 : f32 to vector<1x512xf32>
    %585 = arith.mulf %584, %517 : vector<1x512xf32>
    %586 = arith.addf %580, %585 : vector<1x512xf32>
    %587 = vector.broadcast %505 : f32 to vector<1x512xf32>
    %588 = arith.mulf %587, %517 : vector<1x512xf32>
    %589 = arith.addf %583, %588 : vector<1x512xf32>
    %c511_i32_101 = arith.constant 511 : i32
    %590 = tpu.dynamic_rotate %515 by %c511_i32_101 dim 1 : vector<1x512xf32>, i32 -> vector<1x512xf32>
    %591 = arith.mulf %590, %4 : vector<1x512xf32>
    %592 = vector.broadcast %479 : f32 to vector<1x512xf32>
    %593 = arith.mulf %592, %591 : vector<1x512xf32>
    %594 = arith.addf %586, %593 : vector<1x512xf32>
    %595 = vector.broadcast %497 : f32 to vector<1x512xf32>
    %596 = arith.mulf %595, %591 : vector<1x512xf32>
    %597 = arith.addf %589, %596 : vector<1x512xf32>
    %c511_i32_102 = arith.constant 511 : i32
    %598 = tpu.dynamic_rotate %517 by %c511_i32_102 dim 1 : vector<1x512xf32>, i32 -> vector<1x512xf32>
    %599 = arith.mulf %598, %4 : vector<1x512xf32>
    %600 = vector.broadcast %488 : f32 to vector<1x512xf32>
    %601 = arith.mulf %600, %599 : vector<1x512xf32>
    %602 = arith.addf %594, %601 : vector<1x512xf32>
    %603 = vector.broadcast %506 : f32 to vector<1x512xf32>
    %604 = arith.mulf %603, %599 : vector<1x512xf32>
    %605 = arith.addf %597, %604 : vector<1x512xf32>
    %c497_i32_103 = arith.constant 497 : i32
    %606 = tpu.dynamic_rotate %515 by %c497_i32_103 dim 1 : vector<1x512xf32>, i32 -> vector<1x512xf32>
    %607 = arith.mulf %606, %5 : vector<1x512xf32>
    %608 = vector.broadcast %480 : f32 to vector<1x512xf32>
    %609 = arith.mulf %608, %607 : vector<1x512xf32>
    %610 = vector.broadcast %498 : f32 to vector<1x512xf32>
    %611 = arith.mulf %610, %607 : vector<1x512xf32>
    %c497_i32_104 = arith.constant 497 : i32
    %612 = tpu.dynamic_rotate %517 by %c497_i32_104 dim 1 : vector<1x512xf32>, i32 -> vector<1x512xf32>
    %613 = arith.mulf %612, %5 : vector<1x512xf32>
    %614 = vector.broadcast %489 : f32 to vector<1x512xf32>
    %615 = arith.mulf %614, %613 : vector<1x512xf32>
    %616 = arith.addf %609, %615 : vector<1x512xf32>
    %617 = vector.broadcast %507 : f32 to vector<1x512xf32>
    %618 = arith.mulf %617, %613 : vector<1x512xf32>
    %619 = arith.addf %611, %618 : vector<1x512xf32>
    %c496_i32_105 = arith.constant 496 : i32
    %620 = tpu.dynamic_rotate %515 by %c496_i32_105 dim 1 : vector<1x512xf32>, i32 -> vector<1x512xf32>
    %621 = arith.mulf %620, %6 : vector<1x512xf32>
    %622 = vector.broadcast %481 : f32 to vector<1x512xf32>
    %623 = arith.mulf %622, %621 : vector<1x512xf32>
    %624 = arith.addf %616, %623 : vector<1x512xf32>
    %625 = vector.broadcast %499 : f32 to vector<1x512xf32>
    %626 = arith.mulf %625, %621 : vector<1x512xf32>
    %627 = arith.addf %619, %626 : vector<1x512xf32>
    %c496_i32_106 = arith.constant 496 : i32
    %628 = tpu.dynamic_rotate %517 by %c496_i32_106 dim 1 : vector<1x512xf32>, i32 -> vector<1x512xf32>
    %629 = arith.mulf %628, %6 : vector<1x512xf32>
    %630 = vector.broadcast %490 : f32 to vector<1x512xf32>
    %631 = arith.mulf %630, %629 : vector<1x512xf32>
    %632 = arith.addf %624, %631 : vector<1x512xf32>
    %633 = vector.broadcast %508 : f32 to vector<1x512xf32>
    %634 = arith.mulf %633, %629 : vector<1x512xf32>
    %635 = arith.addf %627, %634 : vector<1x512xf32>
    %c495_i32_107 = arith.constant 495 : i32
    %636 = tpu.dynamic_rotate %515 by %c495_i32_107 dim 1 : vector<1x512xf32>, i32 -> vector<1x512xf32>
    %637 = arith.mulf %636, %7 : vector<1x512xf32>
    %638 = vector.broadcast %482 : f32 to vector<1x512xf32>
    %639 = arith.mulf %638, %637 : vector<1x512xf32>
    %640 = arith.addf %632, %639 : vector<1x512xf32>
    %641 = vector.broadcast %500 : f32 to vector<1x512xf32>
    %642 = arith.mulf %641, %637 : vector<1x512xf32>
    %643 = arith.addf %635, %642 : vector<1x512xf32>
    %c495_i32_108 = arith.constant 495 : i32
    %644 = tpu.dynamic_rotate %517 by %c495_i32_108 dim 1 : vector<1x512xf32>, i32 -> vector<1x512xf32>
    %645 = arith.mulf %644, %7 : vector<1x512xf32>
    %646 = vector.broadcast %491 : f32 to vector<1x512xf32>
    %647 = arith.mulf %646, %645 : vector<1x512xf32>
    %648 = arith.addf %640, %647 : vector<1x512xf32>
    %649 = vector.broadcast %509 : f32 to vector<1x512xf32>
    %650 = arith.mulf %649, %645 : vector<1x512xf32>
    %651 = arith.addf %643, %650 : vector<1x512xf32>
    %652 = arith.addf %560, %602 : vector<1x512xf32>
    %653 = arith.addf %652, %648 : vector<1x512xf32>
    %654 = arith.addf %563, %605 : vector<1x512xf32>
    %655 = arith.addf %654, %651 : vector<1x512xf32>
    %cst_109 = arith.constant dense<0.000000e+00> : vector<1xf32>
    %656 = vector.multi_reduction <add>, %653, %cst_109 [1] : vector<1x512xf32> to vector<1xf32>
    %657 = vector.shape_cast %656 : vector<1xf32> to vector<1x1xf32>
    %cst_110 = arith.constant 0.001953125 : f32
    %658 = vector.broadcast %cst_110 : f32 to vector<1x1xf32>
    %659 = arith.mulf %657, %658 : vector<1x1xf32>
    %660 = vector.broadcast %659 : vector<1x1xf32> to vector<1x512xf32>
    %661 = arith.subf %653, %660 : vector<1x512xf32>
    %662 = arith.mulf %661, %661 : vector<1x512xf32>
    %cst_111 = arith.constant dense<0.000000e+00> : vector<1xf32>
    %663 = vector.multi_reduction <add>, %662, %cst_111 [1] : vector<1x512xf32> to vector<1xf32>
    %664 = vector.shape_cast %663 : vector<1xf32> to vector<1x1xf32>
    %cst_112 = arith.constant 0.001953125 : f32
    %665 = vector.broadcast %cst_112 : f32 to vector<1x1xf32>
    %666 = arith.mulf %664, %665 : vector<1x1xf32>
    %cst_113 = arith.constant 9.99999974E-6 : f32
    %667 = vector.broadcast %cst_113 : f32 to vector<1x1xf32>
    %668 = arith.addf %666, %667 : vector<1x1xf32>
    %669 = math.rsqrt %668 : vector<1x1xf32>
    %670 = vector.broadcast %510 : f32 to vector<1x1xf32>
    %671 = arith.mulf %669, %670 : vector<1x1xf32>
    %672 = vector.broadcast %671 : vector<1x1xf32> to vector<1x512xf32>
    %673 = arith.mulf %661, %672 : vector<1x512xf32>
    %674 = vector.broadcast %512 : f32 to vector<1x512xf32>
    %675 = arith.addf %673, %674 : vector<1x512xf32>
    %676 = arith.addf %675, %515 : vector<1x512xf32>
    %cst_114 = arith.constant 0.000000e+00 : f32
    %677 = vector.broadcast %cst_114 : f32 to vector<1x512xf32>
    %678 = arith.maximumf %676, %677 : vector<1x512xf32>
    %c0_115 = arith.constant 0 : index
    %c0_116 = arith.constant 0 : index
    %c0_117 = arith.constant 0 : index
    %679 = vector.load %arg4[%c0_115, %c0_116, %c0_117] : memref<2x1x512xf32, #tpu.memory_space<vmem>>, vector<1x1x512xf32>
    %680 = vector.shape_cast %679 : vector<1x1x512xf32> to vector<1x512xf32>
    %681 = vector.shape_cast %678 : vector<1x512xf32> to vector<1x1x512xf32>
    tpu.vector_store %arg4[%c0_115, %c0_116, %c0_117], %681 {strides = array<i32>} : memref<2x1x512xf32, #tpu.memory_space<vmem>>, vector<1x1x512xf32>,
    %cst_118 = arith.constant dense<0.000000e+00> : vector<1xf32>
    %682 = vector.multi_reduction <add>, %655, %cst_118 [1] : vector<1x512xf32> to vector<1xf32>
    %683 = vector.shape_cast %682 : vector<1xf32> to vector<1x1xf32>
    %cst_119 = arith.constant 0.001953125 : f32
    %684 = vector.broadcast %cst_119 : f32 to vector<1x1xf32>
    %685 = arith.mulf %683, %684 : vector<1x1xf32>
    %686 = vector.broadcast %685 : vector<1x1xf32> to vector<1x512xf32>
    %687 = arith.subf %655, %686 : vector<1x512xf32>
    %688 = arith.mulf %687, %687 : vector<1x512xf32>
    %cst_120 = arith.constant dense<0.000000e+00> : vector<1xf32>
    %689 = vector.multi_reduction <add>, %688, %cst_120 [1] : vector<1x512xf32> to vector<1xf32>
    %690 = vector.shape_cast %689 : vector<1xf32> to vector<1x1xf32>
    %cst_121 = arith.constant 0.001953125 : f32
    %691 = vector.broadcast %cst_121 : f32 to vector<1x1xf32>
    %692 = arith.mulf %690, %691 : vector<1x1xf32>
    %cst_122 = arith.constant 9.99999974E-6 : f32
    %693 = vector.broadcast %cst_122 : f32 to vector<1x1xf32>
    %694 = arith.addf %692, %693 : vector<1x1xf32>
    %695 = math.rsqrt %694 : vector<1x1xf32>
    %696 = vector.broadcast %511 : f32 to vector<1x1xf32>
    %697 = arith.mulf %695, %696 : vector<1x1xf32>
    %698 = vector.broadcast %697 : vector<1x1xf32> to vector<1x512xf32>
    %699 = arith.mulf %687, %698 : vector<1x512xf32>
    %700 = vector.broadcast %513 : f32 to vector<1x512xf32>
    %701 = arith.addf %699, %700 : vector<1x512xf32>
    %702 = arith.addf %701, %517 : vector<1x512xf32>
    %cst_123 = arith.constant 0.000000e+00 : f32
    %703 = vector.broadcast %cst_123 : f32 to vector<1x512xf32>
    %704 = arith.maximumf %702, %703 : vector<1x512xf32>
    %c1_124 = arith.constant 1 : index
    %c0_125 = arith.constant 0 : index
    %c0_126 = arith.constant 0 : index
    %705 = vector.load %arg4[%c1_124, %c0_125, %c0_126] : memref<2x1x512xf32, #tpu.memory_space<vmem>>, vector<1x1x512xf32>
    %706 = vector.shape_cast %705 : vector<1x1x512xf32> to vector<1x512xf32>
    %707 = vector.shape_cast %704 : vector<1x512xf32> to vector<1x1x512xf32>
    tpu.vector_store %arg4[%c1_124, %c0_125, %c0_126], %707 {strides = array<i32>} : memref<2x1x512xf32, #tpu.memory_space<vmem>>, vector<1x1x512xf32>,
    return
  }
  func.func @transform_0(%arg0: i32) -> i32 {
    %c0_i32 = arith.constant 0 : i32
    %c0_i32_0 = arith.constant 0 : i32
    return %c0_i32 : i32
  }
  func.func @transform_1(%arg0: i32) -> (i32, i32) {
    %c0_i32 = arith.constant 0 : i32
    %c0_i32_0 = arith.constant 0 : i32
    %c0_i32_1 = arith.constant 0 : i32
    return %c0_i32, %c0_i32_0 : i32, i32
  }
  func.func @transform_2(%arg0: i32) -> (i32, i32, i32) {
    %c0_i32 = arith.constant 0 : i32
    %c0_i32_0 = arith.constant 0 : i32
    %c0_i32_1 = arith.constant 0 : i32
    return %c0_i32, %arg0, %c0_i32_0 : i32, i32, i32
  }
  func.func @transform_3(%arg0: i32) -> (i32, i32, i32) {
    %c0_i32 = arith.constant 0 : i32
    %c0_i32_0 = arith.constant 0 : i32
    %c0_i32_1 = arith.constant 0 : i32
    return %c0_i32, %arg0, %c0_i32_0 : i32, i32, i32
  }
}

</mosaic_0001>

<bundles_post_ra>
// kernel: tpu_custom_call.1
= control target key start
LH: loop header
LB: loop body
LE: loop exit
PB: predicated region body
PF: predicated region fallthrough
CT: control target
= control target key end

     0   :  { %8 = vsyncpa [#allocation5], 0  ;;  %s6517_s0 = inlined_call_operand.hbm [shape: f32[126], index: 0, kind: input, shape index: {}]   ;;  %s6518_s1 = inlined_call_operand.hbm [shape: f32[9,512], index: 1, kind: input, shape index: {}]   ;;  %s6519_s2 = inlined_call_operand.hbm [shape: f32[2,1,512], index: 2, kind: input, shape index: {}]   ;;  %s6520_s3 = inlined_call_operand.hbm [shape: f32[2,1,512], index: 3, kind: output, shape index: {}]  }
   0x1   :  { %9 = vsyncpa [#allocation3], 0 }
   0x2   :  { %10 = vsyncpa [#allocation8], 0 }
   0x3   :  { %11 = vsyncpa [#allocation4], 0  ;;  %s3147_s12 = smov [#allocation2]   ;;  %s3148_s15 = smov [#allocation6]  }
   0x4   :  { %19 = dma.hbm_to_smem %s6517_s0, 16, %s3147_s12, [#allocation5]  }
   0x5   :  { %s25_s16 = sshll.u32 %s3148_s15, 4  ;;  %s26_s16 = int_to_ptr.vmem [resolvable:$true] %s25_s16 }
   0x6   :  { %s3087_s17 = scalar_lea.vmem %s26_s16, 1024  ;;  %p3092_p1 = scmp.lt.s32.totalorder %s26_s16, %s26_s16 }
   0x7   :  { %p3088_p0 = scmp.ne.s32.totalorder %s26_s16, %s3087_s17  ;;  %p3093_p2 = scmp.lt.s32.totalorder %s3087_s17, %s3087_s17 }
   0x9   :  { %p3094_p3 = por %p3093_p2, %p3092_p1 }
   0xb   :  { %p3095_p4 = pnand %p3094_p3, %p3088_p0 }
   0xd   :  { %3098 = shalt.err (!%p3095_p4)
}
   0xe   :  { %s3149_s18 = smov 512   ;;  %s3150_s19 = smov 32  }
   0xf   :  { %31 = dma.hbm_to_vmem [thread:$0]  %s6518_s1, 1024, %s26_s16, [#allocation3], %s3149_s18, %s3149_s18, %s3150_s19  }
  0x10   :  { %s3151_s22 = smov [#allocation7]  }
  0x11   :  { %s37_s23 = sshll.u32 %s3151_s22, 4  ;;  %s38_s23 = int_to_ptr.vmem [resolvable:$true] %s37_s23 }
  0x12   :  { %s3107_s0 = scalar_lea.vmem %s38_s23, 128  ;;  %p3112_p6 = scmp.lt.s32.totalorder %s38_s23, %s38_s23 }
  0x13   :  { %p3108_p5 = scmp.ne.s32.totalorder %s38_s23, %s3107_s0  ;;  %p3113_p7 = scmp.lt.s32.totalorder %s3107_s0, %s3107_s0 }
  0x15   :  { %p3114_p8 = por %p3113_p7, %p3112_p6 }
  0x17   :  { %p3115_p9 = pnand %p3114_p8, %p3108_p5 }
  0x19   :  { %3118 = shalt.err (!%p3115_p9)
}
  0x1a   :  { %s6596_s24 = smov 64   ;;  %s6597_s25 = smov 4  }
  0x1b   :  { %43 = dma.hbm_to_vmem [thread:$0]  %s6519_s2, 128, %s38_s23, [#allocation8], %s6596_s24, %s6596_s24, %s6597_s25  }
  0x1c   :  { %3139 = dma.done.wait [#allocation5], 16  }
  0x1d   :  { %3140 = vsyncadd [#allocation5], 4294967280 }
  0x1e   :  { %3141 = dma.done.wait [#allocation3], 1024  }
  0x1f   :  { %3142 = vsyncadd [#allocation3], 4294966272 }
  0x20   :  { %3143 = dma.done.wait [#allocation8], 128  }
  0x21   :  { %3144 = vsyncadd [#allocation8], 4294967168 }
  0x22   :  { %53 = sfence }
  0x23   :  { %v6521_v0 = vlaneseq  ;;  %v3199_v2 = vld [vmem:[#allocation7] sm:$0xf]  ;;  %v3210_v6 = vld [vmem:[#allocation7 + $0x4] sm:$0xf]  ;;  %s3154_s1 = smov 17   ;;  %s3155_s2 = smov 1  }
  0x24   :  { %s3156_s28 = smov 16   ;;  %s3157_s29 = smov 113   ;;  %v54_v23 = vld [vmem:[#allocation6] ss:$8 sm:$0xf]  ;;  %vm976_vm8 = vcmask 1040384  }
  0x25   :  { %v3197_v1 = vshrl.u32 %v6521_v0, 7  ;;  %s6604_s30 = smov 112   ;;  %s6602_s4 = smov 15   ;;  %v3396_v22 = vand.u32 127, %v6521_v0 }
  0x26   :  { %s6600_s5 = smov 127   ;;  %s6598_s6 = smov 111   ;;  %v3400_v26 = vld [vmem:[#allocation6 + $0x3] ss:$8 sm:$0xf] }
  0x27   :  { %6707 = vst [vmem:[#allocation14_spill] sm:$0xff] %v3197_v1  ;;  %v3202_v3 = vsub.s32 3, %v3197_v1  ;;  %v3205_v4 = vsub.s32 0, %v3197_v1  ;;  %v3208_v5 = vsub.s32 1, %v3197_v1  ;;  %v3257_v13 = vsub.s32 2, %v3197_v1  ;;  %s3357_s7 = sld [smem:[#allocation2]] }
  0x28   :  { %s3359_s8 = sld [smem:[#allocation2 + $0x12]]  ;;  %vm426_vm0 = vcmp.lt.s32.totalorder %v3396_v22, 1  ;;  %vm143_vm1 = vcmp.lt.s32.totalorder %v3396_v22, 17  ;;  %vm246_vm2 = vcmp.lt.s32.totalorder %v3396_v22, 16  ;;  %vm706_vm3 = vcmp.lt.s32.totalorder %v3396_v22, 113 }
  0x29   :  { %6708 = vst [vmem:[#allocation15_spill] sm:$0xff] %v3202_v3  ;;  %6709 = vst [vmem:[#allocation16_spill] sm:$0xff] %v3205_v4  ;;  %v3214_v7 = vrot.slane %v3199_v2, %v3202_v3  ;;  %v3218_v8 = vrot.slane %v3199_v2, %v3205_v4  ;;  %v3226_v9 = vrot.slane %v3210_v6, %v3205_v4  ;;  %s3365_s9 = sld [smem:[#allocation2 + $0x9]]  ;;  %vm788_vm4 = vcmp.lt.s32.totalorder %v3396_v22, 112 }
  0x2a   :  { %6710 = vst [vmem:[#allocation17_spill] sm:$0xff] %v3208_v5  ;;  %v3230_v10 = vrot.slane %v3199_v2, %v3208_v5  ;;  %v3238_v11 = vrot.slane %v3210_v6, %v3202_v3  ;;  %v3242_v12 = vrot.slane %v3210_v6, %v3208_v5  ;;  %6711 = vst [vmem:[#allocation18_spill] sm:$0xff] %v3257_v13  ;;  %s3371_s10 = sld [smem:[#allocation2 + $0x1b]]  ;;  %vm336_vm5 = vcmp.lt.s32.totalorder %v3396_v22, 15 }
  0x2b   :  { %139 = vrot.lane.b32.xlu1 %v3214_v7, %s3154_s1  ;;  %133 = vrot.lane.b32.xlu0 %v3218_v8, %s3154_s1  ;;  %v3265_v14 = vrot.slane %v3210_v6, %v3257_v13  ;;  %v124_v15 = vrot.slane %v3199_v2, %v3257_v13  ;;  %s3373_s11 = sld [smem:[#allocation2 + $0x4]]  ;;  %v3405_v28 = vrot.slane %v54_v23, %v3205_v4  ;;  %vm616_vm6 = vcmp.lt.s32.totalorder %v3396_v22, 127 }
  0x2c   :  { %s3379_s12 = sld [smem:[#allocation2 + $0x3]]  ;;  %v3408_v29 = vrot.slane %v54_v23, %v3208_v5  ;;  %v3412_v30 = vrot.slane %v3400_v26, %v3208_v5  ;;  %v3416_v31 = vrot.slane %v3400_v26, %v3205_v4  ;;  %v3459_v50 = vrot.slane %v54_v23, %v3257_v13 }
  0x2d   :  { %s3381_s13 = sld [smem:[#allocation2 + $0x16]]  ;;  %6712 = vst [vmem:[#allocation19_spill] sm:$0xff] %v3405_v28  ;;  %v3420_v33 = vstv %s3357_s7  ;;  %v3474_v56 = vrot.slane %v54_v23, %v3202_v3  ;;  %vm878_vm7 = vcmp.lt.s32.totalorder %v3396_v22, 111 }
  0x2e   :  { %s2943_s14 = sld [smem:[#allocation2 + $0x15]]  ;;  %6713 = vst [vmem:[#allocation20_spill] sm:$0xff] %v3408_v29  ;;  %6714 = vst [vmem:[#allocation21_spill] sm:$0xff] %v3412_v30  ;;  %v3423_v34 = vstv %s3359_s8 }
  0x2f   :  { %204 = vrot.lane.b32.xlu1 %v3226_v9, %s3154_s1  ;;  %135 = vrot.lane.b32.xlu0 %v3230_v10, %s3154_s1  ;;  %s3387_s15 = sld [smem:[#allocation2 + $0xd]]  ;;  %6715 = vst [vmem:[#allocation22_spill] sm:$0xff] %v3416_v31  ;;  %v3434_v39 = vstv %s3365_s9  ;;  %6716 = vst [vmem:[#allocation23_spill] sm:$0xff] %v3459_v50 }
  0x30   :  { %s3393_s16 = sld [smem:[#allocation2 + $0x1f]]  ;;  %v3437_v40 = vstv %s3371_s10  ;;  %6717 = vst [vmem:[#allocation24_spill] sm:$0xff] %v3474_v56 }
  0x31   :  { %s2934_s17 = sld [smem:[#allocation2 + $0xc]]  ;;  %v500_v27 = vstv %s3373_s11 }
  0x32   :  { %s2952_s18 = sld [smem:[#allocation2 + $0x1e]]  ;;  %v3431_v38 = vmul.f32 %v500_v27, %v3199_v2  ;;  %v3440_v41 = vstv %s3379_s12 }
  0x33   :  { %210 = vrot.lane.b32.xlu1 %v3238_v11, %s3154_s1  ;;  %206 = vrot.lane.b32.xlu0 %v3242_v12, %s3154_s1  ;;  %v527_v32 = vstv %s3381_s13  ;;  %s3450_s19 = sld [smem:[#allocation2 + $0x1]] }
  0x34   :  { %v3445_v43 = vstv %s2943_s14  ;;  %v3448_v44 = vmul.f32 %v527_v32, %v3199_v2  ;;  %s3461_s20 = sld [smem:[#allocation2 + $0x13]]  ;;  %v506_v53 = vrot.slane %v3431_v38, %v3205_v4  ;;  %v510_v55 = vrot.slane %v3431_v38, %v3208_v5 }
  0x35   :  { %v554_v45 = vstv %s3387_s15  ;;  %s3482_s21 = sld [smem:[#allocation2 + $0x6]] }
  0x36   :  { %v581_v46 = vstv %s3393_s16  ;;  %v3485_v59 = vmul.f32 %v554_v45, %v3210_v6  ;;  %v533_v62 = vrot.slane %v3448_v44, %v3205_v4  ;;  %v537_v2 = vrot.slane %v3448_v44, %v3208_v5  ;;  %s3498_s22 = sld [smem:[#allocation2 + $0x18]] }
  0x37   :  { %420 = vrot.lane.b32.xlu1 %v3230_v10, %s3155_s2  ;;  %418 = vrot.lane.b32.xlu0 %v3218_v8, %s3155_s2  ;;  %v3456_v49 = vstv %s2934_s17  ;;  %v3488_v60 = vmul.f32 %v581_v46, %v3210_v6  ;;  %s3504_s23 = sld [smem:[#allocation2 + $0xf]] }
  0x38   :  { %v3465_v52 = vstv %s2952_s18  ;;  %s3514_s0 = sld [smem:[#allocation2 + $0x21]]  ;;  %v560_v32 = vrot.slane %v3485_v59, %v3205_v4 }
  0x39   :  { %s3520_s26 = sld [smem:[#allocation2 + $0xa]] }
  0x3a   :  { %s3528_s27 = sld [smem:[#allocation2 + $0x1c]] }
  0x3b   :  { %466 = vrot.lane.b32.xlu1 %v3226_v9, %s3155_s2  ;;  %424 = vrot.lane.b32.xlu0 %v3214_v7, %s3155_s2  ;;  %s3540_s7 = sld [smem:[#allocation2 + $0x7]] }
  0x3c   :  { %s3552_s8 = sld [smem:[#allocation2 + $0x19]] }
  0x3d   :  { %s3565_s9 = sld [smem:[#allocation2 + $0x2]] }
  0x3e   :  { %s3574_s10 = sld [smem:[#allocation2 + $0x14]] }
  0x3f   :  { %472 = vrot.lane.b32.xlu1 %v3238_v11, %s3155_s2  ;;  %468 = vrot.lane.b32.xlu0 %v3242_v12, %s3155_s2  ;;  %s3579_s11 = sld [smem:[#allocation2 + $0x5]] }
  0x40   :  { %s3620_s12 = sld [smem:[#allocation2 + $0x17]] }
  0x41   :  { %s3637_s13 = sld [smem:[#allocation2 + $0x10]] }
  0x42   :  { %s3651_s14 = sld [smem:[#allocation2 + $0x22]] }
  0x43   :  { %208 = vrot.lane.b32.xlu1 %v3265_v14, %s3154_s1  ;;  %137 = vrot.lane.b32.xlu0 %v124_v15, %s3154_s1  ;;  %s3665_s15 = sld [smem:[#allocation2 + $0xb]] }
  0x44   :  { %s3679_s16 = sld [smem:[#allocation2 + $0x1d]] }
  0x45   :  { %s3690_s17 = sld [smem:[#allocation2 + $0xe]] }
  0x46   :  { %s3700_s18 = sld [smem:[#allocation2 + $0x20]] }
  0x47   :  { %240 = vrot.lane.b32.xlu1 %v3230_v10, %s3156_s28  ;;  %238 = vrot.lane.b32.xlu0 %v3218_v8, %s3156_s28  ;;  %s4620_s24 = sld [smem:[#allocation2 + $0x31]] }
  0x48   :  { %s4622_s25 = sld [smem:[#allocation2 + $0x43]] }
  0x4b   :  { %422 = vrot.lane.b32.xlu1 %v124_v15, %s3155_s2  ;;  %244 = vrot.lane.b32.xlu0 %v3214_v7, %s3156_s28 }
  0x4f   :  { %698 = vrot.lane.b32.xlu1 %v3218_v8, %s3157_s29  ;;  %470 = vrot.lane.b32.xlu0 %v3265_v14, %s3155_s2 }
  0x53   :  { %702 = vrot.lane.b32.xlu1 %v124_v15, %s3157_s29  ;;  %700 = vrot.lane.b32.xlu0 %v3230_v10, %s3157_s29 }
  0x57   :  { %748 = vrot.lane.b32.xlu1 %v3242_v12, %s3157_s29  ;;  %746 = vrot.lane.b32.xlu0 %v3226_v9, %s3157_s29 }
  0x5b   :  { %242 = vrot.lane.b32.xlu1 %v124_v15, %s3156_s28  ;;  %750 = vrot.lane.b32.xlu0 %v3265_v14, %s3157_s29 }
  0x5f   :  { %296 = vrot.lane.b32.xlu1 %v3242_v12, %s3156_s28  ;;  %294 = vrot.lane.b32.xlu0 %v3226_v9, %s3156_s28 }
  0x63   :  { %704 = vrot.lane.b32.xlu1 %v3214_v7, %s3157_s29  ;;  %300 = vrot.lane.b32.xlu0 %v3238_v11, %s3156_s28 }
  0x67   :  { %780 = vrot.lane.b32.xlu1 %v3218_v8, %s6604_s30  ;;  %752 = vrot.lane.b32.xlu0 %v3238_v11, %s3157_s29 }
  0x6b   :  { %784 = vrot.lane.b32.xlu1 %v124_v15, %s6604_s30  ;;  %782 = vrot.lane.b32.xlu0 %v3230_v10, %s6604_s30 }
  0x6f   :  { %328 = vrot.lane.b32.xlu1 %v3218_v8, %s6602_s4  ;;  %298 = vrot.lane.b32.xlu0 %v3265_v14, %s3156_s28 }
  0x73   :  { %334 = vrot.lane.b32.xlu1 %v3214_v7, %s6602_s4  ;;  %330 = vrot.lane.b32.xlu0 %v3230_v10, %s6602_s4 }
  0x77   :  { %610 = vrot.lane.b32.xlu1 %v3230_v10, %s6600_s5  ;;  %608 = vrot.lane.b32.xlu0 %v3218_v8, %s6600_s5 }
  0x7b   :  { %786 = vrot.lane.b32.xlu1 %v3214_v7, %s6604_s30  ;;  %612 = vrot.lane.b32.xlu0 %v124_v15, %s6600_s5 }
  0x7f   :  { %838 = vrot.lane.b32.xlu1 %v3242_v12, %s6604_s30  ;;  %836 = vrot.lane.b32.xlu0 %v3226_v9, %s6604_s30 }
  0x83   :  { %332 = vrot.lane.b32.xlu1 %v124_v15, %s6602_s4  ;;  %840 = vrot.lane.b32.xlu0 %v3265_v14, %s6604_s30 }
  0x87   :  { %386 = vrot.lane.b32.xlu1 %v3242_v12, %s6602_s4  ;;  %384 = vrot.lane.b32.xlu0 %v3226_v9, %s6602_s4 }
  0x8b   :  { %614 = vrot.lane.b32.xlu1 %v3214_v7, %s6600_s5  ;;  %390 = vrot.lane.b32.xlu0 %v3238_v11, %s6602_s4 }
  0x8f   :  { %666 = vrot.lane.b32.xlu1 %v3242_v12, %s6600_s5  ;;  %664 = vrot.lane.b32.xlu0 %v3226_v9, %s6600_s5 }
  0x93   :  { %842 = vrot.lane.b32.xlu1 %v3238_v11, %s6604_s30  ;;  %668 = vrot.lane.b32.xlu0 %v3265_v14, %s6600_s5 }
  0x97   :  { %872 = vrot.lane.b32.xlu1 %v3230_v10, %s6598_s6  ;;  %870 = vrot.lane.b32.xlu0 %v3218_v8, %s6598_s6 }
  0x9b   :  { %388 = vrot.lane.b32.xlu1 %v3265_v14, %s6602_s4  ;;  %874 = vrot.lane.b32.xlu0 %v124_v15, %s6598_s6 }
  0x9d   :  { %v3353_v16 = vpop.permute.xlu1 %139  ;;  %v3355_v17 = vpop.permute.xlu0 %133 }
  0x9f   :  { %876 = vrot.lane.b32.xlu1 %v3214_v7, %s6598_s6  ;;  %670 = vrot.lane.b32.xlu0 %v3238_v11, %s6600_s5  ;;  %v3496_v7 = vld [vmem:[#allocation6 + $0x1] ss:$8 sm:$0xf] }
  0xa0   :  { %v3518_v27 = vrot.slane %v3496_v7, %v3208_v5 }
  0xa1   :  { %v3367_v18 = vpop.permute.xlu1 %204  ;;  %v3369_v19 = vpop.permute.xlu0 %135 }
  0xa2   :  { %6718 = vst [vmem:[#allocation25_spill] sm:$0xff] %v3518_v27 }
  0xa3   :  { %928 = vrot.lane.b32.xlu1 %v3242_v12, %s6598_s6  ;;  %926 = vrot.lane.b32.xlu0 %v3226_v9, %s6598_s6 }
  0xa5   :  { %v3383_v20 = vpop.permute.xlu1 %210  ;;  %v3385_v21 = vpop.permute.xlu0 %206 }
  0xa7   :  { %932 = vrot.lane.b32.xlu1 %v3238_v11, %s6598_s6  ;;  %930 = vrot.lane.b32.xlu0 %v3265_v14, %s6598_s6 }
  0xa9   :  { %v3398_v24 = vpop.permute.xlu1 %420  ;;  %v419_v25 = vpop.permute.xlu0 %418 }
  0xaa   :  { %v429_v35 = vsel %vm426_vm0, %v419_v25, %v3398_v24 }
  0xab   :  { %v453_v47 = vmul.f32 %v3412_v30, %v429_v35  ;;  %v587_v35 = vrot.slane %v3488_v60, %v3205_v4 }
  0xad   :  { %v467_v36 = vpop.permute.xlu1 %466  ;;  %v3428_v37 = vpop.permute.xlu0 %424  ;;  %v458_v8 = vmul.f32 %v3440_v41, %v453_v47  ;;  %v463_v9 = vmul.f32 %v3445_v43, %v453_v47 }
  0xae   :  { %v430_v42 = vsel %vm426_vm0, %v3428_v37, %v419_v25 }
  0xaf   :  { %v452_v48 = vmul.f32 %v3416_v31, %v430_v42 }
  0xb1   :  { %v3463_v51 = vpop.permute.xlu1 %472  ;;  %v3469_v54 = vpop.permute.xlu0 %468  ;;  %v457_v6 = vmul.f32 %v3440_v41, %v452_v48  ;;  %v462_v10 = vmul.f32 %v3445_v43, %v452_v48  ;;  %v64_v48 = vld [vmem:[#allocation6 + $0x6] ss:$8 sm:$0xf] }
  0xb2   :  { %v477_v57 = vsel %vm426_vm0, %v3463_v51, %v467_v36  ;;  %v476_v58 = vsel %vm426_vm0, %v467_v36, %v3469_v54  ;;  %v564_v36 = vrot.slane %v3485_v59, %v3208_v5  ;;  %v3635_v1 = vrot.slane %v64_v48, %v3202_v3 }
  0xb3   :  { %v478_v61 = vmul.f32 %v477_v57, %v3416_v31  ;;  %v479_v63 = vmul.f32 %v476_v58, %v3412_v30  ;;  %v3531_v57 = vstv %s3450_s19  ;;  %v3534_v58 = vstv %s3461_s20  ;;  %s3706_s19 = sld [smem:[#allocation2 + $0x8]] }
  0xb4   :  { %v3614_v31 = vrot.slane %v3496_v7, %v3257_v13  ;;  %v3632_v30 = vrot.slane %v64_v48, %v3257_v13  ;;  %6732 = vst [vmem:[#allocation39_spill] sm:$0xff] %v3635_v1  ;;  %s3721_s20 = sld [smem:[#allocation2 + $0x1a]] }
  0xb5   :  { %v483_v11 = vmul.f32 %v3456_v49, %v478_v61  ;;  %v492_v12 = vmul.f32 %v3465_v52, %v478_v61  ;;  %v484_v14 = vmul.f32 %v3456_v49, %v479_v63  ;;  %v493_v15 = vmul.f32 %v3465_v52, %v479_v63  ;;  %v3510_v23 = vpop.permute.xlu1 %208  ;;  %v3512_v25 = vpop.permute.xlu0 %137 }
  0xb6   :  { %v3538_v61 = vrot.slane %v3400_v26, %v3257_v13  ;;  %v591_v63 = vrot.slane %v3488_v60, %v3208_v5  ;;  %6727 = vst [vmem:[#allocation34_spill] sm:$0xff] %v3614_v31  ;;  %6731 = vst [vmem:[#allocation38_spill] sm:$0xff] %v3632_v30 }
  0xb7   :  { %v487_v42 = vadd.f32 %v483_v11, %v457_v6  ;;  %v496_v45 = vadd.f32 %v492_v12, %v462_v10  ;;  %v488_v46 = vadd.f32 %v484_v14, %v458_v8  ;;  %v497_v47 = vadd.f32 %v493_v15, %v463_v9 }
  0xb8   :  { %6719 = vst [vmem:[#allocation26_spill] sm:$0xff] %v3538_v61  ;;  %v3550_v12 = vrot.slane %v3400_v26, %v3202_v3  ;;  %v3556_v14 = vrot.slane %v3496_v7, %v3205_v4 }
  0xb9   :  { %v523_v6 = vadd.f32 %v506_v53, %v487_v42  ;;  %v550_v10 = vadd.f32 %v533_v62, %v496_v45  ;;  %v524_v8 = vadd.f32 %v510_v55, %v488_v46  ;;  %v3544_v9 = vpop.permute.xlu1 %240  ;;  %v3546_v11 = vpop.permute.xlu0 %238  ;;  %v3563_v62 = vrot.slane %v64_v48, %v3205_v4 }
  0xba   :  { %6720 = vst [vmem:[#allocation27_spill] sm:$0xff] %v3550_v12  ;;  %6721 = vst [vmem:[#allocation28_spill] sm:$0xff] %v3556_v14  ;;  %v551_v26 = vadd.f32 %v537_v2, %v497_v47  ;;  %v3572_v45 = vrot.slane %v64_v48, %v3208_v5  ;;  %v3577_v46 = vstv %s3482_s21  ;;  %v3590_v42 = vstv %s3498_s22  ;;  %v3649_v48 = vld [vmem:[#allocation6 + $0x5] ss:$8 sm:$0xf]  ;;  %s3786_s21 = sld [smem:[#allocation2 + $0x11]] }
  0xbb   :  { %6722 = vst [vmem:[#allocation29_spill] sm:$0xff] %v3563_v62  ;;  %v3581_v0 = vadd.f32 %v560_v32, %v523_v6  ;;  %v3583_v2 = vadd.f32 %v587_v35, %v550_v10  ;;  %v3585_v47 = vadd.f32 %v564_v36, %v524_v8  ;;  %v3605_v6 = vstv %s3504_s23  ;;  %v66_v10 = vld [vmem:[#allocation6 + $0x7] ss:$8 sm:$0xf]  ;;  %s3808_s22 = sld [smem:[#allocation2 + $0x23]] }
  0xbc   :  { %6723 = vst [vmem:[#allocation30_spill] sm:$0xff] %v3572_v45  ;;  %v3610_v53 = vstv %s3514_s0  ;;  %v3618_v32 = vrot.slane %v3496_v7, %v3202_v3  ;;  %v3629_v8 = vstv %s3528_s27  ;;  %s2958_s23 = sld [smem:[#allocation2 + $0x26]] }
  0xbd   :  { %6724 = vst [vmem:[#allocation31_spill] sm:$0xff] %v3581_v0  ;;  %6725 = vst [vmem:[#allocation32_spill] sm:$0xff] %v3583_v2  ;;  %v423_v15 = vpop.permute.xlu1 %422  ;;  %v3587_v55 = vpop.permute.xlu0 %244  ;;  %v3647_v2 = vrot.slane %v66_v10, %v3208_v5  ;;  %v3654_v0 = vstv %s3540_s7  ;;  %s2960_s0 = sld [smem:[#allocation2 + $0x28]] }
  0xbe   :  { %6726 = vst [vmem:[#allocation33_spill] sm:$0xff] %v3585_v47  ;;  %v427_v35 = vsel %vm426_vm0, %v423_v15, %v3428_v37  ;;  %v428_v36 = vsel %vm426_vm0, %v3398_v24, %v423_v15  ;;  %6728 = vst [vmem:[#allocation35_spill] sm:$0xff] %v3618_v32  ;;  %v58_v37 = vld [vmem:[#allocation6 + $0x2] ss:$8 sm:$0xf]  ;;  %v3622_v24 = vadd.f32 %v591_v63, %v551_v26  ;;  %v3626_v15 = vstv %s3520_s26  ;;  %s2959_s26 = sld [smem:[#allocation2 + $0x27]] }
  0xbf   :  { %6730 = vst [vmem:[#allocation37_spill] sm:$0xff] %v3629_v8  ;;  %v454_v7 = vmul.f32 %v3538_v61, %v428_v36  ;;  %v455_v63 = vmul.f32 %v3550_v12, %v427_v35  ;;  %v3644_v47 = vrot.slane %v66_v10, %v3205_v4  ;;  %6734 = vst [vmem:[#allocation41_spill] sm:$0xff] %v3647_v2  ;;  %v3657_v36 = vstv %s3552_s8  ;;  %s2961_s27 = sld [smem:[#allocation2 + $0x29]] }
  0xc0   :  { %6729 = vst [vmem:[#allocation36_spill] sm:$0xff] %v3622_v24  ;;  %6735 = vst [vmem:[#allocation42_spill] sm:$0xff] %v3654_v0  ;;  %v3660_v35 = vrot.slane %v58_v37, %v3205_v4  ;;  %v3663_v1 = vrot.slane %v58_v37, %v3208_v5  ;;  %v3674_v8 = vstv %s3565_s9  ;;  %v3677_v0 = vstv %s3574_s10  ;;  %s4548_s7 = sld [smem:[#allocation2 + $0x2e]] }
  0xc1   :  { %v3641_v26 = vpop.permute.xlu1 %698  ;;  %v471_v24 = vpop.permute.xlu0 %470  ;;  %6733 = vst [vmem:[#allocation40_spill] sm:$0xff] %v3644_v47  ;;  %6736 = vst [vmem:[#allocation43_spill] sm:$0xff] %v3657_v36  ;;  %s4552_s8 = sld [smem:[#allocation2 + $0x40]] }
  0xc2   :  { %6737 = vst [vmem:[#allocation44_spill] sm:$0xff] %v3660_v35  ;;  %6738 = vst [vmem:[#allocation45_spill] sm:$0xff] %v3663_v1  ;;  %v474_v2 = vsel %vm426_vm0, %v471_v24, %v3463_v51  ;;  %v475_v47 = vsel %vm426_vm0, %v3469_v54, %v471_v24  ;;  %v3685_v35 = vrot.slane %v3649_v48, %v3205_v4  ;;  %v3688_v51 = vstv %s3579_s11  ;;  %s4556_s9 = sld [smem:[#allocation2 + $0x37]] }
  0xc3   :  { %6739 = vst [vmem:[#allocation46_spill] sm:$0xff] %v3674_v8  ;;  %6740 = vst [vmem:[#allocation47_spill] sm:$0xff] %v3677_v0  ;;  %v480_v36 = vmul.f32 %v475_v47, %v3538_v61  ;;  %v481_v1 = vmul.f32 %v474_v2, %v3550_v12  ;;  %v459_v54 = vmul.f32 %v3440_v41, %v454_v7  ;;  %s4560_s10 = sld [smem:[#allocation2 + $0x49]] }
  0xc4   :  { %6741 = vst [vmem:[#allocation48_spill] sm:$0xff] %v3685_v35  ;;  %6742 = vst [vmem:[#allocation49_spill] sm:$0xff] %v3688_v51  ;;  %v460_v24 = vmul.f32 %v3440_v41, %v455_v63  ;;  %v464_v0 = vmul.f32 %v3445_v43, %v454_v7  ;;  %v465_v8 = vmul.f32 %v3445_v43, %v455_v63  ;;  %v3709_v7 = vstv %s3620_s12  ;;  %s4562_s11 = sld [smem:[#allocation2 + $0x2a]] }
  0xc5   :  { %v3696_v47 = vpop.permute.xlu1 %702  ;;  %v3698_v2 = vpop.permute.xlu0 %700  ;;  %v485_v12 = vmul.f32 %v3456_v49, %v480_v36  ;;  %v486_v61 = vmul.f32 %v3456_v49, %v481_v1  ;;  %v494_v51 = vmul.f32 %v3465_v52, %v480_v36  ;;  %v495_v41 = vmul.f32 %v3465_v52, %v481_v1  ;;  %6743 = vst [vmem:[#allocation50_spill] sm:$0xff] %v3709_v7  ;;  %s4566_s12 = sld [smem:[#allocation2 + $0x3c]] }
  0xc6   :  { %v3712_v43 = vrot.slane %v66_v10, %v3257_v13  ;;  %v3715_v63 = vrot.slane %v66_v10, %v3202_v3  ;;  %v3719_v35 = vrot.slane %v3649_v48, %v3208_v5  ;;  %v3732_v10 = vstv %s3651_s14  ;;  %s4574_s14 = sld [smem:[#allocation2 + $0x45]] }
  0xc7   :  { %v489_v49 = vadd.f32 %v485_v12, %v459_v54  ;;  %v490_v1 = vadd.f32 %v486_v61, %v460_v24  ;;  %v498_v52 = vadd.f32 %v494_v51, %v464_v0  ;;  %v499_v36 = vadd.f32 %v495_v41, %v465_v8 }
  0xc8   :  { %6744 = vst [vmem:[#allocation51_spill] sm:$0xff] %v3712_v43  ;;  %6745 = vst [vmem:[#allocation52_spill] sm:$0xff] %v3715_v63  ;;  %v3729_v43 = vstv %s3637_s13  ;;  %v3735_v63 = vrot.slane %v58_v37, %v3257_v13  ;;  %v6749_v61 = vrot.slane %v3431_v38, %v3257_v13  ;;  %v6750_v0 = vrot.slane %v3431_v38, %v3202_v3  ;;  %s4572_s13 = sld [smem:[#allocation2 + $0x33]] }
  0xc9   :  { %6746 = vst [vmem:[#allocation53_spill] sm:$0xff] %v3719_v35  ;;  %v3724_v7 = vpop.permute.xlu1 %748  ;;  %v3726_v30 = vpop.permute.xlu0 %746  ;;  %v3738_v35 = vrot.slane %v58_v37, %v3202_v3  ;;  %v6751_v51 = vrot.slane %v3448_v44, %v3257_v13  ;;  %v6752_v24 = vrot.slane %v3448_v44, %v3202_v3  ;;  %v147_v37 = vsel %vm143_vm1, %v3353_v16, %v3355_v17 }
  0xca   :  { %6747 = vst [vmem:[#allocation54_spill] sm:$0xff] %v3735_v63  ;;  %v525_v12 = vadd.f32 %v6749_v61, %v489_v49  ;;  %v526_v8 = vadd.f32 %v6750_v0, %v490_v1  ;;  %v215_v38 = vsel %vm143_vm1, %v3383_v20, %v3367_v18  ;;  %v214_v49 = vsel %vm143_vm1, %v3367_v18, %v3385_v21 }
  0xcb   :  { %6748 = vst [vmem:[#allocation55_spill] sm:$0xff] %v3738_v35  ;;  %v552_v54 = vadd.f32 %v6751_v51, %v498_v52  ;;  %v553_v41 = vadd.f32 %v6752_v24, %v499_v36  ;;  %v3765_v1 = vstv %s3665_s15  ;;  %v6753_v44 = vrot.slane %v3485_v59, %v3257_v13  ;;  %v68_v24 = vld [vmem:[#allocation6 + $0x20] ss:$8 sm:$0xf]  ;;  %s4580_s15 = sld [smem:[#allocation2 + $0x2d]] }
  0xcc   :  { %v6755_v36 = vrot.slane %v3485_v59, %v3202_v3  ;;  %v6757_v0 = vrot.slane %v3488_v60, %v3257_v13  ;;  %v3784_v18 = vrot.slane %v3649_v48, %v3257_v13  ;;  %v146_v59 = vsel %vm143_vm1, %v3355_v17, %v3369_v19 }
  0xcd   :  { %v3770_v52 = vadd.f32 %v6753_v44, %v525_v12  ;;  %v3792_v12 = vpop.permute.xlu1 %242  ;;  %v6761_v44 = vrot.slane %v3488_v60, %v3202_v3  ;;  %v216_v17 = vmul.f32 %v215_v38, %v3405_v28  ;;  %v3821_v60 = vrot.slane %v68_v24, %v3205_v4 }
  0xce   :  { %v3775_v61 = vadd.f32 %v6755_v36, %v526_v8  ;;  %v3780_v51 = vadd.f32 %v6757_v0, %v552_v54  ;;  %6759 = vst [vmem:[#allocation59_spill] sm:$0xff] %v3784_v18  ;;  %v3794_v8 = vpop.permute.xlu0 %750  ;;  %v3797_v54 = vstv %s3679_s16  ;;  %v3806_v0 = vrot.slane %v3649_v48, %v3202_v3  ;;  %s4584_s16 = sld [smem:[#allocation2 + $0x3f]] }
  0xcf   :  { %6754 = vst [vmem:[#allocation56_spill] sm:$0xff] %v3770_v52  ;;  %6760 = vst [vmem:[#allocation60_spill] sm:$0xff] %v3797_v54  ;;  %v3802_v36 = vadd.f32 %v6761_v44, %v553_v41  ;;  %v3815_v52 = vstv %s3690_s17  ;;  %v3818_v54 = vstv %s3700_s18  ;;  %v3824_v41 = vstv %s3706_s19  ;;  %s4586_s17 = sld [smem:[#allocation2 + $0x36]] }
  0xd0   :  { %6756 = vst [vmem:[#allocation57_spill] sm:$0xff] %v3775_v61  ;;  %6758 = vst [vmem:[#allocation58_spill] sm:$0xff] %v3780_v51  ;;  %v169_v51 = vmul.f32 %v3405_v28, %v147_v37  ;;  %v217_v61 = vmul.f32 %v214_v49, %v3408_v29  ;;  %v3827_v48 = vstv %s3721_s20  ;;  %v170_v44 = vmul.f32 %v3408_v29, %v146_v59  ;;  %s4590_s18 = sld [smem:[#allocation2 + $0x48]] }
  0xd1   :  { %6762 = vst [vmem:[#allocation61_spill] sm:$0xff] %v3802_v36  ;;  %6763 = vst [vmem:[#allocation62_spill] sm:$0xff] %v3806_v0  ;;  %v212_v37 = vsel %vm143_vm1, %v3510_v23, %v3383_v20  ;;  %v213_v38 = vsel %vm143_vm1, %v3385_v21, %v3510_v23  ;;  %v145_v49 = vsel %vm143_vm1, %v3369_v19, %v3512_v25  ;;  %v3846_v28 = vpop.permute.xlu1 %296  ;;  %s4594_s19 = sld [smem:[#allocation2 + $0x2b]] }
  0xd2   :  { %6764 = vst [vmem:[#allocation63_spill] sm:$0xff] %v3815_v52  ;;  %6765 = vst [vmem:[#allocation64_spill] sm:$0xff] %v3818_v54  ;;  %v144_v59 = vsel %vm143_vm1, %v3512_v25, %v3353_v16  ;;  %v3848_v29 = vpop.permute.xlu0 %294  ;;  %v3851_v20 = vrot.slane %v68_v24, %v3208_v5  ;;  %v3854_v4 = vrot.slane %v68_v24, %v3257_v13  ;;  %s4598_s20 = sld [smem:[#allocation2 + $0x3d]] }
  0xd3   :  { %6766 = vst [vmem:[#allocation65_spill] sm:$0xff] %v3821_v60  ;;  %6767 = vst [vmem:[#allocation66_spill] sm:$0xff] %v3824_v41  ;;  %v3857_v21 = vrot.slane %v68_v24, %v3202_v3  ;;  %v174_v19 = vmul.f32 %v3420_v33, %v169_v51  ;;  %v221_v23 = vmul.f32 %v3434_v39, %v216_v17 }
  0xd4   :  { %6768 = vst [vmem:[#allocation67_spill] sm:$0xff] %v3827_v48  ;;  %6769 = vst [vmem:[#allocation68_spill] sm:$0xff] %v3851_v20  ;;  %v230_v16 = vmul.f32 %v3437_v40, %v216_v17  ;;  %v222_v25 = vmul.f32 %v3434_v39, %v217_v61  ;;  %v218_v48 = vmul.f32 %v213_v38, %v3459_v50  ;;  %v3884_v20 = vstv %s3786_s21  ;;  %s4600_s21 = sld [smem:[#allocation2 + $0x30]] }
  0xd5   :  { %6770 = vst [vmem:[#allocation69_spill] sm:$0xff] %v3854_v4  ;;  %6771 = vst [vmem:[#allocation70_spill] sm:$0xff] %v3857_v21  ;;  %v219_v5 = vmul.f32 %v212_v37, %v3474_v56  ;;  %v171_v13 = vmul.f32 %v3459_v50, %v145_v49  ;;  %v249_v24 = vsel %vm246_vm2, %v3546_v11, %v3544_v9  ;;  %v3879_v49 = vpop.permute.xlu1 %704 }
  0xd6   :  { %v179_v3 = vmul.f32 %v3423_v34, %v169_v51  ;;  %v175_v21 = vmul.f32 %v3420_v33, %v170_v44  ;;  %v172_v4 = vmul.f32 %v3474_v56, %v144_v59  ;;  %v250_v17 = vsel %vm246_vm2, %v3587_v55, %v3546_v11  ;;  %v3881_v50 = vpop.permute.xlu0 %300  ;;  %6772 = vst [vmem:[#allocation71_spill] sm:$0xff] %v3884_v20 }
  0xd7   :  { %v180_v37 = vmul.f32 %v3423_v34, %v170_v44  ;;  %v231_v38 = vmul.f32 %v3437_v40, %v217_v61  ;;  %v3887_v51 = vstv %s3808_s22  ;;  %v225_v41 = vadd.f32 %v221_v23, %v174_v19  ;;  %s4604_s22 = sld [smem:[#allocation2 + $0x42]] }
  0xd8   :  { %6773 = vst [vmem:[#allocation72_spill] sm:$0xff] %v3887_v51  ;;  %v234_v60 = vadd.f32 %v230_v16, %v179_v3  ;;  %v226_v59 = vadd.f32 %v222_v25, %v175_v21  ;;  %v273_v56 = vmul.f32 %v3518_v27, %v249_v24  ;;  %v223_v36 = vmul.f32 %v3434_v39, %v218_v48 }
  0xd9   :  { %v224_v11 = vmul.f32 %v3434_v39, %v219_v5  ;;  %v176_v44 = vmul.f32 %v3420_v33, %v171_v13  ;;  %v272_v61 = vmul.f32 %v3556_v14, %v250_v17  ;;  %v232_v52 = vmul.f32 %v3437_v40, %v218_v48 }
  0xda   :  { %v233_v54 = vmul.f32 %v3437_v40, %v219_v5  ;;  %v177_v20 = vmul.f32 %v3420_v33, %v172_v4  ;;  %v756_v3 = vsel %vm706_vm3, %v3726_v30, %v3724_v7  ;;  %v181_v21 = vmul.f32 %v3423_v34, %v171_v13  ;;  %v3911_v33 = vpop.permute.xlu1 %780  ;;  %v753_v40 = vpop.permute.xlu0 %752 }
  0xdb   :  { %v182_v19 = vmul.f32 %v3423_v34, %v172_v4  ;;  %v709_v39 = vsel %vm706_vm3, %v3641_v26, %v3698_v2  ;;  %v248_v5 = vsel %vm246_vm2, %v3544_v9, %v3792_v12  ;;  %v278_v48 = vmul.f32 %v3531_v57, %v273_v56 }
  0xdc   :  { %v287_v23 = vmul.f32 %v3534_v58, %v273_v56  ;;  %v708_v4 = vsel %vm706_vm3, %v3698_v2, %v3696_v47  ;;  %v247_v13 = vsel %vm246_vm2, %v3792_v12, %v3587_v55  ;;  %v235_v34 = vadd.f32 %v231_v38, %v180_v37 }
  0xdd   :  { %v227_v16 = vadd.f32 %v223_v36, %v176_v44  ;;  %v277_v9 = vmul.f32 %v3531_v57, %v272_v61  ;;  %v758_v25 = vmul.f32 %v756_v3, %v3563_v62  ;;  %v286_v24 = vmul.f32 %v3534_v58, %v272_v61 }
  0xde   :  { %v732_v56 = vmul.f32 %v3563_v62, %v709_v39  ;;  %v274_v17 = vmul.f32 %v3614_v31, %v248_v5  ;;  %v755_v2 = vsel %vm706_vm3, %v3724_v7, %v3794_v8  ;;  %v228_v55 = vadd.f32 %v224_v11, %v177_v20  ;;  %v3939_v38 = vpop.permute.xlu1 %784  ;;  %v783_v44 = vpop.permute.xlu0 %782 }
  0xdf   :  { %v733_v12 = vmul.f32 %v3572_v45, %v708_v4  ;;  %v275_v36 = vmul.f32 %v3618_v32, %v247_v13  ;;  %v304_v37 = vsel %vm246_vm2, %v3848_v29, %v3846_v28  ;;  %v236_v61 = vadd.f32 %v232_v52, %v181_v21 }
  0xe0   :  { %v237_v3 = vadd.f32 %v233_v54, %v182_v19  ;;  %v282_v39 = vadd.f32 %v278_v48, %v226_v59  ;;  %v291_v5 = vadd.f32 %v287_v23, %v235_v34  ;;  %v3941_v7 = vadd.f32 %v277_v9, %v225_v41 }
  0xe1   :  { %v763_v20 = vmul.f32 %v3605_v6, %v758_v25  ;;  %v772_v11 = vmul.f32 %v3610_v53, %v758_v25  ;;  %v759_v4 = vmul.f32 %v755_v2, %v3572_v45  ;;  %v290_v13 = vadd.f32 %v286_v24, %v234_v60 }
  0xe2   :  { %v737_v62 = vmul.f32 %v3577_v46, %v732_v56  ;;  %v279_v51 = vmul.f32 %v3531_v57, %v274_v17  ;;  %v307_v0 = vmul.f32 %v304_v37, %v3518_v27  ;;  %v738_v52 = vmul.f32 %v3577_v46, %v733_v12  ;;  %v329_v21 = vpop.permute.xlu1 %328  ;;  %v299_v19 = vpop.permute.xlu0 %298 }
  0xe3   :  { %v742_v54 = vmul.f32 %v3590_v42, %v732_v56  ;;  %v743_v41 = vmul.f32 %v3590_v42, %v733_v12  ;;  %v280_v59 = vmul.f32 %v3531_v57, %v275_v36  ;;  %v288_v60 = vmul.f32 %v3534_v58, %v274_v17 }
  0xe4   :  { %v289_v48 = vmul.f32 %v3534_v58, %v275_v36  ;;  %v305_v23 = vsel %vm246_vm2, %v3881_v50, %v3848_v29  ;;  %v754_v34 = vsel %vm706_vm3, %v3794_v8, %v753_v40  ;;  %v3963_v9 = vadd.f32 %v763_v20, %v737_v62 }
  0xe5   :  { %v3965_v25 = vadd.f32 %v772_v11, %v742_v54  ;;  %v764_v57 = vmul.f32 %v3605_v6, %v759_v4  ;;  %v707_v58 = vsel %vm706_vm3, %v3696_v47, %v3879_v49  ;;  %v3972_v24 = vadd.f32 %v279_v51, %v227_v16  ;;  %v6774_v51 = vld [vmem:[#allocation38_spill] sm:$0xff]  ;;  %v6776_v11 = vld [vmem:[#allocation39_spill] sm:$0xff] }
  0xe6   :  { %v773_v56 = vmul.f32 %v3610_v53, %v759_v4  ;;  %v312_v29 = vmul.f32 %v3626_v15, %v307_v0  ;;  %v710_v62 = vsel %vm706_vm3, %v3879_v49, %v3641_v26  ;;  %v3981_v8 = vadd.f32 %v280_v59, %v228_v55  ;;  %v3988_v2 = vpop.permute.xlu1 %334  ;;  %v3990_v12 = vpop.permute.xlu0 %330  ;;  %v6775_v26 = vld [vmem:[#allocation37_spill] sm:$0xff] }
  0xe7   :  { %v306_v17 = vmul.f32 %v305_v23, %v3556_v14  ;;  %v757_v47 = vsel %vm706_vm3, %v753_v40, %v3726_v30  ;;  %v760_v16 = vmul.f32 %v754_v34, %v6774_v51  ;;  %v3992_v36 = vadd.f32 %v288_v60, %v236_v61  ;;  %v6777_v34 = vld [vmem:[#allocation40_spill] sm:$0xff] }
  0xe8   :  { %v3994_v37 = vadd.f32 %v289_v48, %v237_v3  ;;  %v321_v49 = vmul.f32 %v6775_v26, %v307_v0  ;;  %v734_v55 = vmul.f32 %v6774_v51, %v707_v58  ;;  %v768_v20 = vadd.f32 %v764_v57, %v738_v52 }
  0xe9   :  { %v735_v4 = vmul.f32 %v6776_v11, %v710_v62  ;;  %v790_v30 = vsel %vm788_vm4, %v783_v44, %v3939_v38  ;;  %v791_v40 = vsel %vm788_vm4, %v3911_v33, %v783_v44  ;;  %v777_v54 = vadd.f32 %v773_v56, %v743_v41 }
  0xea   :  { %v4005_v61 = vadd.f32 %v312_v29, %v282_v39  ;;  %v761_v3 = vmul.f32 %v757_v47, %v6776_v11  ;;  %v303_v0 = vsel %vm246_vm2, %v3846_v28, %v299_v19  ;;  %v311_v52 = vmul.f32 %v3626_v15, %v306_v17  ;;  %v611_v44 = vpop.permute.xlu1 %610  ;;  %v4017_v41 = vpop.permute.xlu0 %608  ;;  %v6778_v28 = vld [vmem:[#allocation41_spill] sm:$0xff]  ;;  %v6779_v11 = vld [vmem:[#allocation42_spill] sm:$0xff] }
  0xeb   :  { %v320_v59 = vmul.f32 %v6775_v26, %v306_v17  ;;  %v765_v60 = vmul.f32 %v3605_v6, %v760_v16  ;;  %v302_v48 = vsel %vm246_vm2, %v299_v19, %v3881_v50  ;;  %v4019_v39 = vadd.f32 %v321_v49, %v291_v5 }
  0xec   :  { %v739_v23 = vmul.f32 %v3577_v46, %v734_v55  ;;  %v814_v57 = vmul.f32 %v6777_v34, %v791_v40  ;;  %v815_v58 = vmul.f32 %v6778_v28, %v790_v30  ;;  %v740_v56 = vmul.f32 %v3577_v46, %v735_v4 }
  0xed   :  { %v744_v29 = vmul.f32 %v3590_v42, %v734_v55  ;;  %v308_v62 = vmul.f32 %v303_v0, %v3614_v31  ;;  %v340_v50 = vsel %vm336_vm5, %v3988_v2, %v329_v21  ;;  %v745_v19 = vmul.f32 %v3590_v42, %v735_v4  ;;  %v6780_v4 = vld [vmem:[#allocation44_spill] sm:$0xff] }
  0xee   :  { %v766_v5 = vmul.f32 %v3605_v6, %v761_v3  ;;  %v774_v17 = vmul.f32 %v3610_v53, %v760_v16  ;;  %v309_v47 = vmul.f32 %v302_v48, %v3618_v32  ;;  %v315_v49 = vadd.f32 %v311_v52, %v3941_v7  ;;  %v787_v40 = vpop.permute.xlu1 %786  ;;  %v4038_v0 = vpop.permute.xlu0 %612  ;;  %v6781_v48 = vld [vmem:[#allocation43_spill] sm:$0xff]  ;;  %v6782_v32 = vld [vmem:[#allocation45_spill] sm:$0xff] }
  0xef   :  { %v324_v30 = vadd.f32 %v320_v59, %v290_v13  ;;  %v4035_v46 = vadd.f32 %v765_v60, %v739_v23  ;;  %v775_v55 = vmul.f32 %v3610_v53, %v761_v3  ;;  %v819_v51 = vmul.f32 %v6779_v11, %v814_v57 }
  0xf0   :  { %v820_v42 = vmul.f32 %v6779_v11, %v815_v58  ;;  %v362_v6 = vmul.f32 %v6780_v4, %v340_v50  ;;  %v339_v16 = vsel %vm336_vm5, %v329_v21, %v3990_v12  ;;  %v828_v7 = vmul.f32 %v6781_v48, %v814_v57 }
  0xf1   :  { %v829_v13 = vmul.f32 %v6781_v48, %v815_v58  ;;  %v313_v52 = vmul.f32 %v3626_v15, %v308_v62  ;;  %v619_v53 = vsel %vm616_vm6, %v4017_v41, %v611_v44  ;;  %v770_v3 = vadd.f32 %v766_v5, %v740_v56 }
  0xf2   :  { %v778_v59 = vadd.f32 %v774_v17, %v744_v29  ;;  %v314_v60 = vmul.f32 %v3626_v15, %v309_v47  ;;  %v322_v23 = vmul.f32 %v6775_v26, %v308_v62  ;;  %v323_v50 = vmul.f32 %v6775_v26, %v309_v47  ;;  %v839_v31 = vpop.permute.xlu1 %838  ;;  %v4062_v45 = vpop.permute.xlu0 %836  ;;  %v6783_v29 = vld [vmem:[#allocation46_spill] sm:$0xff]  ;;  %v6784_v26 = vld [vmem:[#allocation48_spill] sm:$0xff] }
  0xf3   :  { %v363_v21 = vmul.f32 %v6782_v32, %v339_v16  ;;  %v789_v57 = vsel %vm788_vm4, %v3939_v38, %v787_v40  ;;  %v792_v58 = vsel %vm788_vm4, %v787_v40, %v3911_v33  ;;  %v779_v56 = vadd.f32 %v775_v55, %v745_v19  ;;  %v6785_v40 = vld [vmem:[#allocation47_spill] sm:$0xff] }
  0xf4   :  { %v4065_v15 = vadd.f32 %v819_v51, %v3963_v9  ;;  %v367_v62 = vmul.f32 %v6783_v29, %v362_v6  ;;  %v642_v5 = vmul.f32 %v6784_v26, %v619_v53  ;;  %v4069_v17 = vadd.f32 %v820_v42, %v768_v20  ;;  %v6786_v19 = vld [vmem:[#allocation51_spill] sm:$0xff]  ;;  %v6787_v9 = vld [vmem:[#allocation52_spill] sm:$0xff] }
  0xf5   :  { %v4072_v47 = vadd.f32 %v828_v7, %v3965_v25  ;;  %v4074_v38 = vadd.f32 %v829_v13, %v777_v54  ;;  %v4077_v33 = vadd.f32 %v313_v52, %v3972_v24  ;;  %v376_v16 = vmul.f32 %v6785_v40, %v362_v6  ;;  %v6788_v52 = vld [vmem:[#allocation49_spill] sm:$0xff] }
  0xf6   :  { %v816_v55 = vmul.f32 %v6786_v19, %v789_v57  ;;  %v817_v51 = vmul.f32 %v6787_v9, %v792_v58  ;;  %v618_v53 = vsel %vm616_vm6, %v611_v44, %v4038_v0  ;;  %v4086_v20 = vadd.f32 %v314_v60, %v3981_v8  ;;  %v333_v42 = vpop.permute.xlu1 %332  ;;  %v4095_v6 = vpop.permute.xlu0 %840 }
  0xf7   :  { %v4089_v25 = vadd.f32 %v322_v23, %v3992_v36  ;;  %v4092_v54 = vadd.f32 %v323_v50, %v3994_v37  ;;  %v368_v24 = vmul.f32 %v6783_v29, %v363_v21  ;;  %v4097_v7 = vadd.f32 %v367_v62, %v315_v49  ;;  %v6789_v36 = vld [vmem:[#allocation50_spill] sm:$0xff]  ;;  %v6790_v23 = vld [vmem:[#allocation53_spill] sm:$0xff] }
  0xf8   :  { %v377_v13 = vmul.f32 %v6785_v40, %v363_v21  ;;  %v647_v44 = vmul.f32 %v6788_v52, %v642_v5  ;;  %v846_v8 = vsel %vm788_vm4, %v4062_v45, %v839_v31  ;;  %v656_v60 = vmul.f32 %v6789_v36, %v642_v5 }
  0xf9   :  { %v643_v37 = vmul.f32 %v6790_v23, %v618_v53  ;;  %v337_v50 = vsel %vm336_vm5, %v333_v42, %v3988_v2  ;;  %v338_v49 = vsel %vm336_vm5, %v3990_v12, %v333_v42  ;;  %v4112_v57 = vadd.f32 %v376_v16, %v324_v30 }
  0xfa   :  { %v821_v21 = vmul.f32 %v6779_v11, %v816_v55  ;;  %v822_v58 = vmul.f32 %v6779_v11, %v817_v51  ;;  %v845_v62 = vsel %vm788_vm4, %v839_v31, %v4095_v6  ;;  %v372_v5 = vadd.f32 %v368_v24, %v4005_v61  ;;  %v4123_v14 = vpop.permute.xlu1 %386  ;;  %v385_v12 = vpop.permute.xlu0 %384  ;;  %v6791_v61 = vld [vmem:[#allocation31_spill] sm:$0xff] }
  0xfb   :  { %v830_v53 = vmul.f32 %v6781_v48, %v816_v55  ;;  %v831_v2 = vmul.f32 %v6781_v48, %v817_v51  ;;  %v848_v27 = vmul.f32 %v846_v8, %v6777_v34  ;;  %v381_v30 = vadd.f32 %v377_v13, %v4019_v39  ;;  %v6792_v55 = vld [vmem:[#allocation32_spill] sm:$0xff] }
  0xfc   :  { %v364_v16 = vmul.f32 %v3735_v63, %v338_v49  ;;  %v365_v11 = vmul.f32 %v3738_v35, %v337_v50  ;;  %v394_v31 = vsel %vm336_vm5, %v385_v12, %v4123_v14  ;;  %v4132_v24 = vadd.f32 %v647_v44, %v6791_v61 }
  0xfd   :  { %v660_v48 = vadd.f32 %v656_v60, %v6792_v55  ;;  %v648_v51 = vmul.f32 %v6788_v52, %v643_v37  ;;  %v849_v42 = vmul.f32 %v845_v62, %v6778_v28  ;;  %v4138_v8 = vadd.f32 %v821_v21, %v4035_v46 }
  0xfe   :  { %v4140_v39 = vadd.f32 %v822_v58, %v770_v3  ;;  %v657_v13 = vmul.f32 %v6789_v36, %v643_v37  ;;  %v397_v50 = vmul.f32 %v394_v31, %v6782_v32  ;;  %v4144_v49 = vadd.f32 %v830_v53, %v778_v59  ;;  %v615_v61 = vpop.permute.xlu1 %614  ;;  %v4150_v55 = vpop.permute.xlu0 %390 }
  0xff   :  { %v4146_v34 = vadd.f32 %v831_v2, %v779_v56  ;;  %v853_v44 = vmul.f32 %v3729_v43, %v848_v27  ;;  %v862_v60 = vmul.f32 %v3732_v10, %v848_v27  ;;  %v369_v46 = vmul.f32 %v6783_v29, %v364_v16  ;;  %v6794_v2 = vld [vmem:[#allocation36_spill] sm:$0xff] }
 0x100   :  { %v370_v3 = vmul.f32 %v6783_v29, %v365_v11  ;;  %v617_v37 = vsel %vm616_vm6, %v4038_v0, %v615_v61  ;;  %v620_v59 = vsel %vm616_vm6, %v615_v61, %v4017_v41  ;;  %v378_v56 = vmul.f32 %v6785_v40, %v364_v16  ;;  %v6793_v29 = vld [vmem:[#allocation33_spill] sm:$0xff]  ;;  %v6796_v61 = vld [vmem:[#allocation62_spill] sm:$0xff] }
 0x101   :  { %v379_v21 = vmul.f32 %v6785_v40, %v365_v11  ;;  %v854_v27 = vmul.f32 %v3729_v43, %v849_v42  ;;  %v395_v58 = vsel %vm336_vm5, %v4150_v55, %v385_v12  ;;  %v652_v62 = vadd.f32 %v648_v51, %v6793_v29  ;;  %v6795_v11 = vld [vmem:[#allocation60_spill] sm:$0xff] }
 0x102   :  { %v863_v0 = vmul.f32 %v3732_v10, %v849_v42  ;;  %v402_v53 = vmul.f32 %v3765_v1, %v397_v50  ;;  %v644_v41 = vmul.f32 %v3784_v18, %v617_v37  ;;  %v661_v16 = vadd.f32 %v657_v13, %v6794_v2  ;;  %v667_v12 = vpop.permute.xlu1 %666  ;;  %v4177_v28 = vpop.permute.xlu0 %664  ;;  %v6798_v29 = vld [vmem:[#allocation56_spill] sm:$0xff] }
 0x103   :  { %v4173_v40 = vadd.f32 %v853_v44, %v4065_v15  ;;  %v411_v31 = vmul.f32 %v6795_v11, %v397_v50  ;;  %v645_v32 = vmul.f32 %v6796_v61, %v620_v59  ;;  %v4180_v51 = vadd.f32 %v862_v60, %v4072_v47 }
 0x104   :  { %v4183_v42 = vadd.f32 %v369_v46, %v4077_v33  ;;  %v396_v37 = vmul.f32 %v395_v58, %v6780_v4  ;;  %v674_v15 = vsel %vm616_vm6, %v4177_v28, %v667_v12  ;;  %v4190_v13 = vadd.f32 %v370_v3, %v4086_v20 }
 0x105   :  { %v4193_v50 = vadd.f32 %v378_v56, %v4089_v25  ;;  %v4196_v44 = vadd.f32 %v379_v21, %v4092_v54  ;;  %v4199_v47 = vadd.f32 %v854_v27, %v4069_v17  ;;  %v4202_v33 = vadd.f32 %v863_v0, %v4074_v38  ;;  %v6797_v21 = vld [vmem:[#allocation64_spill] sm:$0xff] }
 0x106   :  { %v406_v60 = vadd.f32 %v402_v53, %v372_v5  ;;  %v649_v46 = vmul.f32 %v6788_v52, %v644_v41  ;;  %v676_v59 = vmul.f32 %v674_v15, %v6784_v26  ;;  %v415_v58 = vadd.f32 %v411_v31, %v381_v30  ;;  %v843_v54 = vpop.permute.xlu1 %842  ;;  %v4209_v56 = vpop.permute.xlu0 %668  ;;  %v6799_v53 = vld [vmem:[#allocation63_spill] sm:$0xff]  ;;  %v6800_v31 = vld [vmem:[#allocation57_spill] sm:$0xff] }
 0x107   :  { %v650_v20 = vmul.f32 %v6788_v52, %v645_v32  ;;  %v658_v25 = vmul.f32 %v6789_v36, %v644_v41  ;;  %v659_v3 = vmul.f32 %v6789_v36, %v645_v32  ;;  %v410_v17 = vmul.f32 %v6795_v11, %v396_v37 }
 0x108   :  { %v690_v38 = vmul.f32 %v6797_v21, %v676_v59  ;;  %v844_v5 = vsel %vm788_vm4, %v4095_v6, %v843_v54  ;;  %v847_v30 = vsel %vm788_vm4, %v843_v54, %v4062_v45  ;;  %v401_v52 = vmul.f32 %v3765_v1, %v396_v37 }
 0x109   :  { %v850_v27 = vmul.f32 %v844_v5, %v6786_v19  ;;  %v851_v32 = vmul.f32 %v847_v30, %v6787_v9  ;;  %v673_v36 = vsel %vm616_vm6, %v667_v12, %v4209_v56  ;;  %v4226_v0 = vadd.f32 %v649_v46, %v6798_v29 }
 0x10a   :  { %v681_v41 = vmul.f32 %v6799_v53, %v676_v59  ;;  %v694_v6 = vadd.f32 %v690_v38, %v660_v48  ;;  %v677_v2 = vmul.f32 %v673_v36, %v6790_v23  ;;  %v4231_v45 = vadd.f32 %v650_v20, %v6800_v31  ;;  %v873_v5 = vpop.permute.xlu1 %872  ;;  %v871_v30 = vpop.permute.xlu0 %870  ;;  %v6801_v38 = vld [vmem:[#allocation58_spill] sm:$0xff]  ;;  %v6802_v36 = vld [vmem:[#allocation61_spill] sm:$0xff] }
 0x10b   :  { %v855_v37 = vmul.f32 %v3729_v43, %v850_v27  ;;  %v856_v15 = vmul.f32 %v3729_v43, %v851_v32  ;;  %v864_v54 = vmul.f32 %v3732_v10, %v850_v27  ;;  %v414_v12 = vadd.f32 %v410_v17, %v4112_v57  ;;  %v6803_v17 = vld [vmem:[#allocation65_spill] sm:$0xff] }
 0x10c   :  { %v682_v46 = vmul.f32 %v6799_v53, %v677_v2  ;;  %v691_v59 = vmul.f32 %v6797_v21, %v677_v2  ;;  %v881_v48 = vsel %vm878_vm7, %v871_v30, %v873_v5  ;;  %v4242_v20 = vadd.f32 %v658_v25, %v6801_v38 }
 0x10d   :  { %v4245_v29 = vadd.f32 %v659_v3, %v6802_v36  ;;  %v405_v43 = vadd.f32 %v401_v52, %v4097_v7  ;;  %v865_v27 = vmul.f32 %v3732_v10, %v851_v32  ;;  %v685_v31 = vadd.f32 %v681_v41, %v4132_v24  ;;  %v6804_v7 = vld [vmem:[#allocation66_spill] sm:$0xff]  ;;  %v6805_v10 = vld [vmem:[#allocation67_spill] sm:$0xff] }
 0x10e   :  { %v695_v57 = vadd.f32 %v691_v59, %v661_v16  ;;  %v904_v9 = vmul.f32 %v6803_v17, %v881_v48  ;;  %v4251_v19 = vadd.f32 %v694_v6, %v414_v12  ;;  %v859_v2 = vadd.f32 %v855_v37, %v4138_v8  ;;  %v389_v38 = vpop.permute.xlu1 %388  ;;  %v875_v36 = vpop.permute.xlu0 %874 }
 0x10f   :  { %v4255_v23 = vadd.f32 %v856_v15, %v4140_v39  ;;  %v868_v25 = vadd.f32 %v864_v54, %v4144_v49  ;;  %v686_v3 = vadd.f32 %v682_v46, %v652_v62  ;;  %v392_v24 = vsel %vm336_vm5, %v389_v38, %v4150_v55 }
 0x110   :  { %v909_v52 = vmul.f32 %v6804_v7, %v904_v9  ;;  %v918_v32 = vmul.f32 %v6805_v10, %v904_v9  ;;  %v393_v8 = vsel %vm336_vm5, %v4123_v14, %v389_v38  ;;  %v869_v39 = vadd.f32 %v865_v27, %v4146_v34  ;;  %v6806_v9 = vld [vmem:[#allocation68_spill] sm:$0xff] }
 0x111   :  { %v398_v16 = vmul.f32 %v393_v8, %v3735_v63  ;;  %v399_v49 = vmul.f32 %v392_v24, %v3738_v35  ;;  %v880_v62 = vsel %vm878_vm7, %v873_v5, %v875_v36  ;;  %v4273_v37 = vadd.f32 %v695_v57, %v415_v58 }
 0x112   :  { %v913_v41 = vadd.f32 %v909_v52, %v4173_v40  ;;  %v905_v6 = vmul.f32 %v6806_v9, %v880_v62  ;;  %v4275_v55 = vadd.f32 %v685_v31, %v405_v43  ;;  %v922_v15 = vadd.f32 %v918_v32, %v4180_v51  ;;  %v877_v54 = vpop.permute.xlu1 %876  ;;  %v671_v12 = vpop.permute.xlu0 %670  ;;  %v6807_v43 = vld [vmem:[#allocation69_spill] sm:$0xff]  ;;  %v6808_v31 = vld [vmem:[#allocation70_spill] sm:$0xff] }
 0x113   :  { %v403_v14 = vmul.f32 %v3765_v1, %v398_v16  ;;  %v412_v34 = vmul.f32 %v6795_v11, %v398_v16  ;;  %v4280_v46 = vadd.f32 %v686_v3, %v406_v60  ;;  %v404_v5 = vmul.f32 %v3765_v1, %v399_v49 }
 0x114   :  { %v910_v40 = vmul.f32 %v6804_v7, %v905_v6  ;;  %v879_v58 = vsel %vm878_vm7, %v875_v36, %v877_v54  ;;  %v882_v59 = vsel %vm878_vm7, %v877_v54, %v871_v30  ;;  %v413_v51 = vmul.f32 %v6795_v11, %v399_v49  ;;  %v6809_v54 = vld [vmem:[#allocation71_spill] sm:$0xff] }
 0x115   :  { %v919_v48 = vmul.f32 %v6805_v10, %v905_v6  ;;  %v906_v27 = vmul.f32 %v6807_v43, %v879_v58  ;;  %v907_v57 = vmul.f32 %v6808_v31, %v882_v59  ;;  %v407_v60 = vadd.f32 %v403_v14, %v4183_v42 }
 0x116   :  { %v416_v1 = vadd.f32 %v412_v34, %v4193_v50  ;;  %v672_v3 = vsel %vm616_vm6, %v4209_v56, %v671_v12  ;;  %v675_v30 = vsel %vm616_vm6, %v671_v12, %v4177_v28  ;;  %v914_v11 = vadd.f32 %v910_v40, %v4199_v47  ;;  %v929_v32 = vpop.permute.xlu1 %928  ;;  %v927_v42 = vpop.permute.xlu0 %926  ;;  %v6810_v40 = vld [vmem:[#allocation72_spill] sm:$0xff] }
 0x117   :  { %v911_v38 = vmul.f32 %v6804_v7, %v906_v27  ;;  %v920_v36 = vmul.f32 %v6805_v10, %v906_v27  ;;  %v921_v52 = vmul.f32 %v6805_v10, %v907_v57  ;;  %v912_v50 = vmul.f32 %v6804_v7, %v907_v57 }
 0x118   :  { %v678_v24 = vmul.f32 %v672_v3, %v3784_v18  ;;  %v679_v56 = vmul.f32 %v675_v30, %v6796_v61  ;;  %v936_v8 = vsel %vm878_vm7, %v927_v42, %v929_v32  ;;  %v923_v28 = vadd.f32 %v919_v48, %v4202_v33 }
 0x119   :  { %v915_v47 = vadd.f32 %v911_v38, %v859_v2  ;;  %v938_v16 = vmul.f32 %v936_v8, %v6803_v17  ;;  %v417_v49 = vadd.f32 %v413_v51, %v4196_v44  ;;  %v924_v62 = vadd.f32 %v920_v36, %v868_v25  ;;  %v6843_v17 = vld [vmem:[#allocation20_spill] sm:$0xff] }
 0x11a   :  { %v683_v10 = vmul.f32 %v6799_v53, %v678_v24  ;;  %v692_v6 = vmul.f32 %v6797_v21, %v678_v24  ;;  %v925_v7 = vadd.f32 %v921_v52, %v869_v39  ;;  %v684_v14 = vmul.f32 %v6799_v53, %v679_v56  ;;  %v933_v2 = vpop.permute.xlu1 %932  ;;  %v931_v58 = vpop.permute.xlu0 %930 }
 0x11b   :  { %v693_v34 = vmul.f32 %v6797_v21, %v679_v56  ;;  %v943_v12 = vmul.f32 %v6809_v54, %v938_v16  ;;  %v952_v33 = vmul.f32 %v6810_v40, %v938_v16  ;;  %v937_v44 = vsel %vm878_vm7, %v933_v2, %v927_v42 }
 0x11c   :  { %v934_v25 = vsel %vm878_vm7, %v931_v58, %v933_v2  ;;  %v408_v59 = vadd.f32 %v404_v5, %v4190_v13  ;;  %v916_v39 = vadd.f32 %v912_v50, %v4255_v23  ;;  %v696_v53 = vadd.f32 %v692_v6, %v4242_v20 }
 0x11d   :  { %v956_v51 = vadd.f32 %v952_v33, %v922_v15  ;;  %v941_v21 = vmul.f32 %v937_v44, %v6808_v31  ;;  %v935_v48 = vsel %vm878_vm7, %v929_v32, %v931_v58  ;;  %v687_v27 = vadd.f32 %v683_v10, %v4226_v0 }
 0x11e   :  { %v947_v57 = vadd.f32 %v943_v12, %v913_v41  ;;  %v939_v3 = vmul.f32 %v935_v48, %v6806_v9  ;;  %v940_v30 = vmul.f32 %v934_v25, %v6807_v43  ;;  %v697_v23 = vadd.f32 %v693_v34, %v4245_v29 }
 0x11f   :  { %v946_v38 = vmul.f32 %v6809_v54, %v941_v21  ;;  %v955_v13 = vmul.f32 %v6810_v40, %v941_v21  ;;  %v688_v20 = vadd.f32 %v684_v14, %v4231_v45  ;;  %v970_v52 = vadd.f32 %v696_v53, %v416_v1 }
 0x120   :  { %v944_v15 = vmul.f32 %v6809_v54, %v939_v3  ;;  %v945_v5 = vmul.f32 %v6809_v54, %v940_v30  ;;  %v953_v36 = vmul.f32 %v6810_v40, %v939_v3  ;;  %v954_v0 = vmul.f32 %v6810_v40, %v940_v30 }
 0x121   :  { %v959_v41 = vadd.f32 %v955_v13, %v925_v7  ;;  %v972_v32 = vadd.f32 %v4251_v19, %v956_v51  ;;  %v950_v42 = vadd.f32 %v946_v38, %v916_v39  ;;  %v971_v29 = vadd.f32 %v697_v23, %v417_v49 }
 0x122   :  { %v948_v50 = vadd.f32 %v944_v15, %v914_v11  ;;  %v957_v24 = vadd.f32 %v953_v36, %v923_v28  ;;  %v958_v56 = vadd.f32 %v954_v0, %v924_v62  ;;  %v949_v8 = vadd.f32 %v945_v5, %v915_v47 }
 0x123   :  { %v962_v16 = vadd.f32 %v687_v27, %v407_v60  ;;  %v964_v45 = vadd.f32 %v4275_v55, %v947_v57  ;;  %v963_v14 = vadd.f32 %v688_v20, %v408_v59  ;;  %v975_v54 = vadd.f32 %v971_v29, %v959_v41 }
 0x124   :  { %v973_v10 = vadd.f32 %v4273_v37, %v957_v24  ;;  %v974_v6 = vadd.f32 %v970_v52, %v958_v56  ;;  %v965_v34 = vadd.f32 %v4280_v46, %v948_v50  ;;  %v1056_v1 = vsel %vm976_vm8, %v972_v32, 0.0 }
 0x125   :  { %v966_v7 = vadd.f32 %v962_v16, %v949_v8  ;;  %v967_v11 = vadd.f32 %v963_v14, %v950_v42  ;;  %v977_v28 = vsel %vm976_vm8, %v964_v45, 0.0  ;;  %v1061_v46 = vsel %vm976_vm8, %v975_v54, 0.0 }
 0x126   :  { %v1057_v19 = vsel %vm976_vm8, %v973_v10, 0.0  ;;  %v978_v47 = vsel %vm976_vm8, %v965_v34, 0.0  ;;  %v1059_v55 = vsel %vm976_vm8, %v974_v6, 0.0 }
 0x127   :  { %v1058_v60 = vadd.f32 %v1057_v19, %v1056_v1  ;;  %v979_v49 = vadd.f32 %v978_v47, %v977_v28  ;;  %v980_v37 = vsel %vm976_vm8, %v966_v7, 0.0  ;;  %v982_v40 = vsel %vm976_vm8, %v967_v11, 0.0 }
 0x128   :  { %v3162_v28 = vmov 1966171168  }
 0x129   :  { %v1060_v62 = vadd.f32 %v1059_v55, %v1058_v60  ;;  %v981_v12 = vadd.f32 %v980_v37, %v979_v49  ;;  %v1029_v47 = vunpack.c.l.s4 %v3162_v28  ;;  %v1013_v55 = vstv %s2960_s0  ;;  %v6819_v28 = vld [vmem:[#allocation16_spill] sm:$0xff]  ;;  %s4610_s0 = sld [smem:[#allocation2 + $0x4b]] }
 0x12b   :  { %v1062_v33 = vadd.f32 %v1061_v46, %v1060_v62  ;;  %v983_v2 = vadd.f32 %v982_v40, %v981_v12  ;;  %v1030_v37 = vunpack.c.0.s8 %v1029_v47  ;;  %v1086_v62 = vstv %s2959_s26  ;;  %s4612_s26 = sld [smem:[#allocation2 + $0x34]] }
 0x12d   :  { %1063 = vadd.xlane.f32.xlu1 %v1062_v33  ;;  %984 = vadd.xlane.f32.xlu0 %v983_v2 }
 0x1b6   :  { %v1064_v58 = vpop.xlane.xlu1 %1063  ;;  %v985_v44 = vpop.xlane.xlu0 %984 }
 0x1b7   :  { %v1065_v25 = vmul.f32 0.001953125, %v1064_v58  ;;  %v986_v59 = vmul.f32 0.001953125, %v985_v44 }
 0x1b9   :  { %v4351_v39 = vsub.f32 %v972_v32, %v1065_v25  ;;  %v4353_v53 = vsub.f32 %v973_v10, %v1065_v25  ;;  %v987_v51 = vsub.f32 %v964_v45, %v986_v59  ;;  %v988_v21 = vsub.f32 %v965_v34, %v986_v59 }
 0x1ba   :  { %v989_v48 = vsub.f32 %v966_v7, %v986_v59  ;;  %v990_v27 = vsub.f32 %v967_v11, %v986_v59  ;;  %v4355_v57 = vsub.f32 %v974_v6, %v1065_v25  ;;  %v1069_v15 = vsub.f32 %v975_v54, %v1065_v25 }
 0x1bb   :  { %v991_v3 = vmul.f32 %v987_v51, %v987_v51  ;;  %v992_v30 = vmul.f32 %v988_v21, %v988_v21  ;;  %v1070_v38 = vmul.f32 %v4351_v39, %v4351_v39  ;;  %v1071_v13 = vmul.f32 %v4353_v53, %v4353_v53 }
 0x1bc   :  { %v993_v23 = vmul.f32 %v989_v48, %v989_v48  ;;  %v994_v20 = vmul.f32 %v990_v27, %v990_v27  ;;  %v1072_v5 = vmul.f32 %v4355_v57, %v4355_v57  ;;  %v1073_v8 = vmul.f32 %v1069_v15, %v1069_v15 }
 0x1bd   :  { %v995_v36 = vsel %vm976_vm8, %v991_v3, 0.0  ;;  %v996_v0 = vsel %vm976_vm8, %v992_v30, 0.0  ;;  %v1074_v41 = vsel %vm976_vm8, %v1070_v38, 0.0  ;;  %v1075_v52 = vsel %vm976_vm8, %v1071_v13, 0.0  ;;  %v6811_v3 = vld [vmem:[#allocation14_spill] sm:$0xff] }
 0x1be   :  { %v997_v32 = vadd.f32 %v996_v0, %v995_v36  ;;  %v1076_v42 = vadd.f32 %v1075_v52, %v1074_v41  ;;  %v998_v50 = vsel %vm976_vm8, %v993_v23, 0.0  ;;  %v1000_v56 = vsel %vm976_vm8, %v994_v20, 0.0 }
 0x1bf   :  { %v1077_v29 = vsel %vm976_vm8, %v1072_v5, 0.0  ;;  %v1079_v10 = vsel %vm976_vm8, %v1073_v8, 0.0  ;;  %v1007_v11 = vstv %s2958_s23  ;;  %v4372_v30 = vsub.s32 %v1030_v37, %v6811_v3  ;;  %s4608_s23 = sld [smem:[#allocation2 + $0x39]] }
 0x1c0   :  { %v999_v24 = vadd.f32 %v998_v50, %v997_v32  ;;  %v1078_v45 = vadd.f32 %v1077_v29, %v1076_v42  ;;  %v1092_v38 = vstv %s2961_s27  ;;  %s4616_s27 = sld [smem:[#allocation2 + $0x46]] }
 0x1c1   :  { %6812 = vst [vmem:[#allocation37_spill] sm:$0xff] %v4372_v30 }
 0x1c2   :  { %v1001_v16 = vadd.f32 %v1000_v56, %v999_v24  ;;  %v1080_v6 = vadd.f32 %v1079_v10, %v1078_v45  ;;  %v6813_v10 = vlaneseq }
 0x1c4   :  { %1002 = vadd.xlane.f32.xlu0 %v1001_v16  ;;  %vm4380_vm9 = vcmp.lt.s32.totalorder %v6813_v10, 512  ;;  %v4753_v10 = vstv %s4612_s26  ;;  %s3008_s26 = sld [smem:[#allocation2 + $0x5a]] }
 0x1c5   :  { %6833 = vst [vmem:[#allocation63_spill] sm:$0xff] %v4753_v10 }
 0x1c8   :  { %1081 = vadd.xlane.f32.xlu0 %v1080_v6 }
 0x24d   :  { %v1003_v14 = vpop.xlane.xlu0 %1002 }
 0x24e   :  { %v1004_v34 = vmul.f32 0.001953125, %v1003_v14 }
 0x250   :  { %v1005_v54 = vadd.f32 1e-05, %v1004_v34 }
 0x251   :  { %v1082_v1 = vpop.xlane.xlu0 %1081 }
 0x252   :  { %3059 = vrsqrt.f32 %v1005_v54  ;;  %v1083_v7 = vmul.f32 0.001953125, %v1082_v1 }
 0x254   :  { %v1084_v19 = vadd.f32 1e-05, %v1083_v7 }
 0x256   :  { %3061 = vrsqrt.f32 %v1084_v19  ;;  %v6817_v19 = vld [vmem:[#allocation17_spill] sm:$0xff] }
 0x25f   :  { %v3060_v60 = vpop.eup %3059 }
 0x260   :  { %v1008_v49 = vmul.f32 %v3060_v60, %v1007_v11  ;;  %v6821_v60 = vld [vmem:[#allocation15_spill] sm:$0xff] }
 0x262   :  { %v1009_v12 = vmul.f32 %v1008_v49, %v987_v51  ;;  %v1010_v46 = vmul.f32 %v1008_v49, %v988_v21  ;;  %v1011_v40 = vmul.f32 %v1008_v49, %v989_v48  ;;  %v1012_v33 = vmul.f32 %v1008_v49, %v990_v27 }
 0x263   :  { %v3062_v2 = vpop.eup %3061 }
 0x264   :  { %v1014_v58 = vadd.f32 %v1013_v55, %v1009_v12  ;;  %v1015_v44 = vadd.f32 %v1013_v55, %v1010_v46  ;;  %v1016_v25 = vadd.f32 %v1013_v55, %v1011_v40  ;;  %v1017_v59 = vadd.f32 %v1013_v55, %v1012_v33  ;;  %v6826_v46 = vld [vmem:[#allocation18_spill] sm:$0xff] }
 0x265   :  { %v1087_v13 = vmul.f32 %v3062_v2, %v1086_v62 }
 0x266   :  { %v1018_v23 = vmax.f32 %v1014_v58, 0.0  ;;  %v1019_v20 = vmax.f32 %v1015_v44, 0.0  ;;  %v1020_v5 = vmax.f32 %v1016_v25, 0.0  ;;  %v1021_v36 = vmax.f32 %v1017_v59, 0.0 }
 0x267   :  { %v1088_v0 = vmul.f32 %v1087_v13, %v4351_v39  ;;  %v1089_v51 = vmul.f32 %v1087_v13, %v4353_v53  ;;  %v1090_v21 = vmul.f32 %v1087_v13, %v4355_v57  ;;  %v1091_v48 = vmul.f32 %v1087_v13, %v1069_v15 }
 0x268   :  { %v1026_v27 = vcombine.low %v1018_v23, %v1019_v20  ;;  %v1027_v41 = vcombine.low %v1020_v5, %v1021_v36  ;;  %v6814_v53 = vmov 0 }
 0x269   :  { %v1093_v52 = vadd.f32 %v1092_v38, %v1088_v0  ;;  %v1094_v32 = vadd.f32 %v1092_v38, %v1089_v51  ;;  %v1095_v42 = vadd.f32 %v1092_v38, %v1090_v21  ;;  %v1096_v50 = vadd.f32 %v1092_v38, %v1091_v48 }
 0x26a   :  { %v1034_v24 = vrot.slane %v1026_v27, %v4372_v30  ;;  %v1041_v56 = vrot.slane %v1027_v41, %v4372_v30  ;;  %v6815_v53 = vsel %vm4380_vm9, 4294967295, %v6814_v53  ;;  %v1472_v0 = vstv %s4548_s7  ;;  %s4644_s7 = sld [smem:[#allocation2 + $0x41]] }
 0x26b   :  { %v1097_v8 = vmax.f32 %v1093_v52, 0.0  ;;  %v1098_v29 = vmax.f32 %v1094_v32, 0.0  ;;  %v1099_v16 = vmax.f32 %v1095_v42, 0.0  ;;  %v1100_v45 = vmax.f32 %v1096_v50, 0.0  ;;  %6816 = vst [vmem:[#allocation42_spill] sm:$0xff] %v6815_v53 }
 0x26c   :  { %v1042_v39 = vcombine.low %v1034_v24, %v1041_v56  ;;  %v1499_v51 = vstv %s4552_s8  ;;  %v1526_v27 = vstv %s4556_s9  ;;  %v1553_v41 = vstv %s4560_s10  ;;  %s4646_s8 = sld [smem:[#allocation2 + $0x3a]] }
 0x26d   :  { %v1105_v57 = vcombine.low %v1097_v8, %v1098_v29  ;;  %v1106_v15 = vcombine.low %v1099_v16, %v1100_v45  ;;  %s4656_s9 = sld [smem:[#allocation2 + $0x4c]]  ;;  %v4659_v56 = vstv %s4562_s11  ;;  %v4662_v8 = vstv %s4566_s12 }
 0x26e   :  { %v1049_v6 = vrot.slane %v1042_v39, %v4372_v30  ;;  %v4665_v29 = vstv %s4572_s13  ;;  %v4668_v16 = vstv %s4574_s14  ;;  %s4672_s10 = sld [smem:[#allocation2 + $0x35]]  ;;  %v4756_v39 = vstv %s4616_s27 }
 0x26f   :  { %v1113_v14 = vrot.slane %v1105_v57, %v4372_v30  ;;  %v1120_v34 = vrot.slane %v1106_v15, %v4372_v30  ;;  %s4682_s11 = sld [smem:[#allocation2 + $0x47]]  ;;  %v4742_v15 = vstv %s4604_s22  ;;  %v4747_v57 = vstv %s4608_s23  ;;  %6834 = vst [vmem:[#allocation57_spill] sm:$0xff] %v4756_v39 }
 0x270   :  { %1055 = vst.msk [vmem:[#allocation9] sm:$0xf] %vm4380_vm9, %v1049_v6  ;;  %s4692_s12 = sld [smem:[#allocation2 + $0x38]]  ;;  %v4722_v6 = vstv %s4584_s16  ;;  %6830 = vst [vmem:[#allocation60_spill] sm:$0xff] %v4742_v15  ;;  %v4796_v31 = vstv %s4644_s7 }
 0x271   :  { %v1121_v54 = vcombine.low %v1113_v14, %v1120_v34  ;;  %s4704_s13 = sld [smem:[#allocation2 + $0x4a]]  ;;  %v4736_v34 = vstv %s4598_s20  ;;  %v4739_v14 = vstv %s4600_s21  ;;  %6831 = vst [vmem:[#allocation64_spill] sm:$0xff] %v4747_v57  ;;  %6840 = vst [vmem:[#allocation72_spill] sm:$0xff] %v4796_v31  ;;  %v6844_v31 = vld [vmem:[#allocation21_spill] sm:$0xff] }
 0x272   :  { %s4716_s14 = sld [smem:[#allocation2 + $0x32]]  ;;  %6829 = vst [vmem:[#allocation36_spill] sm:$0xff] %v4739_v14  ;;  %v4799_v43 = vstv %s4646_s8 }
 0x273   :  { %v1128_v1 = vrot.slane %v1121_v54, %v4372_v30  ;;  %v4733_v54 = vstv %s4594_s19  ;;  %s4776_s16 = sld [smem:[#allocation2 + $0x4d]]  ;;  %6841 = vst [vmem:[#allocation14_spill] sm:$0xff] %v4799_v43  ;;  %v4802_v9 = vstv %s4656_s9 }
 0x274   :  { %6842 = vst [vmem:[#allocation73_spill] sm:$0xff] %v4802_v9  ;;  %v6848_v9 = vld [vmem:[#allocation19_spill] sm:$0xff]  ;;  %s3005_s19 = sld [smem:[#allocation2 + $0x57]] }
 0x275   :  { %1131 = vst.msk [vmem:[#allocation9 + $0x4] sm:$0xf] %vm4380_vm9, %v1128_v1  ;;  %s3014_s20 = sld [smem:[#allocation2 + $0x60]] }
 0x276   :  { %s3032_s21 = sld [smem:[#allocation2 + $0x72]] }
 0x277   :  { %v4392_v7 = vld [vmem:[#allocation9] sm:$0xf]  ;;  %s3023_s22 = sld [smem:[#allocation2 + $0x69]] }
 0x278   :  { %v4396_v11 = vrot.slane %v4392_v7, %v6817_v19  ;;  %v4400_v47 = vrot.slane %v4392_v7, %v6819_v28  ;;  %v4408_v49 = vrot.slane %v4392_v7, %v6821_v60  ;;  %v4442_v40 = vrot.slane %v4392_v7, %v6826_v46  ;;  %s3003_s23 = sld [smem:[#allocation2 + $0x55]] }
 0x279   :  { %v4639_v52 = vmul.f32 %v1472_v0, %v4392_v7  ;;  %v4642_v32 = vmul.f32 %v1499_v51, %v4392_v7  ;;  %v4719_v0 = vstv %s4580_s15  ;;  %v4725_v7 = vstv %s4586_s17  ;;  %s4758_s15 = sld [smem:[#allocation2 + $0x3b]] }
 0x27a   :  { %6818 = vst [vmem:[#allocation43_spill] sm:$0xff] %v4396_v11  ;;  %6820 = vst [vmem:[#allocation46_spill] sm:$0xff] %v4400_v47  ;;  %1197 = vrot.lane.b32.xlu0 %v4396_v11, %s3154_s1  ;;  %1195 = vrot.lane.b32.xlu1 %v4400_v47, %s3154_s1  ;;  %s3011_s17 = sld [smem:[#allocation2 + $0x5d]] }
 0x27b   :  { %6822 = vst [vmem:[#allocation47_spill] sm:$0xff] %v4408_v49  ;;  %6827 = vst [vmem:[#allocation32_spill] sm:$0xff] %v4442_v40  ;;  %s3026_s27 = sld [smem:[#allocation2 + $0x6c]] }
 0x27c   :  { %v4410_v55 = vld [vmem:[#allocation9 + $0x4] sm:$0xf]  ;;  %s3017_s7 = sld [smem:[#allocation2 + $0x63]] }
 0x27d   :  { %v4414_v37 = vrot.slane %v4410_v55, %v6817_v19  ;;  %v4422_v62 = vrot.slane %v4410_v55, %v6819_v28  ;;  %v4430_v12 = vrot.slane %v4410_v55, %v6821_v60  ;;  %v4454_v33 = vrot.slane %v4410_v55, %v6826_v46  ;;  %s3035_s8 = sld [smem:[#allocation2 + $0x75]] }
 0x27e   :  { %1201 = vrot.lane.b32.xlu1 %v4408_v49, %s3154_s1  ;;  %v4651_v50 = vmul.f32 %v1526_v27, %v4410_v55  ;;  %v4654_v24 = vmul.f32 %v1553_v41, %v4410_v55  ;;  %v4728_v41 = vstv %s4590_s18  ;;  %v4750_v55 = vstv %s4610_s0  ;;  %s3029_s18 = sld [smem:[#allocation2 + $0x6f]] }
 0x27f   :  { %6823 = vst [vmem:[#allocation49_spill] sm:$0xff] %v4414_v37  ;;  %1244 = vrot.lane.b32.xlu0 %v4414_v37, %s3154_s1  ;;  %6824 = vst [vmem:[#allocation50_spill] sm:$0xff] %v4422_v62  ;;  %s3021_s0 = sld [smem:[#allocation2 + $0x67]] }
 0x280   :  { %6825 = vst [vmem:[#allocation31_spill] sm:$0xff] %v4430_v12  ;;  %6828 = vst [vmem:[#allocation33_spill] sm:$0xff] %v4454_v33  ;;  %s3012_s9 = sld [smem:[#allocation2 + $0x5e]] }
 0x281   :  { %6832 = vst [vmem:[#allocation56_spill] sm:$0xff] %v4750_v55  ;;  %v6855_v55 = vld [vmem:[#allocation23_spill] sm:$0xff] }
 0x282   :  { %1242 = vrot.lane.b32.xlu1 %v4422_v62, %s3154_s1 }
 0x283   :  { %1412 = vrot.lane.b32.xlu0 %v4400_v47, %s3155_s2 }
 0x286   :  { %1248 = vrot.lane.b32.xlu1 %v4430_v12, %s3154_s1 }
 0x287   :  { %1418 = vrot.lane.b32.xlu0 %v4408_v49, %s3155_s2 }
 0x28a   :  { %1414 = vrot.lane.b32.xlu1 %v4396_v11, %s3155_s2 }
 0x28b   :  { %1440 = vrot.lane.b32.xlu0 %v4414_v37, %s3155_s2 }
 0x28e   :  { %1438 = vrot.lane.b32.xlu1 %v4422_v62, %s3155_s2 }
 0x28f   :  { %1199 = vrot.lane.b32.xlu0 %v4442_v40, %s3154_s1 }
 0x292   :  { %1444 = vrot.lane.b32.xlu1 %v4430_v12, %s3155_s2 }
 0x293   :  { %1276 = vrot.lane.b32.xlu0 %v4400_v47, %s3156_s28 }
 0x296   :  { %1246 = vrot.lane.b32.xlu1 %v4454_v33, %s3154_s1 }
 0x297   :  { %1282 = vrot.lane.b32.xlu0 %v4408_v49, %s3156_s28 }
 0x29a   :  { %1278 = vrot.lane.b32.xlu1 %v4396_v11, %s3156_s28 }
 0x29b   :  { %1442 = vrot.lane.b32.xlu0 %v4454_v33, %s3155_s2 }
 0x29e   :  { %1416 = vrot.lane.b32.xlu1 %v4442_v40, %s3155_s2 }
 0x29f   :  { %1650 = vrot.lane.b32.xlu0 %v4396_v11, %s3157_s29 }
 0x2a2   :  { %1648 = vrot.lane.b32.xlu1 %v4400_v47, %s3157_s29 }
 0x2a3   :  { %1674 = vrot.lane.b32.xlu0 %v4422_v62, %s3157_s29 }
 0x2a6   :  { %1652 = vrot.lane.b32.xlu1 %v4442_v40, %s3157_s29 }
 0x2a7   :  { %1678 = vrot.lane.b32.xlu0 %v4454_v33, %s3157_s29 }
 0x2aa   :  { %1676 = vrot.lane.b32.xlu1 %v4414_v37, %s3157_s29 }
 0x2ab   :  { %1310 = vrot.lane.b32.xlu0 %v4422_v62, %s3156_s28 }
 0x2ae   :  { %1280 = vrot.lane.b32.xlu1 %v4442_v40, %s3156_s28 }
 0x2af   :  { %1316 = vrot.lane.b32.xlu0 %v4430_v12, %s3156_s28 }
 0x2b2   :  { %1312 = vrot.lane.b32.xlu1 %v4414_v37, %s3156_s28 }
 0x2b3   :  { %1680 = vrot.lane.b32.xlu0 %v4430_v12, %s3157_s29 }
 0x2b6   :  { %1654 = vrot.lane.b32.xlu1 %v4408_v49, %s3157_s29 }
 0x2b7   :  { %1710 = vrot.lane.b32.xlu0 %v4396_v11, %s6604_s30 }
 0x2ba   :  { %1708 = vrot.lane.b32.xlu1 %v4400_v47, %s6604_s30 }
 0x2bb   :  { %1314 = vrot.lane.b32.xlu0 %v4454_v33, %s3156_s28 }
 0x2be   :  { %1712 = vrot.lane.b32.xlu1 %v4442_v40, %s6604_s30 }
 0x2bf   :  { %1346 = vrot.lane.b32.xlu0 %v4396_v11, %s6602_s4 }
 0x2c2   :  { %1344 = vrot.lane.b32.xlu1 %v4400_v47, %s6602_s4 }
 0x2c3   :  { %1580 = vrot.lane.b32.xlu0 %v4400_v47, %s6600_s5 }
 0x2c6   :  { %1350 = vrot.lane.b32.xlu1 %v4408_v49, %s6602_s4 }
 0x2c7   :  { %1584 = vrot.lane.b32.xlu0 %v4442_v40, %s6600_s5 }
 0x2ca   :  { %1582 = vrot.lane.b32.xlu1 %v4396_v11, %s6600_s5 }
 0x2cb   :  { %1742 = vrot.lane.b32.xlu0 %v4422_v62, %s6604_s30 }
 0x2ce   :  { %1714 = vrot.lane.b32.xlu1 %v4408_v49, %s6604_s30 }
 0x2cf   :  { %1746 = vrot.lane.b32.xlu0 %v4454_v33, %s6604_s30 }
 0x2d2   :  { %1744 = vrot.lane.b32.xlu1 %v4414_v37, %s6604_s30 }
 0x2d3   :  { %1378 = vrot.lane.b32.xlu0 %v4422_v62, %s6602_s4 }
 0x2d6   :  { %1348 = vrot.lane.b32.xlu1 %v4442_v40, %s6602_s4 }
 0x2d7   :  { %1384 = vrot.lane.b32.xlu0 %v4430_v12, %s6602_s4 }
 0x2da   :  { %1380 = vrot.lane.b32.xlu1 %v4414_v37, %s6602_s4 }
 0x2db   :  { %1614 = vrot.lane.b32.xlu0 %v4422_v62, %s6600_s5 }
 0x2de   :  { %1586 = vrot.lane.b32.xlu1 %v4408_v49, %s6600_s5 }
 0x2df   :  { %1618 = vrot.lane.b32.xlu0 %v4454_v33, %s6600_s5 }
 0x2e2   :  { %1616 = vrot.lane.b32.xlu1 %v4414_v37, %s6600_s5 }
 0x2e3   :  { %1776 = vrot.lane.b32.xlu0 %v4400_v47, %s6598_s6 }
 0x2e6   :  { %1748 = vrot.lane.b32.xlu1 %v4430_v12, %s6604_s30  ;;  %s4730_s30 = sld [smem:[#allocation2 + $0x44]] }
 0x2e7   :  { %1780 = vrot.lane.b32.xlu0 %v4442_v40, %s6598_s6 }
 0x2ea   :  { %1778 = vrot.lane.b32.xlu1 %v4396_v11, %s6598_s6 }
 0x2eb   :  { %1620 = vrot.lane.b32.xlu0 %v4430_v12, %s6600_s5  ;;  %s4630_s5 = sld [smem:[#allocation2 + $0x3e]] }
 0x2ec   :  { %v4544_v2 = vpop.permute.xlu1 %1195  ;;  %v4546_v58 = vpop.permute.xlu0 %1197  ;;  %v4836_v26 = vstv %s4730_s30  ;;  %s2999_s30 = sld [smem:[#allocation2 + $0x51]] }
 0x2ed   :  { %v1205_v53 = vsel %vm143_vm1, %v4544_v2, %v4546_v58  ;;  %6851 = vst [vmem:[#allocation79_spill] sm:$0xff] %v4836_v26 }
 0x2ee   :  { %1382 = vrot.lane.b32.xlu1 %v4454_v33, %s6602_s4  ;;  %s4634_s4 = sld [smem:[#allocation2 + $0x2f]]  ;;  %v1208_v61 = vmul.f32 %v1205_v53, %v6843_v17  ;;  %v4820_v53 = vstv %s4672_s10 }
 0x2ef   :  { %1810 = vrot.lane.b32.xlu0 %v4422_v62, %s6598_s6  ;;  %6845 = vst [vmem:[#allocation74_spill] sm:$0xff] %v4820_v53  ;;  %s3030_s10 = sld [smem:[#allocation2 + $0x70]] }
 0x2f0   :  { %v4558_v44 = vpop.permute.xlu1 %1201 }
 0x2f1   :  { %v4564_v25 = vpop.permute.xlu0 %1244  ;;  %v4786_v40 = vstv %s4630_s5  ;;  %v1206_v47 = vsel %vm143_vm1, %v4558_v44, %v4544_v2  ;;  %s6964_s5 = smov 127  }
 0x2f2   :  { %1782 = vrot.lane.b32.xlu1 %v4408_v49, %s6598_s6  ;;  %6838 = vst [vmem:[#allocation67_spill] sm:$0xff] %v4786_v40  ;;  %v4830_v40 = vstv %s4704_s13  ;;  %s5972_s13 = sld [smem:[#allocation2 + $0x61]] }
 0x2f3   :  { %1814 = vrot.lane.b32.xlu0 %v4454_v33, %s6598_s6  ;;  %v4771_v33 = vstv %s4620_s24  ;;  %6849 = vst [vmem:[#allocation77_spill] sm:$0xff] %v4830_v40  ;;  %v1213_v40 = vmul.f32 %v4659_v56, %v1208_v61  ;;  %s2998_s24 = sld [smem:[#allocation2 + $0x50]] }
 0x2f4   :  { %v4576_v59 = vpop.permute.xlu1 %1242  ;;  %6835 = vst [vmem:[#allocation58_spill] sm:$0xff] %v4771_v33  ;;  %v4789_v11 = vstv %s4634_s4  ;;  %s3001_s4 = sld [smem:[#allocation2 + $0x53]] }
 0x2f5   :  { %v4578_v3 = vpop.permute.xlu0 %1412  ;;  %v1252_v30 = vsel %vm143_vm1, %v4576_v59, %v4564_v25  ;;  %6839 = vst [vmem:[#allocation71_spill] sm:$0xff] %v4789_v11 }
 0x2f6   :  { %1812 = vrot.lane.b32.xlu1 %v4414_v37, %s6598_s6  ;;  %v4774_v37 = vstv %s4622_s25  ;;  %v1255_v18 = vmul.f32 %v1252_v30, %v6843_v17  ;;  %v4823_v30 = vstv %s4682_s11  ;;  %v4826_v17 = vstv %s4692_s12  ;;  %s3000_s25 = sld [smem:[#allocation2 + $0x52]] }
 0x2f7   :  { %6836 = vst [vmem:[#allocation61_spill] sm:$0xff] %v4774_v37  ;;  %6846 = vst [vmem:[#allocation75_spill] sm:$0xff] %v4823_v30  ;;  %s5950_s11 = sld [smem:[#allocation2 + $0x58]] }
 0x2f8   :  { %v4588_v38 = vpop.permute.xlu1 %1248  ;;  %6847 = vst [vmem:[#allocation76_spill] sm:$0xff] %v4826_v17  ;;  %v1260_v26 = vmul.f32 %v4665_v29, %v1255_v18  ;;  %s5956_s12 = sld [smem:[#allocation2 + $0x6a]] }
 0x2f9   :  { %v4592_v13 = vpop.permute.xlu0 %1418  ;;  %v1253_v35 = vsel %vm143_vm1, %v4588_v38, %v4576_v59  ;;  %v1207_v59 = vmul.f32 %v1206_v47, %v6848_v9 }
 0x2fa   :  { %1816 = vrot.lane.b32.xlu1 %v4430_v12, %s6598_s6  ;;  %s4626_s6 = sld [smem:[#allocation2 + $0x2c]]  ;;  %v1423_v53 = vsel %vm426_vm0, %v4592_v13, %v4578_v3 }
 0x2fb   :  { %v1212_v33 = vmul.f32 %v4659_v56, %v1207_v59 }
 0x2fc   :  { %v4602_v23 = vpop.permute.xlu1 %1414 }
 0x2fd   :  { %v4606_v20 = vpop.permute.xlu0 %1440  ;;  %v1422_v2 = vsel %vm426_vm0, %v4578_v3, %v4602_v23 }
 0x2fe   :  { %v1425_v30 = vmul.f32 %v1422_v2, %v6844_v31 }
 0x300   :  { %v4614_v5 = vpop.permute.xlu1 %1438  ;;  %v4783_v49 = vstv %s4626_s6  ;;  %v1430_v10 = vmul.f32 %v4719_v0, %v1425_v30  ;;  %s3020_s6 = sld [smem:[#allocation2 + $0x66]] }
 0x301   :  { %v4618_v36 = vpop.permute.xlu0 %1199  ;;  %v1448_v62 = vsel %vm426_vm0, %v4614_v5, %v4606_v20  ;;  %6837 = vst [vmem:[#allocation66_spill] sm:$0xff] %v4783_v49  ;;  %v4833_v49 = vstv %s4716_s14  ;;  %s5984_s14 = sld [smem:[#allocation2 + $0x73]] }
 0x302   :  { %v1451_v43 = vmul.f32 %v1448_v62, %v6844_v31  ;;  %6850 = vst [vmem:[#allocation78_spill] sm:$0xff] %v4833_v49  ;;  %v1254_v62 = vmul.f32 %v1253_v35, %v6848_v9  ;;  %v1218_v49 = vmul.f32 %v4662_v8, %v1208_v61  ;;  %v4854_v35 = vstv %s4758_s15  ;;  %v6854_v61 = vld [vmem:[#allocation22_spill] sm:$0xff]  ;;  %s5996_s15 = sld [smem:[#allocation2 + $0x5b]] }
 0x303   :  { %6852 = vst [vmem:[#allocation80_spill] sm:$0xff] %v4854_v35  ;;  %v1269_v9 = vmul.f32 %v4668_v16, %v1255_v18  ;;  %v1204_v2 = vsel %vm143_vm1, %v4546_v58, %v4618_v36  ;;  %v4865_v31 = vstv %s4776_s16  ;;  %v1424_v4 = vmul.f32 %v1423_v53, %v6854_v61  ;;  %s6002_s16 = sld [smem:[#allocation2 + $0x6d]] }
 0x304   :  { %v4628_v21 = vpop.permute.xlu1 %1444  ;;  %v1456_v3 = vmul.f32 %v4725_v7, %v1451_v43  ;;  %6853 = vst [vmem:[#allocation81_spill] sm:$0xff] %v4865_v31  ;;  %v1465_v37 = vmul.f32 %v4728_v41, %v1451_v43  ;;  %v1203_v18 = vsel %vm143_vm1, %v4618_v36, %v4558_v44  ;;  %v1259_v39 = vmul.f32 %v4665_v29, %v1254_v62 }
 0x305   :  { %v4632_v48 = vpop.permute.xlu0 %1276  ;;  %v1449_v47 = vsel %vm426_vm0, %v4628_v21, %v4614_v5  ;;  %v1268_v58 = vmul.f32 %v4668_v16, %v1254_v62  ;;  %v1217_v31 = vmul.f32 %v4662_v8, %v1207_v59  ;;  %v4879_v53 = vadd.f32 %v1260_v26, %v1213_v40 }
 0x306   :  { %v1450_v35 = vmul.f32 %v1449_v47, %v6854_v61  ;;  %v1435_v43 = vmul.f32 %v4722_v6, %v1425_v30  ;;  %v1209_v15 = vmul.f32 %v1204_v2, %v6855_v55  ;;  %v4885_v44 = vadd.f32 %v1269_v9, %v1218_v49  ;;  %v6856_v47 = vld [vmem:[#allocation24_spill] sm:$0xff] }
 0x307   :  { %v1460_v36 = vadd.f32 %v1456_v3, %v1430_v10  ;;  %v1210_v61 = vmul.f32 %v1203_v18, %v6856_v47  ;;  %v1429_v26 = vmul.f32 %v4719_v0, %v1424_v4  ;;  %v4900_v49 = vadd.f32 %v1259_v39, %v1212_v33 }
 0x308   :  { %v4648_v42 = vpop.permute.xlu1 %1246  ;;  %v1469_v40 = vadd.f32 %v1465_v37, %v1435_v43  ;;  %v1455_v30 = vmul.f32 %v4725_v7, %v1450_v35  ;;  %v4902_v10 = vadd.f32 %v1268_v58, %v1217_v31  ;;  %v1434_v59 = vmul.f32 %v4722_v6, %v1424_v4 }
 0x309   :  { %v4670_v45 = vpop.permute.xlu0 %1282  ;;  %v1251_v62 = vsel %vm143_vm1, %v4564_v25, %v4648_v42  ;;  %v1250_v9 = vsel %vm143_vm1, %v4648_v42, %v4588_v38  ;;  %v1464_v25 = vmul.f32 %v4728_v41, %v1450_v35  ;;  %v1214_v3 = vmul.f32 %v4659_v56, %v1209_v15 }
 0x30a   :  { %v1256_v2 = vmul.f32 %v1251_v62, %v6855_v55  ;;  %v1287_v37 = vsel %vm246_vm2, %v4670_v45, %v4632_v48  ;;  %v6857_v4 = vrot.slane %v4639_v52, %v6817_v19  ;;  %v1215_v42 = vmul.f32 %v4659_v56, %v1210_v61 }
 0x30b   :  { %v1257_v39 = vmul.f32 %v1250_v9, %v6856_v47  ;;  %v1219_v43 = vmul.f32 %v4662_v8, %v1209_v15  ;;  %v1459_v62 = vadd.f32 %v1455_v30, %v1429_v26  ;;  %v6859_v9 = vld [vmem:[#allocation28_spill] sm:$0xff] }
 0x30c   :  { %v4694_v1 = vpop.permute.xlu1 %1278  ;;  %v1496_v38 = vadd.f32 %v6857_v4, %v1460_v36  ;;  %v1468_v36 = vadd.f32 %v1464_v25, %v1434_v59  ;;  %v1288_v4 = vmul.f32 %v1287_v37, %v6859_v9  ;;  %v1261_v15 = vmul.f32 %v4665_v29, %v1256_v2 }
 0x30d   :  { %v4706_v27 = vpop.permute.xlu0 %1442  ;;  %v1286_v26 = vsel %vm246_vm2, %v4632_v48, %v4694_v1  ;;  %v1262_v25 = vmul.f32 %v4665_v29, %v1257_v39  ;;  %v1270_v37 = vmul.f32 %v4668_v16, %v1256_v2  ;;  %v6864_v48 = vrot.slane %v4639_v52, %v6819_v28 }
 0x30e   :  { %v1447_v56 = vsel %vm426_vm0, %v4606_v20, %v4706_v27  ;;  %v6861_v20 = vld [vmem:[#allocation27_spill] sm:$0xff]  ;;  %v6865_v29 = vrot.slane %v4654_v24, %v6817_v19 }
 0x310   :  { %v4744_v51 = vpop.permute.xlu1 %1416 }
 0x311   :  { %v4768_v12 = vpop.permute.xlu0 %1650  ;;  %v1421_v33 = vsel %vm426_vm0, %v4602_v23, %v4744_v51  ;;  %v1420_v35 = vsel %vm426_vm0, %v4744_v51, %v4592_v13  ;;  %v6858_v23 = vrot.slane %v4642_v32, %v6817_v19  ;;  %v1446_v13 = vsel %vm426_vm0, %v4706_v27, %v4628_v21  ;;  %v6860_v51 = vld [vmem:[#allocation26_spill] sm:$0xff] }
 0x312   :  { %v1426_v47 = vmul.f32 %v1421_v33, %v6860_v51  ;;  %v1427_v30 = vmul.f32 %v1420_v35, %v6861_v20  ;;  %v1452_v21 = vmul.f32 %v1447_v56, %v6860_v51  ;;  %v1495_v33 = vadd.f32 %v6864_v48, %v1459_v62 }
 0x313   :  { %v1523_v58 = vadd.f32 %v6858_v23, %v1469_v40  ;;  %v1220_v40 = vmul.f32 %v4662_v8, %v1210_v61  ;;  %v6862_v8 = vrot.slane %v4651_v50, %v6817_v19  ;;  %v1271_v35 = vmul.f32 %v4668_v16, %v1257_v39  ;;  %v6869_v19 = vld [vmem:[#allocation29_spill] sm:$0xff] }
 0x314   :  { %v4814_v63 = vpop.permute.xlu1 %1648  ;;  %v1453_v23 = vmul.f32 %v1446_v13, %v6861_v20  ;;  %v6867_v56 = vrot.slane %v4642_v32, %v6819_v28  ;;  %v4978_v62 = vadd.f32 %v1261_v15, %v1214_v3  ;;  %v1302_v16 = vmul.f32 %v4736_v34, %v1288_v4 }
 0x315   :  { %v4817_v11 = vpop.permute.xlu0 %1674  ;;  %v4960_v61 = vadd.f32 %v6862_v8, %v1496_v38  ;;  %v4970_v2 = vadd.f32 %v6865_v29, %v1523_v58  ;;  %v1293_v38 = vmul.f32 %v4733_v54, %v1288_v4  ;;  %v6868_v8 = vld [vmem:[#allocation25_spill] sm:$0xff]  ;;  %v1432_v39 = vmul.f32 %v4719_v0, %v1427_v30 }
 0x316   :  { %v1522_v51 = vadd.f32 %v6867_v56, %v1468_v36  ;;  %v1289_v55 = vmul.f32 %v1286_v26, %v6868_v8  ;;  %v1436_v13 = vmul.f32 %v4722_v6, %v1426_v47  ;;  %v4985_v48 = vadd.f32 %v1262_v25, %v1215_v42 }
 0x317   :  { %6863 = vst [vmem:[#allocation82_spill] sm:$0xff] %v4960_v61  ;;  %6866 = vst [vmem:[#allocation83_spill] sm:$0xff] %v4970_v2  ;;  %v1431_v61 = vmul.f32 %v4719_v0, %v1426_v47  ;;  %v4987_v29 = vadd.f32 %v1270_v37, %v1219_v43  ;;  %v1457_v36 = vmul.f32 %v4725_v7, %v1452_v21 }
 0x318   :  { %v4851_v17 = vpop.permute.xlu1 %1652  ;;  %v1437_v26 = vmul.f32 %v4722_v6, %v1427_v30  ;;  %v1458_v3 = vmul.f32 %v4725_v7, %v1453_v23  ;;  %v1466_v4 = vmul.f32 %v4728_v41, %v1452_v21  ;;  %v1658_v0 = vsel %vm706_vm3, %v4814_v63, %v4768_v12 }
 0x319   :  { %v4862_v5 = vpop.permute.xlu0 %1678  ;;  %v1294_v42 = vmul.f32 %v4733_v54, %v1289_v55  ;;  %v1467_v6 = vmul.f32 %v4728_v41, %v1453_v23  ;;  %v1461_v43 = vadd.f32 %v1457_v36, %v1431_v61  ;;  %v5009_v15 = vadd.f32 %v1271_v35, %v1220_v40  ;;  %v6870_v40 = vld [vmem:[#allocation30_spill] sm:$0xff] }
 0x31a   :  { %v1303_v30 = vmul.f32 %v4736_v34, %v1289_v55  ;;  %v1462_v25 = vadd.f32 %v1458_v3, %v1432_v39  ;;  %v1470_v37 = vadd.f32 %v1466_v4, %v1436_v13  ;;  %v1660_v2 = vmul.f32 %v1658_v0, %v6869_v19 }
 0x31b   :  { %v1471_v20 = vadd.f32 %v1467_v6, %v1437_v26  ;;  %v1657_v41 = vsel %vm706_vm3, %v4768_v12, %v4851_v17  ;;  %v5026_v55 = vadd.f32 %v1302_v16, %v4902_v10  ;;  %v6871_v39 = vrot.slane %v4651_v50, %v6819_v28 }
 0x31c   :  { %v4883_v57 = vpop.permute.xlu1 %1676  ;;  %v5035_v36 = vadd.f32 %v1294_v42, %v4879_v53  ;;  %v6872_v12 = vrot.slane %v4639_v52, %v6826_v46  ;;  %v6873_v10 = vrot.slane %v4654_v24, %v6819_v28  ;;  %v6875_v53 = vrot.slane %v4642_v32, %v6826_v46  ;;  %v6877_v42 = vld [vmem:[#allocation36_spill] sm:$0xff] }
 0x31d   :  { %v4892_v14 = vpop.permute.xlu0 %1310  ;;  %v1684_v47 = vsel %vm706_vm3, %v4817_v11, %v4883_v57  ;;  %v1683_v7 = vsel %vm706_vm3, %v4883_v57, %v4862_v5  ;;  %v5023_v57 = vadd.f32 %v1293_v38, %v4900_v49  ;;  %v5032_v13 = vadd.f32 %v6871_v39, %v1495_v33 }
 0x31e   :  { %v1686_v61 = vmul.f32 %v1684_v47, %v6869_v19  ;;  %v1687_v35 = vmul.f32 %v1683_v7, %v6870_v40  ;;  %v1497_v26 = vadd.f32 %v6872_v12, %v1461_v43  ;;  %v5047_v38 = vadd.f32 %v6873_v10, %v1522_v51  ;;  %v6878_v43 = vld [vmem:[#allocation64_spill] sm:$0xff] }
 0x31f   :  { %v6874_v33 = vrot.slane %v4639_v52, %v6821_v60  ;;  %v1524_v3 = vadd.f32 %v6875_v53, %v1470_v37  ;;  %v1661_v4 = vmul.f32 %v1657_v41, %v6870_v40  ;;  %v5063_v51 = vadd.f32 %v1303_v30, %v4885_v44  ;;  %v6879_v37 = vld [vmem:[#allocation60_spill] sm:$0xff] }
 0x320   :  { %v4916_v31 = vpop.permute.xlu1 %1280  ;;  %v6876_v52 = vrot.slane %v4642_v32, %v6821_v60  ;;  %v1665_v6 = vmul.f32 %v6877_v42, %v1660_v2  ;;  %v1691_v7 = vmul.f32 %v6878_v43, %v1686_v61  ;;  %v1670_v41 = vmul.f32 %v6879_v37, %v1660_v2  ;;  %v6881_v30 = vld [vmem:[#allocation56_spill] sm:$0xff] }
 0x321   :  { %v4927_v18 = vpop.permute.xlu0 %1316  ;;  %v1285_v49 = vsel %vm246_vm2, %v4694_v1, %v4916_v31  ;;  %v1498_v16 = vadd.f32 %v6874_v33, %v1462_v25  ;;  %v1284_v1 = vsel %vm246_vm2, %v4916_v31, %v4670_v45  ;;  %v1692_v39 = vmul.f32 %v6878_v43, %v1687_v35  ;;  %v6880_v45 = vld [vmem:[#allocation34_spill] sm:$0xff] }
 0x322   :  { %v1525_v47 = vadd.f32 %v6876_v52, %v1471_v20  ;;  %v1290_v31 = vmul.f32 %v1285_v49, %v6880_v45  ;;  %v1321_v44 = vsel %vm246_vm2, %v4927_v18, %v4892_v14  ;;  %v1700_v32 = vmul.f32 %v6881_v30, %v1686_v61  ;;  %v6882_v20 = vld [vmem:[#allocation35_spill] sm:$0xff] }
 0x323   :  { %v1291_v12 = vmul.f32 %v1284_v1, %v6882_v20  ;;  %v6883_v2 = vrot.slane %v4651_v50, %v6826_v46  ;;  %v1666_v49 = vmul.f32 %v6877_v42, %v1661_v4  ;;  %v1701_v53 = vmul.f32 %v6881_v30, %v1687_v35 }
 0x324   :  { %v4950_v59 = vpop.permute.xlu1 %1312  ;;  %v6885_v61 = vrot.slane %v4651_v50, %v6821_v60  ;;  %v6887_v1 = vrot.slane %v4654_v24, %v6826_v46  ;;  %v5103_v28 = vadd.f32 %v1691_v7, %v1665_v6  ;;  %v6889_v35 = vrot.slane %v4654_v24, %v6821_v60 }
 0x325   :  { %v4955_v27 = vpop.permute.xlu0 %1680  ;;  %v1320_v10 = vsel %vm246_vm2, %v4892_v14, %v4950_v59  ;;  %v5088_v33 = vadd.f32 %v6883_v2, %v1497_v26  ;;  %v1671_v14 = vmul.f32 %v6879_v37, %v1661_v4  ;;  %v1322_v26 = vmul.f32 %v1321_v44, %v6859_v9 }
 0x326   :  { %v5095_v40 = vadd.f32 %v6885_v61, %v1498_v16  ;;  %v5100_v19 = vadd.f32 %v6887_v1, %v1524_v3  ;;  %v5113_v50 = vadd.f32 %v1692_v39, %v1666_v49  ;;  %v1295_v16 = vmul.f32 %v4733_v54, %v1290_v31 }
 0x327   :  { %6884 = vst [vmem:[#allocation36_spill] sm:$0xff] %v5088_v33  ;;  %v5111_v33 = vadd.f32 %v6889_v35, %v1525_v47  ;;  %v1323_v3 = vmul.f32 %v1320_v10, %v6868_v8  ;;  %v1682_v4 = vsel %vm706_vm3, %v4862_v5, %v4955_v27  ;;  %v5121_v6 = vadd.f32 %v1700_v32, %v1670_v41  ;;  %v6892_v10 = vld [vmem:[#allocation57_spill] sm:$0xff] }
 0x328   :  { %v4983_v58 = vpop.permute.xlu1 %1654  ;;  %6886 = vst [vmem:[#allocation64_spill] sm:$0xff] %v5095_v40  ;;  %6888 = vst [vmem:[#allocation60_spill] sm:$0xff] %v5100_v19  ;;  %v1296_v7 = vmul.f32 %v4733_v54, %v1291_v12  ;;  %v1304_v44 = vmul.f32 %v4736_v34, %v1290_v31  ;;  %v1685_v24 = vsel %vm706_vm3, %v4955_v27, %v4817_v11  ;;  %v6891_v31 = vld [vmem:[#allocation63_spill] sm:$0xff]  ;;  %v6893_v27 = vld [vmem:[#allocation38_spill] sm:$0xff] }
 0x329   :  { %v4991_v56 = vpop.permute.xlu0 %1710  ;;  %6890 = vst [vmem:[#allocation56_spill] sm:$0xff] %v5111_v33  ;;  %v5129_v47 = vadd.f32 %v1701_v53, %v1671_v14  ;;  %v1305_v39 = vmul.f32 %v4736_v34, %v1291_v12  ;;  %v1656_v5 = vsel %vm706_vm3, %v4851_v17, %v4983_v58  ;;  %v1659_v54 = vsel %vm706_vm3, %v4983_v58, %v4814_v63  ;;  %v6894_v63 = vld [vmem:[#allocation39_spill] sm:$0xff] }
 0x32a   :  { %v1327_v32 = vmul.f32 %v6891_v31, %v1322_v26  ;;  %v1336_v11 = vmul.f32 %v6892_v10, %v1322_v26  ;;  %v1688_v49 = vmul.f32 %v1682_v4, %v6893_v27  ;;  %v1299_v17 = vadd.f32 %v1295_v16, %v4978_v62  ;;  %v6895_v16 = vld [vmem:[#allocation40_spill] sm:$0xff] }
 0x32b   :  { %v1328_v53 = vmul.f32 %v6891_v31, %v1323_v3  ;;  %v1689_v58 = vmul.f32 %v1685_v24, %v6894_v63  ;;  %v1300_v1 = vadd.f32 %v1296_v7, %v4985_v48  ;;  %v1308_v14 = vadd.f32 %v1304_v44, %v4987_v29 }
 0x32c   :  { %v5012_v21 = vpop.permute.xlu1 %1708  ;;  %v1662_v26 = vmul.f32 %v1656_v5, %v6893_v27  ;;  %v1663_v35 = vmul.f32 %v1659_v54, %v6894_v63  ;;  %v1309_v4 = vadd.f32 %v1305_v39, %v5009_v15  ;;  %v1337_v62 = vmul.f32 %v6892_v10, %v1323_v3 }
 0x32d   :  { %v5020_v23 = vpop.permute.xlu0 %1314  ;;  %v1718_v34 = vsel %vm788_vm4, %v5012_v21, %v4991_v56  ;;  %v5170_v48 = vadd.f32 %v1327_v32, %v5023_v57  ;;  %v5173_v29 = vadd.f32 %v1336_v11, %v5026_v55  ;;  %v1693_v7 = vmul.f32 %v6878_v43, %v1688_v49  ;;  %v6896_v11 = vld [vmem:[#allocation58_spill] sm:$0xff] }
 0x32e   :  { %v1318_v61 = vsel %vm246_vm2, %v5020_v23, %v4927_v18  ;;  %v1720_v8 = vmul.f32 %v1718_v34, %v6895_v16  ;;  %v1319_v24 = vsel %vm246_vm2, %v4950_v59, %v5020_v23  ;;  %v5180_v3 = vadd.f32 %v1328_v53, %v5035_v36  ;;  %v6897_v34 = vld [vmem:[#allocation61_spill] sm:$0xff] }
 0x32f   :  { %v1325_v15 = vmul.f32 %v1318_v61, %v6882_v20  ;;  %v1694_v39 = vmul.f32 %v6878_v43, %v1689_v58  ;;  %v1702_v59 = vmul.f32 %v6881_v30, %v1688_v49  ;;  %v1703_v23 = vmul.f32 %v6881_v30, %v1689_v58 }
 0x330   :  { %v5060_v0 = vpop.permute.xlu1 %1712  ;;  %v1667_v57 = vmul.f32 %v6877_v42, %v1662_v26  ;;  %v1668_v55 = vmul.f32 %v6877_v42, %v1663_v35  ;;  %v1324_v5 = vmul.f32 %v1319_v24, %v6880_v45  ;;  %v1341_v36 = vadd.f32 %v1337_v62, %v5063_v51  ;;  %v6900_v45 = vld [vmem:[#allocation44_spill] sm:$0xff] }
 0x331   :  { %v5070_v25 = vpop.permute.xlu0 %1346  ;;  %v1717_v54 = vsel %vm788_vm4, %v4991_v56, %v5060_v0  ;;  %v1672_v32 = vmul.f32 %v6879_v37, %v1662_v26  ;;  %v1673_v43 = vmul.f32 %v6879_v37, %v1663_v35  ;;  %v1725_v49 = vmul.f32 %v6896_v11, %v1720_v8  ;;  %v6898_v37 = vld [vmem:[#allocation41_spill] sm:$0xff] }
 0x332   :  { %v1734_v53 = vmul.f32 %v6897_v34, %v1720_v8  ;;  %v1330_v42 = vmul.f32 %v6891_v31, %v1325_v15  ;;  %v1339_v61 = vmul.f32 %v6892_v10, %v1325_v15  ;;  %v1721_v26 = vmul.f32 %v1717_v54, %v6898_v37  ;;  %v6899_v54 = vld [vmem:[#allocation45_spill] sm:$0xff] }
 0x333   :  { %v5214_v62 = vadd.f32 %v1693_v7, %v1667_v57  ;;  %v5216_v24 = vadd.f32 %v1694_v39, %v1668_v55  ;;  %v1338_v63 = vmul.f32 %v6892_v10, %v1324_v5  ;;  %v5220_v27 = vadd.f32 %v1702_v59, %v1672_v32  ;;  %v6901_v7 = vld [vmem:[#allocation48_spill] sm:$0xff] }
 0x334   :  { %v1345_v52 = vpop.permute.xlu1 %1344  ;;  %v5222_v15 = vadd.f32 %v1703_v23, %v1673_v43  ;;  %v5227_v60 = vadd.f32 %v1725_v49, %v5103_v28  ;;  %v5234_v59 = vadd.f32 %v1330_v42, %v1300_v1  ;;  %v5236_v23 = vadd.f32 %v1339_v61, %v1309_v4  ;;  %v6903_v1 = vld [vmem:[#allocation66_spill] sm:$0xff]  ;;  %v6904_v4 = vld [vmem:[#allocation67_spill] sm:$0xff] }
 0x335   :  { %v5106_v2 = vpop.permute.xlu0 %1580  ;;  %v1354_v58 = vsel %vm336_vm5, %v1345_v52, %v5070_v25  ;;  %v1726_v55 = vmul.f32 %v6896_v11, %v1721_v26  ;;  %v5242_v28 = vadd.f32 %v1338_v63, %v1308_v14 }
 0x336   :  { %v1357_v20 = vmul.f32 %v1354_v58, %v6899_v54 }
 0x338   :  { %v5140_v41 = vpop.permute.xlu1 %1350  ;;  %v1362_v49 = vmul.f32 %v6903_v1, %v1357_v20 }
 0x339   :  { %v5149_v12 = vpop.permute.xlu0 %1584  ;;  %v1355_v56 = vsel %vm336_vm5, %v5140_v41, %v1345_v52  ;;  %v1329_v52 = vmul.f32 %v6891_v31, %v1324_v5  ;;  %v6902_v31 = vld [vmem:[#allocation53_spill] sm:$0xff]  ;;  %v1735_v5 = vmul.f32 %v6897_v34, %v1721_v26 }
 0x33a   :  { %v1356_v9 = vmul.f32 %v1355_v56, %v6900_v45  ;;  %v6905_v56 = vld [vmem:[#allocation71_spill] sm:$0xff] }
 0x33b   :  { %v5240_v32 = vadd.f32 %v1329_v52, %v1299_v17  ;;  %v1739_v61 = vadd.f32 %v1735_v5, %v5129_v47  ;;  %v6908_v52 = vld [vmem:[#allocation72_spill] sm:$0xff] }
 0x33c   :  { %v1583_v18 = vpop.permute.xlu1 %1582  ;;  %v1361_v42 = vmul.f32 %v6903_v1, %v1356_v9  ;;  %v1370_v58 = vmul.f32 %v6904_v4, %v1356_v9  ;;  %v6906_v9 = vld [vmem:[#allocation51_spill] sm:$0xff] }
 0x33d   :  { %v5177_v44 = vpop.permute.xlu0 %1742  ;;  %v1589_v8 = vsel %vm616_vm6, %v1583_v18, %v5149_v12  ;;  %v1590_v35 = vsel %vm616_vm6, %v5106_v2, %v1583_v18  ;;  %v5230_v18 = vadd.f32 %v1734_v53, %v5121_v6  ;;  %v1371_v53 = vmul.f32 %v6904_v4, %v1357_v20 }
 0x33e   :  { %v1592_v39 = vmul.f32 %v1590_v35, %v6901_v7  ;;  %v1593_v57 = vmul.f32 %v1589_v8, %v6902_v31  ;;  %v1730_v20 = vadd.f32 %v1726_v55, %v5113_v50  ;;  %v6907_v8 = vld [vmem:[#allocation52_spill] sm:$0xff]  ;;  %v5277_v50 = vadd.f32 %v1362_v49, %v5180_v3 }
 0x33f   :  { %v5279_v47 = vadd.f32 %v1371_v53, %v1341_v36  ;;  %v6910_v53 = vld [vmem:[#allocation54_spill] sm:$0xff] }
 0x340   :  { %v1715_v30 = vpop.permute.xlu1 %1714  ;;  %v1597_v63 = vmul.f32 %v6905_v56, %v1592_v39  ;;  %v1598_v14 = vmul.f32 %v6905_v56, %v1593_v57  ;;  %v1606_v33 = vmul.f32 %v6908_v52, %v1592_v39  ;;  %v1607_v19 = vmul.f32 %v6908_v52, %v1593_v57 }
 0x341   :  { %v5204_v51 = vpop.permute.xlu0 %1746  ;;  %v1716_v6 = vsel %vm788_vm4, %v5060_v0, %v1715_v30  ;;  %v1719_v43 = vsel %vm788_vm4, %v1715_v30, %v5012_v21  ;;  %v5286_v57 = vadd.f32 %v1361_v42, %v5170_v48 }
 0x342   :  { %v1722_v26 = vmul.f32 %v1716_v6, %v6906_v9  ;;  %v1723_v35 = vmul.f32 %v1719_v43, %v6907_v8  ;;  %v5292_v6 = vadd.f32 %v1597_v63, %v5032_v13  ;;  %v5304_v42 = vadd.f32 %v1606_v33, %v5047_v38  ;;  %v6914_v33 = vld [vmem:[#allocation73_spill] sm:$0xff] }
 0x344   :  { %v1745_v46 = vpop.permute.xlu1 %1744  ;;  %v1727_v43 = vmul.f32 %v6896_v11, %v1722_v26  ;;  %v1728_v49 = vmul.f32 %v6896_v11, %v1723_v35  ;;  %v1736_v13 = vmul.f32 %v6897_v34, %v1722_v26  ;;  %v1737_v63 = vmul.f32 %v6897_v34, %v1723_v35 }
 0x345   :  { %v1379_v10 = vpop.permute.xlu0 %1378  ;;  %v1751_v0 = vsel %vm788_vm4, %v1745_v46, %v5204_v51  ;;  %v1752_v21 = vsel %vm788_vm4, %v5177_v44, %v1745_v46 }
 0x346   :  { %v1754_v55 = vmul.f32 %v1752_v21, %v6895_v16  ;;  %v1755_v5 = vmul.f32 %v1751_v0, %v6898_v37  ;;  %v6911_v0 = vld [vmem:[#allocation55_spill] sm:$0xff]  ;;  %v5338_v37 = vadd.f32 %v1736_v13, %v5220_v27  ;;  %v6916_v16 = vld [vmem:[#allocation62_spill] sm:$0xff] }
 0x348   :  { %v1349_v17 = vpop.permute.xlu1 %1348 }
 0x349   :  { %v5262_v30 = vpop.permute.xlu0 %1384  ;;  %v1352_v40 = vsel %vm336_vm5, %v1349_v17, %v5140_v41  ;;  %v1353_v46 = vsel %vm336_vm5, %v5070_v25, %v1349_v17  ;;  %v5289_v41 = vadd.f32 %v1370_v58, %v5173_v29  ;;  %v6909_v25 = vld [vmem:[#allocation82_spill] sm:$0xff]  ;;  %v6912_v29 = vld [vmem:[#allocation83_spill] sm:$0xff] }
 0x34a   :  { %v5295_v3 = vadd.f32 %v1598_v14, %v6909_v25  ;;  %v1358_v17 = vmul.f32 %v1353_v46, %v6910_v53  ;;  %v1359_v48 = vmul.f32 %v1352_v40, %v6911_v0  ;;  %v5307_v58 = vadd.f32 %v1607_v19, %v6912_v29  ;;  %v6913_v14 = vld [vmem:[#allocation14_spill] sm:$0xff] }
 0x34b   :  { %v1759_v21 = vmul.f32 %v6913_v14, %v1754_v55  ;;  %v1760_v25 = vmul.f32 %v6913_v14, %v1755_v5  ;;  %v1389_v11 = vsel %vm336_vm5, %v5262_v30, %v1379_v10  ;;  %v1768_v19 = vmul.f32 %v6914_v33, %v1754_v55 }
 0x34c   :  { %v5283_v39 = vpop.permute.xlu1 %1380  ;;  %v1769_v46 = vmul.f32 %v6914_v33, %v1755_v5  ;;  %v5330_v29 = vadd.f32 %v1727_v43, %v5214_v62  ;;  %v1363_v55 = vmul.f32 %v6903_v1, %v1358_v17  ;;  %v1364_v5 = vmul.f32 %v6903_v1, %v1359_v48 }
 0x34d   :  { %v5297_v36 = vpop.permute.xlu0 %1614  ;;  %v1388_v40 = vsel %vm336_vm5, %v1379_v10, %v5283_v39  ;;  %v5333_v10 = vadd.f32 %v1728_v49, %v5216_v24  ;;  %v5346_v62 = vadd.f32 %v1759_v21, %v5227_v60  ;;  %v5348_v43 = vadd.f32 %v1760_v25, %v1730_v20  ;;  %v6915_v24 = vld [vmem:[#allocation59_spill] sm:$0xff] }
 0x34e   :  { %v5353_v27 = vadd.f32 %v1768_v19, %v5230_v18  ;;  %v5355_v13 = vadd.f32 %v1769_v46, %v1739_v61  ;;  %v5362_v60 = vadd.f32 %v1363_v55, %v5240_v32  ;;  %v5365_v20 = vadd.f32 %v1364_v5, %v5234_v59  ;;  %v6918_v61 = vld [vmem:[#allocation74_spill] sm:$0xff]  ;;  %v6919_v25 = vld [vmem:[#allocation75_spill] sm:$0xff] }
 0x350   :  { %v1587_v38 = vpop.permute.xlu1 %1586  ;;  %6917 = vst [vmem:[#allocation63_spill] sm:$0xff] %v5365_v20 }
 0x351   :  { %v1588_v34 = vsel %vm616_vm6, %v5149_v12, %v1587_v38  ;;  %v1591_v26 = vsel %vm616_vm6, %v1587_v38, %v5106_v2  ;;  %v5327_v35 = vpop.permute.xlu0 %1618  ;;  %v5341_v12 = vadd.f32 %v1737_v63, %v5222_v15  ;;  %v1390_v2 = vmul.f32 %v1389_v11, %v6900_v45 }
 0x352   :  { %v1391_v38 = vmul.f32 %v1388_v40, %v6899_v54  ;;  %v1594_v49 = vmul.f32 %v1588_v34, %v6915_v24  ;;  %v1595_v0 = vmul.f32 %v1591_v26, %v6916_v16  ;;  %v1372_v15 = vmul.f32 %v6904_v4, %v1358_v17 }
 0x353   :  { %v1373_v63 = vmul.f32 %v6904_v4, %v1359_v48  ;;  %v1395_v17 = vmul.f32 %v6918_v61, %v1390_v2  ;;  %v1404_v4 = vmul.f32 %v6919_v25, %v1390_v2 }
 0x354   :  { %v1617_v1 = vpop.permute.xlu1 %1616  ;;  %v1396_v48 = vmul.f32 %v6918_v61, %v1391_v38  ;;  %v1405_v32 = vmul.f32 %v6919_v25, %v1391_v38  ;;  %v1599_v40 = vmul.f32 %v6905_v56, %v1594_v49  ;;  %v1600_v59 = vmul.f32 %v6905_v56, %v1595_v0 }
 0x355   :  { %v5359_v11 = vpop.permute.xlu0 %1776  ;;  %v1623_v21 = vsel %vm616_vm6, %v1617_v1, %v5327_v35  ;;  %v1624_v18 = vsel %vm616_vm6, %v5297_v36, %v1617_v1  ;;  %v1608_v26 = vmul.f32 %v6908_v52, %v1594_v49  ;;  %v1609_v55 = vmul.f32 %v6908_v52, %v1595_v0  ;;  %v6920_v1 = vld [vmem:[#allocation76_spill] sm:$0xff] }
 0x356   :  { %v1626_v19 = vmul.f32 %v1624_v18, %v6901_v7  ;;  %v1627_v46 = vmul.f32 %v1623_v21, %v6902_v31  ;;  %v6921_v7 = vld [vmem:[#allocation77_spill] sm:$0xff]  ;;  %v5394_v49 = vadd.f32 %v1372_v15, %v5242_v28  ;;  %v5397_v52 = vadd.f32 %v1373_v63, %v5236_v23  ;;  %v6925_v28 = vld [vmem:[#allocation64_spill] sm:$0xff] }
 0x357   :  { %v1400_v45 = vadd.f32 %v1396_v48, %v5277_v50  ;;  %v1604_v15 = vadd.f32 %v1600_v59, %v6925_v28  ;;  %v6927_v63 = vld [vmem:[#allocation56_spill] sm:$0xff] }
 0x358   :  { %v1749_v34 = vpop.permute.xlu1 %1748  ;;  %v1631_v56 = vmul.f32 %v6920_v1, %v1626_v19  ;;  %v1632_v18 = vmul.f32 %v6920_v1, %v1627_v46  ;;  %v1640_v21 = vmul.f32 %v6921_v7, %v1626_v19  ;;  %v1641_v31 = vmul.f32 %v6921_v7, %v1627_v46  ;;  %6922 = vst [vmem:[#allocation57_spill] sm:$0xff] %v5394_v49  ;;  %v6924_v46 = vld [vmem:[#allocation36_spill] sm:$0xff] }
 0x359   :  { %v1750_v5 = vsel %vm788_vm4, %v5204_v51, %v1749_v34  ;;  %v1753_v2 = vsel %vm788_vm4, %v1749_v34, %v5177_v44  ;;  %v1781_v38 = vpop.permute.xlu0 %1780  ;;  %6923 = vst [vmem:[#allocation58_spill] sm:$0xff] %v5397_v52  ;;  %v1399_v44 = vadd.f32 %v1395_v17, %v5286_v57  ;;  %v1408_v34 = vadd.f32 %v1404_v4, %v5289_v41  ;;  %v6926_v49 = vld [vmem:[#allocation60_spill] sm:$0xff] }
 0x35a   :  { %v1756_v51 = vmul.f32 %v1750_v5, %v6906_v9  ;;  %v1757_v0 = vmul.f32 %v1753_v2, %v6907_v8  ;;  %v1409_v19 = vadd.f32 %v1405_v32, %v5279_v47  ;;  %v1603_v20 = vadd.f32 %v1599_v40, %v6924_v46  ;;  %v6929_v40 = vld [vmem:[#allocation68_spill] sm:$0xff] }
 0x35b   :  { %v1612_v23 = vadd.f32 %v1608_v26, %v6926_v49  ;;  %v1613_v52 = vadd.f32 %v1609_v55, %v6927_v63  ;;  %v1635_v2 = vadd.f32 %v1631_v56, %v5292_v6  ;;  %v1636_v57 = vadd.f32 %v1632_v18, %v5295_v3 }
 0x35c   :  { %v1779_v54 = vpop.permute.xlu1 %1778  ;;  %v1644_v41 = vadd.f32 %v1640_v21, %v5304_v42  ;;  %v1645_v50 = vadd.f32 %v1641_v31, %v5307_v58  ;;  %v1761_v47 = vmul.f32 %v6913_v14, %v1756_v51  ;;  %v1762_v17 = vmul.f32 %v6913_v14, %v1757_v0  ;;  %v6928_v58 = vld [vmem:[#allocation65_spill] sm:$0xff]  ;;  %v6930_v21 = vld [vmem:[#allocation78_spill] sm:$0xff] }
 0x35d   :  { %v1621_v5 = vpop.permute.xlu0 %1620  ;;  %v1770_v4 = vmul.f32 %v6914_v33, %v1756_v51  ;;  %v1771_v48 = vmul.f32 %v6914_v33, %v1757_v0  ;;  %v1785_v32 = vsel %vm878_vm7, %v1779_v54, %v1781_v38  ;;  %v1786_v6 = vsel %vm878_vm7, %v5359_v11, %v1779_v54  ;;  %v6931_v0 = vld [vmem:[#allocation79_spill] sm:$0xff] }
 0x35e   :  { %v1622_v3 = vsel %vm616_vm6, %v5327_v35, %v1621_v5  ;;  %v1625_v31 = vsel %vm616_vm6, %v1621_v5, %v5297_v36  ;;  %v1788_v14 = vmul.f32 %v1786_v6, %v6928_v58  ;;  %v1789_v33 = vmul.f32 %v1785_v32, %v6929_v40 }
 0x35f   :  { %v1628_v59 = vmul.f32 %v1622_v3, %v6915_v24  ;;  %v1629_v26 = vmul.f32 %v1625_v31, %v6916_v16  ;;  %v5432_v55 = vadd.f32 %v1635_v2, %v1399_v44  ;;  %v5434_v54 = vadd.f32 %v1636_v57, %v1400_v45 }
 0x360   :  { %v1383_v42 = vpop.permute.xlu1 %1382  ;;  %v5436_v56 = vadd.f32 %v1644_v41, %v1408_v34  ;;  %v5438_v35 = vadd.f32 %v1645_v50, %v1409_v19  ;;  %v1765_v18 = vadd.f32 %v1761_v47, %v5330_v29  ;;  %v1766_v36 = vadd.f32 %v1762_v17, %v5333_v10 }
 0x361   :  { %v1793_v49 = vmul.f32 %v6930_v21, %v1788_v14  ;;  %v1794_v51 = vmul.f32 %v6930_v21, %v1789_v33  ;;  %v1802_v46 = vmul.f32 %v6931_v0, %v1788_v14  ;;  %v1803_v28 = vmul.f32 %v6931_v0, %v1789_v33  ;;  %v1811_v47 = vpop.permute.xlu0 %1810 }
 0x362   :  { %v1386_v45 = vsel %vm336_vm5, %v1383_v42, %v5262_v30  ;;  %v1387_v44 = vsel %vm336_vm5, %v5283_v39, %v1383_v42  ;;  %v1774_v29 = vadd.f32 %v1770_v4, %v5338_v37  ;;  %v1775_v10 = vadd.f32 %v1771_v48, %v5341_v12  ;;  %v6932_v39 = vld [vmem:[#allocation55_spill] sm:$0xff]  ;;  %v6934_v4 = vld [vmem:[#allocation70_spill] sm:$0xff] }
 0x363   :  { %v1633_v19 = vmul.f32 %v6920_v1, %v1628_v59  ;;  %v1634_v63 = vmul.f32 %v6920_v1, %v1629_v26  ;;  %v1797_v5 = vadd.f32 %v1793_v49, %v5346_v62  ;;  %v1798_v2 = vadd.f32 %v1794_v51, %v5348_v43  ;;  %v6933_v1 = vld [vmem:[#allocation69_spill] sm:$0xff]  ;;  %v6935_v49 = vld [vmem:[#allocation63_spill] sm:$0xff] }
 0x364   :  { %v1783_v34 = vpop.permute.xlu1 %1782  ;;  %v1642_v57 = vmul.f32 %v6921_v7, %v1628_v59  ;;  %v1643_v30 = vmul.f32 %v6921_v7, %v1629_v26  ;;  %v1392_v41 = vmul.f32 %v1387_v44, %v6910_v53  ;;  %v1393_v50 = vmul.f32 %v1386_v45, %v6932_v39  ;;  %v6936_v51 = vld [vmem:[#allocation57_spill] sm:$0xff] }
 0x365   :  { %v1784_v37 = vsel %vm878_vm7, %v1781_v38, %v1783_v34  ;;  %v1787_v12 = vsel %vm878_vm7, %v1783_v34, %v5359_v11  ;;  %v1806_v62 = vadd.f32 %v1802_v46, %v5353_v27  ;;  %v1807_v43 = vadd.f32 %v1803_v28, %v5355_v13  ;;  %v6937_v28 = vld [vmem:[#allocation58_spill] sm:$0xff] }
 0x366   :  { %v1790_v17 = vmul.f32 %v1784_v37, %v6933_v1  ;;  %v1791_v7 = vmul.f32 %v1787_v12, %v6934_v4  ;;  %v1397_v32 = vmul.f32 %v6918_v61, %v1392_v41  ;;  %v1398_v6 = vmul.f32 %v6918_v61, %v1393_v50  ;;  %v6939_v12 = vld [vmem:[#allocation81_spill] sm:$0xff] }
 0x367   :  { %v1406_v3 = vmul.f32 %v6919_v25, %v1392_v41  ;;  %v1407_v38 = vmul.f32 %v6919_v25, %v1393_v50  ;;  %v1637_v42 = vadd.f32 %v1633_v19, %v1603_v20  ;;  %v1638_v14 = vadd.f32 %v1634_v63, %v1604_v15  ;;  %v1815_v50 = vpop.permute.xlu0 %1814 }
 0x368   :  { %v1813_v48 = vpop.permute.xlu1 %1812  ;;  %v1795_v31 = vmul.f32 %v6930_v21, %v1790_v17  ;;  %v1796_v11 = vmul.f32 %v6930_v21, %v1791_v7  ;;  %v1804_v27 = vmul.f32 %v6931_v0, %v1790_v17  ;;  %v1805_v13 = vmul.f32 %v6931_v0, %v1791_v7 }
 0x369   :  { %v1646_v33 = vadd.f32 %v1642_v57, %v1612_v23  ;;  %v1647_v59 = vadd.f32 %v1643_v30, %v1613_v52  ;;  %v1401_v26 = vadd.f32 %v1397_v32, %v5362_v60  ;;  %v1402_v61 = vadd.f32 %v1398_v6, %v6935_v49  ;;  %v6938_v57 = vld [vmem:[#allocation80_spill] sm:$0xff] }
 0x36a   :  { %v1410_v46 = vadd.f32 %v1406_v3, %v6936_v51  ;;  %v1411_v25 = vadd.f32 %v1407_v38, %v6937_v28  ;;  %v1799_v44 = vadd.f32 %v1795_v31, %v1765_v18  ;;  %v1800_v34 = vadd.f32 %v1796_v11, %v1766_v36 }
 0x36b   :  { %v1808_v21 = vadd.f32 %v1804_v27, %v1774_v29  ;;  %v1809_v41 = vadd.f32 %v1805_v13, %v1775_v10  ;;  %v1819_v20 = vsel %vm878_vm7, %v1813_v48, %v1815_v50  ;;  %v1820_v52 = vsel %vm878_vm7, %v1811_v47, %v1813_v48 }
 0x36c   :  { %v1817_v45 = vpop.permute.xlu1 %1816  ;;  %v1822_v23 = vmul.f32 %v1820_v52, %v6928_v58  ;;  %v1823_v18 = vmul.f32 %v1819_v20, %v6929_v40  ;;  %v1846_v29 = vadd.f32 %v1637_v42, %v1401_v26  ;;  %v1847_v10 = vadd.f32 %v1638_v14, %v1402_v61  ;;  %v6979_v58 = vld [vmem:[#allocation35_spill] sm:$0xff] }
 0x36d   :  { %v1818_v60 = vsel %vm878_vm7, %v1815_v50, %v1817_v45  ;;  %v1821_v15 = vsel %vm878_vm7, %v1817_v45, %v1811_v47  ;;  %v1854_v19 = vadd.f32 %v1646_v33, %v1410_v46  ;;  %v1855_v63 = vadd.f32 %v1647_v59, %v1411_v25 }
 0x36e   :  { %v1824_v36 = vmul.f32 %v1818_v60, %v6933_v1  ;;  %v1825_v0 = vmul.f32 %v1821_v15, %v6934_v4  ;;  %v1827_v30 = vmul.f32 %v6938_v57, %v1822_v23  ;;  %v1828_v37 = vmul.f32 %v6938_v57, %v1823_v18 }
 0x36f   :  { %v1836_v17 = vmul.f32 %v6939_v12, %v1822_v23  ;;  %v1837_v47 = vmul.f32 %v6939_v12, %v1823_v18 }
 0x370   :  { %v1829_v7 = vmul.f32 %v6938_v57, %v1824_v36  ;;  %v1830_v48 = vmul.f32 %v6938_v57, %v1825_v0  ;;  %v1838_v32 = vmul.f32 %v6939_v12, %v1824_v36  ;;  %v1839_v6 = vmul.f32 %v6939_v12, %v1825_v0 }
 0x371   :  { %v1831_v3 = vadd.f32 %v1827_v30, %v1797_v5  ;;  %v1832_v38 = vadd.f32 %v1828_v37, %v1798_v2  ;;  %v1840_v31 = vadd.f32 %v1836_v17, %v1806_v62  ;;  %v1841_v11 = vadd.f32 %v1837_v47, %v1807_v43 }
 0x372   :  { %v1833_v27 = vadd.f32 %v1829_v7, %v1799_v44  ;;  %v1834_v13 = vadd.f32 %v1830_v48, %v1800_v34  ;;  %v1842_v42 = vadd.f32 %v1838_v32, %v1808_v21  ;;  %v1843_v14 = vadd.f32 %v1839_v6, %v1809_v41 }
 0x373   :  { %v1848_v33 = vadd.f32 %v5432_v55, %v1831_v3  ;;  %v1849_v59 = vadd.f32 %v5434_v54, %v1832_v38  ;;  %v1856_v26 = vadd.f32 %v5436_v56, %v1840_v31  ;;  %v1857_v49 = vadd.f32 %v5438_v35, %v1841_v11 }
 0x374   :  { %v1850_v61 = vadd.f32 %v1846_v29, %v1833_v27  ;;  %v1858_v51 = vadd.f32 %v1854_v19, %v1842_v42  ;;  %v1859_v46 = vadd.f32 %v1855_v63, %v1843_v14  ;;  %v1851_v28 = vadd.f32 %v1847_v10, %v1834_v13 }
 0x375   :  { %v1939_v5 = vsel %vm976_vm8, %v1856_v26, 0.0  ;;  %v1940_v2 = vsel %vm976_vm8, %v1857_v49, 0.0  ;;  %v1860_v62 = vsel %vm976_vm8, %v1848_v33, 0.0  ;;  %v1861_v43 = vsel %vm976_vm8, %v1849_v59, 0.0 }
 0x376   :  { %v1941_v25 = vadd.f32 %v1940_v2, %v1939_v5  ;;  %v1942_v55 = vsel %vm976_vm8, %v1858_v51, 0.0  ;;  %v1862_v54 = vadd.f32 %v1861_v43, %v1860_v62  ;;  %v1863_v56 = vsel %vm976_vm8, %v1850_v61, 0.0 }
 0x377   :  { %v1944_v44 = vsel %vm976_vm8, %v1859_v46, 0.0  ;;  %v1865_v34 = vsel %vm976_vm8, %v1851_v28, 0.0  ;;  %v1890_v2 = vstv %s2998_s24  ;;  %s6006_s24 = sld [smem:[#allocation2 + $0x56]] }
 0x378   :  { %v1943_v45 = vadd.f32 %v1942_v55, %v1941_v25  ;;  %v1864_v35 = vadd.f32 %v1863_v56, %v1862_v54  ;;  %v1896_v25 = vstv %s3000_s25  ;;  %v1969_v55 = vstv %s2999_s30  ;;  %s6018_s25 = sld [smem:[#allocation2 + $0x68]] }
 0x379   :  { %s6024_s30 = sld [smem:[#allocation2 + $0x59]] }
 0x37a   :  { %v1945_v21 = vadd.f32 %v1944_v44, %v1943_v45  ;;  %v1866_v41 = vadd.f32 %v1865_v34, %v1864_v35 }
 0x37c   :  { %1946 = vadd.xlane.f32.xlu1 %v1945_v21  ;;  %1867 = vadd.xlane.f32.xlu0 %v1866_v41 }
 0x405   :  { %v1947_v50 = vpop.xlane.xlu1 %1946  ;;  %v1868_v20 = vpop.xlane.xlu0 %1867 }
 0x406   :  { %v1948_v52 = vmul.f32 0.001953125, %v1947_v50  ;;  %v1869_v60 = vmul.f32 0.001953125, %v1868_v20  ;;  %v1975_v20 = vstv %s3001_s4  ;;  %s6032_s4 = sld [smem:[#allocation2 + $0x6b]] }
 0x408   :  { %v5515_v15 = vsub.f32 %v1856_v26, %v1948_v52  ;;  %v5517_v23 = vsub.f32 %v1857_v49, %v1948_v52  ;;  %v5519_v18 = vsub.f32 %v1858_v51, %v1948_v52  ;;  %v1870_v36 = vsub.f32 %v1848_v33, %v1869_v60 }
 0x409   :  { %v1871_v0 = vsub.f32 %v1849_v59, %v1869_v60  ;;  %v1872_v29 = vsub.f32 %v1850_v61, %v1869_v60  ;;  %v1873_v10 = vsub.f32 %v1851_v28, %v1869_v60  ;;  %v1952_v12 = vsub.f32 %v1859_v46, %v1948_v52  ;;  %v6940_v60 = vld [vmem:[#allocation46_spill] sm:$0xff] }
 0x40a   :  { %v1953_v19 = vmul.f32 %v5515_v15, %v5515_v15  ;;  %v1954_v63 = vmul.f32 %v5517_v23, %v5517_v23  ;;  %v1874_v57 = vmul.f32 %v1870_v36, %v1870_v36  ;;  %v1955_v6 = vmul.f32 %v5519_v18, %v5519_v18 }
 0x40b   :  { %v1875_v30 = vmul.f32 %v1871_v0, %v1871_v0  ;;  %v1876_v37 = vmul.f32 %v1872_v29, %v1872_v29  ;;  %v1877_v7 = vmul.f32 %v1873_v10, %v1873_v10  ;;  %v1956_v13 = vmul.f32 %v1952_v12, %v1952_v12 }
 0x40c   :  { %v1957_v17 = vsel %vm976_vm8, %v1953_v19, 0.0  ;;  %v1958_v47 = vsel %vm976_vm8, %v1954_v63, 0.0  ;;  %v1878_v48 = vsel %vm976_vm8, %v1874_v57, 0.0  ;;  %v1960_v42 = vsel %vm976_vm8, %v1955_v6, 0.0  ;;  %v6941_v63 = vld [vmem:[#allocation43_spill] sm:$0xff] }
 0x40d   :  { %v1879_v32 = vsel %vm976_vm8, %v1875_v30, 0.0  ;;  %v1959_v38 = vadd.f32 %v1958_v47, %v1957_v17  ;;  %v1881_v31 = vsel %vm976_vm8, %v1876_v37, 0.0  ;;  %v1883_v27 = vsel %vm976_vm8, %v1877_v7, 0.0  ;;  %v6942_v30 = vld [vmem:[#allocation32_spill] sm:$0xff]  ;;  %v6943_v17 = vld [vmem:[#allocation47_spill] sm:$0xff] }
 0x40e   :  { %v1880_v3 = vadd.f32 %v1879_v32, %v1878_v48  ;;  %v1962_v59 = vsel %vm976_vm8, %v1956_v13, 0.0 }
 0x40f   :  { %v1961_v33 = vadd.f32 %v1960_v42, %v1959_v38  ;;  %v6944_v42 = vld [vmem:[#allocation50_spill] sm:$0xff] }
 0x410   :  { %v1882_v11 = vadd.f32 %v1881_v31, %v1880_v3 }
 0x411   :  { %v1963_v26 = vadd.f32 %v1962_v59, %v1961_v33  ;;  %v6945_v33 = vld [vmem:[#allocation49_spill] sm:$0xff] }
 0x412   :  { %v1884_v14 = vadd.f32 %v1883_v27, %v1882_v11 }
 0x414   :  { %1885 = vadd.xlane.f32.xlu0 %v1884_v14 }
 0x418   :  { %1964 = vadd.xlane.f32.xlu0 %v1963_v26 }
 0x49d   :  { %v1886_v49 = vpop.xlane.xlu0 %1885 }
 0x49e   :  { %v1887_v61 = vmul.f32 0.001953125, %v1886_v49 }
 0x4a0   :  { %v1888_v51 = vadd.f32 1e-05, %v1887_v61 }
 0x4a1   :  { %v1965_v46 = vpop.xlane.xlu0 %1964 }
 0x4a2   :  { %3063 = vrsqrt.f32 %v1888_v51  ;;  %v1966_v28 = vmul.f32 0.001953125, %v1965_v46 }
 0x4a4   :  { %v1967_v5 = vadd.f32 1e-05, %v1966_v28 }
 0x4a6   :  { %3065 = vrsqrt.f32 %v1967_v5 }
 0x4af   :  { %v3064_v62 = vpop.eup %3063 }
 0x4b0   :  { %v1891_v43 = vmul.f32 %v3064_v62, %v1890_v2 }
 0x4b2   :  { %v1892_v54 = vmul.f32 %v1891_v43, %v1870_v36  ;;  %v1893_v56 = vmul.f32 %v1891_v43, %v1871_v0  ;;  %v1894_v45 = vmul.f32 %v1891_v43, %v1872_v29  ;;  %v1895_v35 = vmul.f32 %v1891_v43, %v1873_v10 }
 0x4b3   :  { %v3066_v44 = vpop.eup %3065 }
 0x4b4   :  { %v1897_v34 = vadd.f32 %v1896_v25, %v1892_v54  ;;  %v1898_v21 = vadd.f32 %v1896_v25, %v1893_v56  ;;  %v1899_v41 = vadd.f32 %v1896_v25, %v1894_v45  ;;  %v1900_v50 = vadd.f32 %v1896_v25, %v1895_v35 }
 0x4b5   :  { %v1970_v52 = vmul.f32 %v3066_v44, %v1969_v55 }
 0x4b6   :  { %v1901_v19 = vadd.f32 %v1897_v34, %v6940_v60  ;;  %v1902_v57 = vadd.f32 %v1898_v21, %v6941_v63  ;;  %v1903_v37 = vadd.f32 %v1899_v41, %v6942_v30  ;;  %v1904_v47 = vadd.f32 %v1900_v50, %v6943_v17  ;;  %v6950_v34 = vld [vmem:[#allocation17_spill] sm:$0xff]  ;;  %v6952_v41 = vld [vmem:[#allocation16_spill] sm:$0xff]  ;;  %v6959_v30 = vld [vmem:[#allocation18_spill] sm:$0xff] }
 0x4b7   :  { %v1971_v36 = vmul.f32 %v1970_v52, %v5515_v15  ;;  %v1972_v0 = vmul.f32 %v1970_v52, %v5517_v23  ;;  %v1973_v29 = vmul.f32 %v1970_v52, %v5519_v18  ;;  %v1974_v10 = vmul.f32 %v1970_v52, %v1952_v12  ;;  %v6946_v15 = vld [vmem:[#allocation33_spill] sm:$0xff]  ;;  %v6947_v23 = vld [vmem:[#allocation31_spill] sm:$0xff] }
 0x4b8   :  { %v1905_v7 = vmax.f32 %v1901_v19, 0.0  ;;  %v1906_v48 = vmax.f32 %v1902_v57, 0.0  ;;  %v1907_v32 = vmax.f32 %v1903_v37, 0.0  ;;  %v1908_v6 = vmax.f32 %v1904_v47, 0.0  ;;  %v6948_v18 = vld [vmem:[#allocation37_spill] sm:$0xff] }
 0x4b9   :  { %v1976_v3 = vadd.f32 %v1975_v20, %v1971_v36  ;;  %v1977_v38 = vadd.f32 %v1975_v20, %v1972_v0  ;;  %v1978_v31 = vadd.f32 %v1975_v20, %v1973_v29  ;;  %v1979_v11 = vadd.f32 %v1975_v20, %v1974_v10  ;;  %v6954_v20 = vld [vmem:[#allocation15_spill] sm:$0xff] }
 0x4ba   :  { %v1913_v27 = vcombine.low %v1905_v7, %v1906_v48  ;;  %v1914_v13 = vcombine.low %v1907_v32, %v1908_v6  ;;  %v6966_v48 = vld [vmem:[#allocation20_spill] sm:$0xff] }
 0x4bb   :  { %v1980_v14 = vadd.f32 %v1976_v3, %v6944_v42  ;;  %v1981_v59 = vadd.f32 %v1977_v38, %v6945_v33  ;;  %v1982_v26 = vadd.f32 %v1978_v31, %v6946_v15  ;;  %v1983_v49 = vadd.f32 %v1979_v11, %v6947_v23 }
 0x4bc   :  { %v1921_v12 = vrot.slane %v1913_v27, %v6948_v18  ;;  %v1928_v61 = vrot.slane %v1914_v13, %v6948_v18  ;;  %v5725_v38 = vstv %s3020_s6  ;;  %v5727_v31 = vstv %s3011_s17  ;;  %s6080_s6 = sld [smem:[#allocation2 + $0x74]] }
 0x4bd   :  { %v1984_v51 = vmax.f32 %v1980_v14, 0.0  ;;  %v1985_v46 = vmax.f32 %v1981_v59, 0.0  ;;  %v1986_v28 = vmax.f32 %v1982_v26, 0.0  ;;  %v1987_v5 = vmax.f32 %v1983_v49, 0.0  ;;  %v6967_v59 = vld [vmem:[#allocation19_spill] sm:$0xff]  ;;  %s6090_s17 = sld [smem:[#allocation2 + $0x5c]] }
 0x4be   :  { %v1929_v2 = vcombine.low %v1921_v12, %v1928_v61  ;;  %v5729_v11 = vstv %s3029_s18  ;;  %s6092_s18 = sld [smem:[#allocation2 + $0x6e]] }
 0x4bf   :  { %v1992_v62 = vcombine.low %v1984_v51, %v1985_v46  ;;  %v1993_v43 = vcombine.low %v1986_v28, %v1987_v5 }
 0x4c0   :  { %v1936_v25 = vrot.slane %v1929_v2, %v6948_v18 }
 0x4c1   :  { %v2000_v55 = vrot.slane %v1992_v62, %v6948_v18  ;;  %v2007_v54 = vrot.slane %v1993_v43, %v6948_v18 }
 0x4c2   :  { %1938 = vst.msk [vmem:[#allocation9] sm:$0xf] %vm4380_vm9, %v1936_v25 }
 0x4c3   :  { %v2008_v45 = vcombine.low %v2000_v55, %v2007_v54 }
 0x4c5   :  { %v2015_v35 = vrot.slane %v2008_v45, %v6948_v18 }
 0x4c7   :  { %2017 = vst.msk [vmem:[#allocation9 + $0x4] sm:$0xf] %vm4380_vm9, %v2015_v35 }
 0x4c9   :  { %v5556_v44 = vld [vmem:[#allocation9] sm:$0xf] }
 0x4ca   :  { %v5560_v21 = vrot.slane %v5556_v44, %v6950_v34  ;;  %v5564_v50 = vrot.slane %v5556_v44, %v6952_v41  ;;  %v5572_v52 = vrot.slane %v5556_v44, %v6954_v20  ;;  %v5606_v37 = vrot.slane %v5556_v44, %v6959_v30 }
 0x4cc   :  { %6951 = vst [vmem:[#allocation61_spill] sm:$0xff] %v5560_v21  ;;  %6953 = vst [vmem:[#allocation66_spill] sm:$0xff] %v5564_v50  ;;  %2083 = vrot.lane.b32.xlu0 %v5560_v21, %s3154_s1  ;;  %2081 = vrot.lane.b32.xlu1 %v5564_v50, %s3154_s1 }
 0x4cd   :  { %6955 = vst [vmem:[#allocation67_spill] sm:$0xff] %v5572_v52  ;;  %6960 = vst [vmem:[#allocation72_spill] sm:$0xff] %v5606_v37 }
 0x4ce   :  { %v5574_v60 = vld [vmem:[#allocation9 + $0x4] sm:$0xf] }
 0x4cf   :  { %v5578_v19 = vrot.slane %v5574_v60, %v6950_v34  ;;  %v5586_v63 = vrot.slane %v5574_v60, %v6952_v41  ;;  %v5594_v57 = vrot.slane %v5574_v60, %v6954_v20  ;;  %v5618_v17 = vrot.slane %v5574_v60, %v6959_v30 }
 0x4d0   :  { %2087 = vrot.lane.b32.xlu1 %v5572_v52, %s3154_s1 }
 0x4d1   :  { %6956 = vst [vmem:[#allocation71_spill] sm:$0xff] %v5578_v19  ;;  %2130 = vrot.lane.b32.xlu0 %v5578_v19, %s3154_s1  ;;  %6957 = vst [vmem:[#allocation51_spill] sm:$0xff] %v5586_v63 }
 0x4d2   :  { %6958 = vst [vmem:[#allocation52_spill] sm:$0xff] %v5594_v57  ;;  %6961 = vst [vmem:[#allocation82_spill] sm:$0xff] %v5618_v17 }
 0x4d4   :  { %2128 = vrot.lane.b32.xlu1 %v5586_v63, %s3154_s1 }
 0x4d5   :  { %2298 = vrot.lane.b32.xlu0 %v5564_v50, %s3155_s2 }
 0x4d8   :  { %2134 = vrot.lane.b32.xlu1 %v5594_v57, %s3154_s1 }
 0x4d9   :  { %2304 = vrot.lane.b32.xlu0 %v5572_v52, %s3155_s2 }
 0x4dc   :  { %2300 = vrot.lane.b32.xlu1 %v5560_v21, %s3155_s2 }
 0x4dd   :  { %2326 = vrot.lane.b32.xlu0 %v5578_v19, %s3155_s2 }
 0x4e0   :  { %2324 = vrot.lane.b32.xlu1 %v5586_v63, %s3155_s2 }
 0x4e1   :  { %2085 = vrot.lane.b32.xlu0 %v5606_v37, %s3154_s1 }
 0x4e4   :  { %2330 = vrot.lane.b32.xlu1 %v5594_v57, %s3155_s2 }
 0x4e5   :  { %2162 = vrot.lane.b32.xlu0 %v5564_v50, %s3156_s28 }
 0x4e8   :  { %2132 = vrot.lane.b32.xlu1 %v5618_v17, %s3154_s1  ;;  %s6962_s1 = smov 112  }
 0x4e9   :  { %2168 = vrot.lane.b32.xlu0 %v5572_v52, %s3156_s28 }
 0x4ec   :  { %2164 = vrot.lane.b32.xlu1 %v5560_v21, %s3156_s28 }
 0x4ed   :  { %2328 = vrot.lane.b32.xlu0 %v5618_v17, %s3155_s2 }
 0x4f0   :  { %2302 = vrot.lane.b32.xlu1 %v5606_v37, %s3155_s2  ;;  %s6963_s2 = smov 15  }
 0x4f1   :  { %2536 = vrot.lane.b32.xlu0 %v5560_v21, %s3157_s29 }
 0x4f4   :  { %2534 = vrot.lane.b32.xlu1 %v5564_v50, %s3157_s29 }
 0x4f5   :  { %2560 = vrot.lane.b32.xlu0 %v5586_v63, %s3157_s29 }
 0x4f8   :  { %2538 = vrot.lane.b32.xlu1 %v5606_v37, %s3157_s29 }
 0x4f9   :  { %2564 = vrot.lane.b32.xlu0 %v5618_v17, %s3157_s29 }
 0x4fc   :  { %2562 = vrot.lane.b32.xlu1 %v5578_v19, %s3157_s29 }
 0x4fd   :  { %2196 = vrot.lane.b32.xlu0 %v5586_v63, %s3156_s28 }
 0x500   :  { %2166 = vrot.lane.b32.xlu1 %v5606_v37, %s3156_s28 }
 0x501   :  { %2202 = vrot.lane.b32.xlu0 %v5594_v57, %s3156_s28 }
 0x504   :  { %2198 = vrot.lane.b32.xlu1 %v5578_v19, %s3156_s28 }
 0x505   :  { %2566 = vrot.lane.b32.xlu0 %v5594_v57, %s3157_s29 }
 0x508   :  { %2540 = vrot.lane.b32.xlu1 %v5572_v52, %s3157_s29  ;;  %s3002_s29 = sld [smem:[#allocation2 + $0x54]] }
 0x509   :  { %2596 = vrot.lane.b32.xlu0 %v5560_v21, %s6962_s1 }
 0x50c   :  { %2594 = vrot.lane.b32.xlu1 %v5564_v50, %s6962_s1 }
 0x50d   :  { %2200 = vrot.lane.b32.xlu0 %v5618_v17, %s3156_s28  ;;  %s6965_s28 = smov 111  }
 0x50e   :  { %v5723_v6 = vstv %s3002_s29  ;;  %s6072_s29 = sld [smem:[#allocation2 + $0x62]] }
 0x510   :  { %2598 = vrot.lane.b32.xlu1 %v5606_v37, %s6962_s1 }
 0x511   :  { %2232 = vrot.lane.b32.xlu0 %v5560_v21, %s6963_s2 }
 0x514   :  { %2230 = vrot.lane.b32.xlu1 %v5564_v50, %s6963_s2 }
 0x515   :  { %2466 = vrot.lane.b32.xlu0 %v5564_v50, %s6964_s5 }
 0x518   :  { %2236 = vrot.lane.b32.xlu1 %v5572_v52, %s6963_s2 }
 0x519   :  { %2470 = vrot.lane.b32.xlu0 %v5606_v37, %s6964_s5 }
 0x51c   :  { %2468 = vrot.lane.b32.xlu1 %v5560_v21, %s6964_s5 }
 0x51d   :  { %2628 = vrot.lane.b32.xlu0 %v5586_v63, %s6962_s1 }
 0x520   :  { %2600 = vrot.lane.b32.xlu1 %v5572_v52, %s6962_s1 }
 0x521   :  { %2632 = vrot.lane.b32.xlu0 %v5618_v17, %s6962_s1 }
 0x524   :  { %2630 = vrot.lane.b32.xlu1 %v5578_v19, %s6962_s1 }
 0x525   :  { %2264 = vrot.lane.b32.xlu0 %v5586_v63, %s6963_s2 }
 0x528   :  { %2234 = vrot.lane.b32.xlu1 %v5606_v37, %s6963_s2 }
 0x529   :  { %2270 = vrot.lane.b32.xlu0 %v5594_v57, %s6963_s2 }
 0x52c   :  { %2266 = vrot.lane.b32.xlu1 %v5578_v19, %s6963_s2 }
 0x52d   :  { %2500 = vrot.lane.b32.xlu0 %v5586_v63, %s6964_s5 }
 0x530   :  { %2472 = vrot.lane.b32.xlu1 %v5572_v52, %s6964_s5 }
 0x531   :  { %2504 = vrot.lane.b32.xlu0 %v5618_v17, %s6964_s5 }
 0x534   :  { %2502 = vrot.lane.b32.xlu1 %v5578_v19, %s6964_s5 }
 0x535   :  { %2662 = vrot.lane.b32.xlu0 %v5564_v50, %s6965_s28 }
 0x538   :  { %2634 = vrot.lane.b32.xlu1 %v5594_v57, %s6962_s1  ;;  %s6041_s1 = sld [smem:[#allocation2 + $0x64]] }
 0x539   :  { %2666 = vrot.lane.b32.xlu0 %v5606_v37, %s6965_s28 }
 0x53c   :  { %2664 = vrot.lane.b32.xlu1 %v5560_v21, %s6965_s28 }
 0x53d   :  { %2506 = vrot.lane.b32.xlu0 %v5594_v57, %s6964_s5  ;;  %s6054_s5 = sld [smem:[#allocation2 + $0x5f]] }
 0x53e   :  { %v2082_v47 = vpop.permute.xlu1 %2081  ;;  %v2084_v36 = vpop.permute.xlu0 %2083 }
 0x53f   :  { %v2091_v0 = vsel %vm143_vm1, %v2082_v47, %v2084_v36 }
 0x540   :  { %2268 = vrot.lane.b32.xlu1 %v5618_v17, %s6963_s2  ;;  %v2094_v32 = vmul.f32 %v2091_v0, %v6966_v48  ;;  %v6968_v0 = vld [vmem:[#allocation21_spill] sm:$0xff]  ;;  %s6048_s2 = sld [smem:[#allocation2 + $0x76]] }
 0x541   :  { %2696 = vrot.lane.b32.xlu0 %v5586_v63, %s6965_s28  ;;  %v6972_v63 = vld [vmem:[#allocation28_spill] sm:$0xff] }
 0x542   :  { %v2088_v29 = vpop.permute.xlu1 %2087  ;;  %v2099_v14 = vmul.f32 %v5723_v6, %v2094_v32  ;;  %v2104_v33 = vmul.f32 %v5725_v38, %v2094_v32  ;;  %v5768_v32 = vstv %s3005_s19  ;;  %s6102_s19 = sld [smem:[#allocation2 + $0x65]] }
 0x543   :  { %v2092_v10 = vsel %vm143_vm1, %v2088_v29, %v2082_v47  ;;  %v5716_v7 = vpop.permute.xlu0 %2130 }
 0x544   :  { %2668 = vrot.lane.b32.xlu1 %v5572_v52, %s6965_s28  ;;  %v2093_v15 = vmul.f32 %v2092_v10, %v6967_v59 }
 0x545   :  { %2700 = vrot.lane.b32.xlu0 %v5618_v17, %s6965_s28 }
 0x546   :  { %v2129_v3 = vpop.permute.xlu1 %2128  ;;  %v2098_v2 = vmul.f32 %v5723_v6, %v2093_v15  ;;  %v2103_v62 = vmul.f32 %v5725_v38, %v2093_v15 }
 0x547   :  { %v2138_v27 = vsel %vm143_vm1, %v2129_v3, %v5716_v7  ;;  %v2299_v13 = vpop.permute.xlu0 %2298 }
 0x548   :  { %v2141_v42 = vmul.f32 %v2138_v27, %v6966_v48  ;;  %2698 = vrot.lane.b32.xlu1 %v5578_v19, %s6965_s28  ;;  %v5772_v27 = vstv %s3032_s21  ;;  %s3038_s21 = sld [smem:[#allocation2 + $0x7a]] }
 0x54a   :  { %v2146_v26 = vmul.f32 %v5727_v31, %v2141_v42  ;;  %v2155_v23 = vmul.f32 %v5729_v11, %v2141_v42  ;;  %v2135_v49 = vpop.permute.xlu1 %2134 }
 0x54b   :  { %v2139_v12 = vsel %vm143_vm1, %v2135_v49, %v2129_v3  ;;  %v5744_v61 = vpop.permute.xlu0 %2304  ;;  %v5770_v3 = vstv %s3014_s20  ;;  %s6114_s20 = sld [smem:[#allocation2 + $0x77]] }
 0x54c   :  { %v5746_v51 = vadd.f32 %v2146_v26, %v2099_v14  ;;  %v5748_v46 = vadd.f32 %v2155_v23, %v2104_v33  ;;  %v2140_v28 = vmul.f32 %v2139_v12, %v6967_v59  ;;  %v2309_v5 = vsel %vm426_vm0, %v5744_v61, %v2299_v13  ;;  %2702 = vrot.lane.b32.xlu1 %v5594_v57, %s6965_s28  ;;  %v6969_v26 = vld [vmem:[#allocation22_spill] sm:$0xff]  ;;  %s6060_s28 = sld [smem:[#allocation2 + $0x71]] }
 0x54d   :  { %v5777_v14 = vstv %s3023_s22  ;;  %v2310_v23 = vmul.f32 %v2309_v5, %v6969_v26  ;;  %s3039_s22 = sld [smem:[#allocation2 + $0x7b]] }
 0x54e   :  { %v2145_v43 = vmul.f32 %v5727_v31, %v2140_v28  ;;  %v2154_v25 = vmul.f32 %v5729_v11, %v2140_v28  ;;  %v5760_v55 = vpop.permute.xlu1 %2300 }
 0x54f   :  { %v2308_v54 = vsel %vm426_vm0, %v2299_v13, %v5760_v55  ;;  %v5765_v45 = vpop.permute.xlu0 %2326 }
 0x550   :  { %v2149_v35 = vadd.f32 %v2145_v43, %v2098_v2  ;;  %v2158_v47 = vadd.f32 %v2154_v25, %v2103_v62  ;;  %v2311_v10 = vmul.f32 %v2308_v54, %v6968_v0  ;;  %v6970_v43 = vld [vmem:[#allocation23_spill] sm:$0xff]  ;;  %v6971_v54 = vld [vmem:[#allocation24_spill] sm:$0xff] }
 0x552   :  { %v2325_v48 = vpop.permute.xlu1 %2324  ;;  %v2316_v12 = vmul.f32 %v5768_v32, %v2311_v10  ;;  %v2321_v28 = vmul.f32 %v5777_v14, %v2311_v10  ;;  %v5798_v10 = vstv %s3003_s23  ;;  %s3040_s23 = sld [smem:[#allocation2 + $0x7c]] }
 0x553   :  { %v2334_v42 = vsel %vm426_vm0, %v2325_v48, %v5765_v45  ;;  %v2086_v13 = vpop.permute.xlu0 %2085 }
 0x554   :  { %v2337_v33 = vmul.f32 %v2334_v42, %v6968_v0  ;;  %v2089_v59 = vsel %vm143_vm1, %v2086_v13, %v2088_v29  ;;  %v2090_v15 = vsel %vm143_vm1, %v2084_v36, %v2086_v13  ;;  %v5800_v13 = vstv %s3021_s0  ;;  %s3041_s0 = sld [smem:[#allocation2 + $0x7d]] }
 0x555   :  { %v2095_v25 = vmul.f32 %v2090_v15, %v6970_v43  ;;  %v2096_v0 = vmul.f32 %v2089_v59, %v6971_v54  ;;  %v2320_v15 = vmul.f32 %v5777_v14, %v2310_v23 }
 0x556   :  { %v2342_v2 = vmul.f32 %v5770_v3, %v2337_v33  ;;  %v2351_v62 = vmul.f32 %v5772_v27, %v2337_v33  ;;  %v2331_v42 = vpop.permute.xlu1 %2330  ;;  %v2315_v33 = vmul.f32 %v5768_v32, %v2310_v23 }
 0x557   :  { %v2163_v56 = vpop.permute.xlu0 %2162  ;;  %v2335_v36 = vsel %vm426_vm0, %v2331_v42, %v2325_v48  ;;  %v2100_v59 = vmul.f32 %v5723_v6, %v2095_v25  ;;  %v2105_v23 = vmul.f32 %v5725_v38, %v2095_v25 }
 0x558   :  { %v5791_v29 = vadd.f32 %v2342_v2, %v2316_v12  ;;  %v5793_v18 = vadd.f32 %v2351_v62, %v2321_v28  ;;  %v2336_v5 = vmul.f32 %v2335_v36, %v6969_v26  ;;  %v2101_v12 = vmul.f32 %v5723_v6, %v2096_v0 }
 0x55a   :  { %v2133_v2 = vpop.permute.xlu1 %2132  ;;  %v2341_v28 = vmul.f32 %v5770_v3, %v2336_v5  ;;  %v2350_v62 = vmul.f32 %v5772_v27, %v2336_v5  ;;  %v2106_v5 = vmul.f32 %v5725_v38, %v2096_v0 }
 0x55b   :  { %v2136_v48 = vsel %vm143_vm1, %v2133_v2, %v2135_v49  ;;  %v2137_v26 = vsel %vm143_vm1, %v5716_v7, %v2133_v2  ;;  %v5813_v36 = vpop.permute.xlu0 %2168 }
 0x55c   :  { %v2142_v57 = vmul.f32 %v2137_v26, %v6970_v43  ;;  %v2143_v6 = vmul.f32 %v2136_v48, %v6971_v54  ;;  %v2173_v17 = vsel %vm246_vm2, %v5813_v36, %v2163_v56  ;;  %v5822_v19 = vadd.f32 %v2341_v28, %v2315_v33 }
 0x55d   :  { %v5824_v49 = vadd.f32 %v2350_v62, %v2320_v15  ;;  %v2174_v7 = vmul.f32 %v2173_v17, %v6972_v63 }
 0x55e   :  { %v2147_v2 = vmul.f32 %v5727_v31, %v2142_v57  ;;  %v2148_v25 = vmul.f32 %v5727_v31, %v2143_v6  ;;  %v2156_v43 = vmul.f32 %v5729_v11, %v2142_v57  ;;  %v2157_v54 = vmul.f32 %v5729_v11, %v2143_v6  ;;  %v5831_v48 = vpop.permute.xlu1 %2164  ;;  %v6973_v6 = vld [vmem:[#allocation25_spill] sm:$0xff] }
 0x55f   :  { %v2179_v26 = vmul.f32 %v5798_v10, %v2174_v7  ;;  %v2188_v38 = vmul.f32 %v5800_v13, %v2174_v7  ;;  %v2329_v0 = vpop.permute.xlu0 %2328  ;;  %v2172_v11 = vsel %vm246_vm2, %v2163_v56, %v5831_v48 }
 0x560   :  { %v5835_v33 = vadd.f32 %v2147_v2, %v2100_v59  ;;  %v5837_v15 = vadd.f32 %v2148_v25, %v2101_v12  ;;  %v5839_v17 = vadd.f32 %v2156_v43, %v2105_v23  ;;  %v5841_v28 = vadd.f32 %v2157_v54, %v2106_v5  ;;  %v6974_v23 = vld [vmem:[#allocation27_spill] sm:$0xff] }
 0x561   :  { %v5843_v31 = vadd.f32 %v2179_v26, %v2149_v35  ;;  %v5845_v57 = vadd.f32 %v2188_v38, %v2158_v47  ;;  %v2332_v62 = vsel %vm426_vm0, %v2329_v0, %v2331_v42  ;;  %v2175_v59 = vmul.f32 %v2172_v11, %v6973_v6  ;;  %v6975_v35 = vld [vmem:[#allocation26_spill] sm:$0xff] }
 0x562   :  { %v2333_v12 = vsel %vm426_vm0, %v5765_v45, %v2329_v0  ;;  %v2339_v5 = vmul.f32 %v2332_v62, %v6974_v23  ;;  %v2303_v7 = vpop.permute.xlu1 %2302 }
 0x563   :  { %v2338_v2 = vmul.f32 %v2333_v12, %v6975_v35  ;;  %v2306_v47 = vsel %vm426_vm0, %v2303_v7, %v5744_v61  ;;  %v2307_v56 = vsel %vm426_vm0, %v5760_v55, %v2303_v7  ;;  %v2537_v42 = vpop.permute.xlu0 %2536  ;;  %v2180_v25 = vmul.f32 %v5798_v10, %v2175_v59 }
 0x564   :  { %v2189_v43 = vmul.f32 %v5800_v13, %v2175_v59  ;;  %v2344_v45 = vmul.f32 %v5770_v3, %v2339_v5  ;;  %v2353_v54 = vmul.f32 %v5772_v27, %v2339_v5  ;;  %v2312_v26 = vmul.f32 %v2307_v56, %v6975_v35 }
 0x565   :  { %v2313_v38 = vmul.f32 %v2306_v47, %v6974_v23  ;;  %v5871_v61 = vadd.f32 %v2180_v25, %v5746_v51  ;;  %v2343_v0 = vmul.f32 %v5770_v3, %v2338_v2  ;;  %v2352_v11 = vmul.f32 %v5772_v27, %v2338_v2  ;;  %v6976_v47 = vld [vmem:[#allocation29_spill] sm:$0xff]  ;;  %v6977_v25 = vld [vmem:[#allocation30_spill] sm:$0xff] }
 0x566   :  { %v5874_v55 = vadd.f32 %v2189_v43, %v5748_v46  ;;  %v5878_v62 = vpop.permute.xlu1 %2534  ;;  %v2317_v59 = vmul.f32 %v5768_v32, %v2312_v26  ;;  %v2322_v23 = vmul.f32 %v5777_v14, %v2312_v26  ;;  %v5904_v26 = vstv %s3008_s26  ;;  %s3163_s26 = smov [#allocation9]  }
 0x567   :  { %v2318_v12 = vmul.f32 %v5768_v32, %v2313_v38  ;;  %v2323_v5 = vmul.f32 %v5777_v14, %v2313_v38  ;;  %v5884_v51 = vpop.permute.xlu0 %2560  ;;  %v2544_v46 = vsel %vm706_vm3, %v5878_v62, %v2537_v42 }
 0x568   :  { %v5889_v3 = vadd.f32 %v2343_v0, %v2317_v59  ;;  %v5893_v7 = vadd.f32 %v2352_v11, %v2322_v23  ;;  %v2546_v56 = vmul.f32 %v2544_v46, %v6976_v47  ;;  %v5910_v0 = vstv %s3035_s8 }
 0x569   :  { %v5891_v27 = vadd.f32 %v2344_v45, %v2318_v12  ;;  %v5895_v35 = vadd.f32 %v2353_v54, %v2323_v5  ;;  %v5906_v45 = vstv %s3026_s27  ;;  %v5908_v54 = vstv %s3017_s7  ;;  %s2909_s27 = sshll.u32 %s3163_s26, 4  ;;  %s2910_s27 = int_to_ptr.vmem [resolvable:$true] %s2909_s27 }
 0x56a   :  { %v5897_v32 = vpop.permute.xlu1 %2538  ;;  %v2551_v5 = vmul.f32 %v5904_v26, %v2546_v56  ;;  %v2556_v46 = vmul.f32 %v5906_v45, %v2546_v56  ;;  %s3119_s7 = scalar_lea.vmem %s2910_s27, 128  ;;  %p3124_p11 = scmp.lt.s32.totalorder %s2910_s27, %s2910_s27 }
 0x56b   :  { %v2565_v2 = vpop.permute.xlu0 %2564  ;;  %v2543_v14 = vsel %vm706_vm3, %v2537_v42, %v5897_v32  ;;  %p3120_p10 = scmp.ne.s32.totalorder %s2910_s27, %s3119_s7  ;;  %p3125_p12 = scmp.lt.s32.totalorder %s3119_s7, %s3119_s7 }
 0x56c   :  { %v2547_v43 = vmul.f32 %v2543_v14, %v6977_v25 }
 0x56d   :  { %p3126_p13 = por %p3125_p12, %p3124_p11 }
 0x56e   :  { %v2563_v38 = vpop.permute.xlu1 %2562  ;;  %v2552_v14 = vmul.f32 %v5904_v26, %v2547_v43  ;;  %v2557_v52 = vmul.f32 %v5906_v45, %v2547_v43 }
 0x56f   :  { %v2569_v11 = vsel %vm706_vm3, %v2563_v38, %v2565_v2  ;;  %v2570_v42 = vsel %vm706_vm3, %v5884_v51, %v2563_v38  ;;  %v2197_v59 = vpop.permute.xlu0 %2196  ;;  %p3127_p0 = pnand %p3126_p13, %p3120_p10 }
 0x570   :  { %v2572_v12 = vmul.f32 %v2570_v42, %v6976_v47  ;;  %v2573_v23 = vmul.f32 %v2569_v11, %v6977_v25  ;;  %v5933_v25 = vstv %s3012_s9 }
 0x572   :  { %v2577_v37 = vmul.f32 %v5908_v54, %v2572_v12  ;;  %v2578_v21 = vmul.f32 %v5908_v54, %v2573_v23  ;;  %v2586_v50 = vmul.f32 %v5910_v0, %v2572_v12  ;;  %v2587_v38 = vmul.f32 %v5910_v0, %v2573_v23  ;;  %v2167_v4 = vpop.permute.xlu1 %2166  ;;  %v6978_v23 = vld [vmem:[#allocation34_spill] sm:$0xff] }
 0x573   :  { %v2170_v47 = vsel %vm246_vm2, %v2167_v4, %v5813_v36  ;;  %v2171_v56 = vsel %vm246_vm2, %v5831_v48, %v2167_v4  ;;  %v2203_v43 = vpop.permute.xlu0 %2202  ;;  %v5945_v36 = vstv %s3030_s10 }
 0x574   :  { %v5935_v11 = vadd.f32 %v2577_v37, %v2551_v5  ;;  %v5937_v42 = vadd.f32 %v2578_v21, %v2552_v14  ;;  %v5939_v1 = vadd.f32 %v2586_v50, %v2556_v46  ;;  %v5941_v12 = vadd.f32 %v2587_v38, %v2557_v52 }
 0x575   :  { %v2176_v40 = vmul.f32 %v2171_v56, %v6978_v23  ;;  %v2177_v16 = vmul.f32 %v2170_v47, %v6979_v58  ;;  %v2207_v4 = vsel %vm246_vm2, %v2203_v43, %v2197_v59 }
 0x576   :  { %v2208_v48 = vmul.f32 %v2207_v4, %v6972_v63  ;;  %v2199_v24 = vpop.permute.xlu1 %2198 }
 0x577   :  { %v2181_v21 = vmul.f32 %v5798_v10, %v2176_v40  ;;  %v2182_v50 = vmul.f32 %v5798_v10, %v2177_v16  ;;  %v2190_v52 = vmul.f32 %v5800_v13, %v2176_v40  ;;  %v2191_v37 = vmul.f32 %v5800_v13, %v2177_v16  ;;  %v2567_v5 = vpop.permute.xlu0 %2566 }
 0x578   :  { %v2213_v46 = vmul.f32 %v5933_v25, %v2208_v48  ;;  %v2222_v14 = vmul.f32 %v5945_v36, %v2208_v48  ;;  %v2206_v63 = vsel %vm246_vm2, %v2197_v59, %v2199_v24  ;;  %v2568_v38 = vsel %vm706_vm3, %v2565_v2, %v2567_v5 }
 0x579   :  { %v5965_v47 = vadd.f32 %v2181_v21, %v5835_v33  ;;  %v2186_v40 = vadd.f32 %v2182_v50, %v5837_v15  ;;  %v5969_v16 = vadd.f32 %v2190_v52, %v5839_v17  ;;  %v2195_v10 = vadd.f32 %v2191_v37, %v5841_v28  ;;  %v6980_v17 = vld [vmem:[#allocation38_spill] sm:$0xff]  ;;  %v6981_v28 = vld [vmem:[#allocation39_spill] sm:$0xff] }
 0x57a   :  { %v5975_v13 = vadd.f32 %v2213_v46, %v5843_v31  ;;  %v5978_v59 = vadd.f32 %v2222_v14, %v5845_v57  ;;  %v2209_v2 = vmul.f32 %v2206_v63, %v6973_v6  ;;  %v2571_v33 = vsel %vm706_vm3, %v2567_v5, %v5884_v51  ;;  %v2541_v15 = vpop.permute.xlu1 %2540 }
 0x57b   :  { %v2574_v56 = vmul.f32 %v2568_v38, %v6980_v17  ;;  %v2575_v4 = vmul.f32 %v2571_v33, %v6981_v28  ;;  %v2542_v31 = vsel %vm706_vm3, %v5897_v32, %v2541_v15  ;;  %v2545_v57 = vsel %vm706_vm3, %v2541_v15, %v5878_v62  ;;  %v5994_v6 = vpop.permute.xlu0 %2596 }
 0x57c   :  { %v2214_v51 = vmul.f32 %v5933_v25, %v2209_v2  ;;  %v2223_v48 = vmul.f32 %v5945_v36, %v2209_v2  ;;  %v2548_v21 = vmul.f32 %v2542_v31, %v6980_v17  ;;  %v2549_v50 = vmul.f32 %v2545_v57, %v6981_v28 }
 0x57d   :  { %v2579_v32 = vmul.f32 %v5908_v54, %v2574_v56  ;;  %v2580_v52 = vmul.f32 %v5908_v54, %v2575_v4  ;;  %v2588_v63 = vmul.f32 %v5910_v0, %v2574_v56  ;;  %v2589_v54 = vmul.f32 %v5910_v0, %v2575_v4 }
 0x57e   :  { %v6009_v62 = vadd.f32 %v2214_v51, %v5871_v61  ;;  %v6012_v37 = vadd.f32 %v2223_v48, %v5874_v55  ;;  %v2553_v5 = vmul.f32 %v5904_v26, %v2548_v21  ;;  %v2554_v46 = vmul.f32 %v5904_v26, %v2549_v50  ;;  %v6016_v14 = vpop.permute.xlu1 %2594 }
 0x57f   :  { %v2558_v61 = vmul.f32 %v5906_v45, %v2548_v21  ;;  %v2559_v38 = vmul.f32 %v5906_v45, %v2549_v50  ;;  %v2201_v55 = vpop.permute.xlu0 %2200  ;;  %v2358_v56 = vstv %s5950_s11  ;;  %v2385_v28 = vstv %s5956_s12 }
 0x580   :  { %v6026_v2 = vadd.f32 %v2579_v32, %v2553_v5  ;;  %v6028_v26 = vadd.f32 %v2580_v52, %v2554_v46  ;;  %v2204_v33 = vsel %vm246_vm2, %v2201_v55, %v2203_v43  ;;  %v2205_v45 = vsel %vm246_vm2, %v2199_v24, %v2201_v55 }
 0x581   :  { %v6034_v15 = vadd.f32 %v2588_v63, %v2558_v61  ;;  %v6036_v0 = vadd.f32 %v2589_v54, %v2559_v38  ;;  %v2211_v17 = vmul.f32 %v2204_v33, %v6979_v58  ;;  %v2210_v4 = vmul.f32 %v2205_v45, %v6978_v23 }
 0x582   :  { %6982 = vst [vmem:[#allocation83_spill] sm:$0xff] %v6026_v2  ;;  %6983 = vst [vmem:[#allocation14_spill] sm:$0xff] %v6028_v26  ;;  %v6046_v43 = vpop.permute.xlu1 %2598  ;;  %v2412_v48 = vstv %s5972_s13  ;;  %v2439_v21 = vstv %s5984_s14  ;;  %v6063_v23 = vmul.f32 %v2358_v56, %v5556_v44  ;;  %v6066_v50 = vmul.f32 %v2385_v28, %v5556_v44 }
 0x583   :  { %6984 = vst [vmem:[#allocation73_spill] sm:$0xff] %v6034_v15  ;;  %6985 = vst [vmem:[#allocation74_spill] sm:$0xff] %v6036_v0  ;;  %v2216_v31 = vmul.f32 %v5933_v25, %v2211_v17  ;;  %v2225_v57 = vmul.f32 %v5945_v36, %v2211_v17  ;;  %v6052_v51 = vpop.permute.xlu0 %2232  ;;  %v2215_v24 = vmul.f32 %v5933_v25, %v2210_v4  ;;  %v6176_v15 = vstv %s6072_s29 }
 0x584   :  { %v2224_v58 = vmul.f32 %v5945_v36, %v2210_v4  ;;  %v6085_v44 = vmul.f32 %v2412_v48, %v5574_v60  ;;  %v2391_v63 = vrot.slane %v6066_v50, %v6952_v41  ;;  %v2376_v54 = vrot.slane %v6063_v23, %v6954_v20  ;;  %6996 = vst [vmem:[#allocation63_spill] sm:$0xff] %v6176_v15 }
 0x585   :  { %v6068_v32 = vadd.f32 %v2216_v31, %v2186_v40  ;;  %v6070_v52 = vadd.f32 %v2225_v57, %v2195_v10  ;;  %v6075_v25 = vadd.f32 %v2215_v24, %v5965_v47  ;;  %v6088_v40 = vmul.f32 %v2439_v21, %v5574_v60 }
 0x586   :  { %v6078_v36 = vadd.f32 %v2224_v58, %v5969_v16  ;;  %v2231_v5 = vpop.permute.xlu1 %2230  ;;  %v2368_v47 = vrot.slane %v6063_v23, %v6950_v34  ;;  %v2395_v16 = vrot.slane %v6066_v50, %v6950_v34  ;;  %v2364_v10 = vrot.slane %v6063_v23, %v6952_v41 }
 0x587   :  { %6986 = vst [vmem:[#allocation75_spill] sm:$0xff] %v6068_v32  ;;  %6987 = vst [vmem:[#allocation76_spill] sm:$0xff] %v6070_v52  ;;  %v6082_v46 = vpop.permute.xlu0 %2466  ;;  %v2372_v60 = vrot.slane %v6063_v23, %v6959_v30  ;;  %v2399_v61 = vrot.slane %v6066_v50, %v6959_v30  ;;  %v2403_v38 = vrot.slane %v6066_v50, %v6954_v20  ;;  %v6145_v48 = vstv %s6006_s24 }
 0x588   :  { %6988 = vst [vmem:[#allocation77_spill] sm:$0xff] %v6075_v25  ;;  %6989 = vst [vmem:[#allocation36_spill] sm:$0xff] %v6078_v36  ;;  %v2418_v45 = vrot.slane %v6085_v44, %v6952_v41  ;;  %v2422_v17 = vrot.slane %v6085_v44, %v6950_v34  ;;  %v2445_v56 = vrot.slane %v6088_v40, %v6952_v41  ;;  %v6135_v41 = vstv %s5996_s15  ;;  %v6995_v25 = vld [vmem:[#allocation40_spill] sm:$0xff] }
 0x589   :  { %6990 = vst [vmem:[#allocation64_spill] sm:$0xff] %v6082_v46  ;;  %v2449_v28 = vrot.slane %v6088_v40, %v6950_v34  ;;  %v2426_v4 = vrot.slane %v6085_v44, %v6959_v30  ;;  %v2430_v31 = vrot.slane %v6085_v44, %v6954_v20  ;;  %v2453_v57 = vrot.slane %v6088_v40, %v6959_v30 }
 0x58a   :  { %v6112_v55 = vpop.permute.xlu1 %2236  ;;  %v2457_v24 = vrot.slane %v6088_v40, %v6954_v20  ;;  %v6138_v34 = vstv %s6002_s16  ;;  %v2604_v58 = vsel %vm788_vm4, %v6016_v14, %v5994_v6  ;;  %v6148_v21 = vstv %s6018_s25 }
 0x58b   :  { %v6116_v33 = vpop.permute.xlu0 %2470  ;;  %v6151_v30 = vstv %s6024_s30  ;;  %v6154_v23 = vstv %s6032_s4  ;;  %v6157_v50 = vstv %s6041_s1  ;;  %v2603_v44 = vsel %vm788_vm4, %v5994_v6, %v6046_v43 }
 0x58c   :  { %6991 = vst [vmem:[#allocation60_spill] sm:$0xff] %v6157_v50  ;;  %v6166_v52 = vstv %s6048_s2  ;;  %v6169_v36 = vstv %s6054_s5  ;;  %v6172_v32 = vstv %s6060_s28  ;;  %v2606_v0 = vmul.f32 %v2604_v58, %v6995_v25 }
 0x58d   :  { %6992 = vst [vmem:[#allocation56_spill] sm:$0xff] %v6166_v52  ;;  %6993 = vst [vmem:[#allocation78_spill] sm:$0xff] %v6169_v36  ;;  %v6179_v26 = vstv %s6080_s6  ;;  %v6182_v2 = vstv %s6090_s17  ;;  %v2382_v6 = vadd.f32 %v2368_v47, %v5791_v29  ;;  %v2409_v50 = vadd.f32 %v2395_v16, %v5793_v18  ;;  %v6999_v52 = vld [vmem:[#allocation41_spill] sm:$0xff] }
 0x58e   :  { %v2469_v20 = vpop.permute.xlu1 %2468  ;;  %6994 = vst [vmem:[#allocation79_spill] sm:$0xff] %v6172_v32  ;;  %6997 = vst [vmem:[#allocation57_spill] sm:$0xff] %v6179_v26  ;;  %v2381_v39 = vadd.f32 %v2364_v10, %v5822_v19  ;;  %v2240_v36 = vsel %vm336_vm5, %v2231_v5, %v6052_v51  ;;  %v2607_v32 = vmul.f32 %v2603_v44, %v6999_v52  ;;  %v6192_v58 = vstv %s6092_s18 }
 0x58f   :  { %v6163_v40 = vpop.permute.xlu0 %2628  ;;  %6998 = vst [vmem:[#allocation58_spill] sm:$0xff] %v6182_v2  ;;  %7000 = vst [vmem:[#allocation80_spill] sm:$0xff] %v6192_v58  ;;  %v6195_v15 = vstv %s6102_s19  ;;  %v6198_v26 = vstv %s6114_s20  ;;  %v2408_v2 = vadd.f32 %v2391_v63, %v5824_v49  ;;  %v2383_v29 = vadd.f32 %v2372_v60, %v5889_v3 }
 0x590   :  { %7001 = vst [vmem:[#allocation81_spill] sm:$0xff] %v6195_v15  ;;  %7002 = vst [vmem:[#allocation46_spill] sm:$0xff] %v6198_v26  ;;  %v2384_v18 = vadd.f32 %v2376_v54, %v5891_v27  ;;  %v2241_v19 = vsel %vm336_vm5, %v6112_v55, %v2231_v5  ;;  %v2410_v16 = vadd.f32 %v2399_v61, %v5893_v7  ;;  %v7003_v15 = vld [vmem:[#allocation45_spill] sm:$0xff]  ;;  %v7004_v54 = vld [vmem:[#allocation44_spill] sm:$0xff] }
 0x591   :  { %v2411_v10 = vadd.f32 %v2403_v38, %v5895_v35  ;;  %v2611_v44 = vmul.f32 %v6135_v41, %v2606_v0  ;;  %v2243_v26 = vmul.f32 %v2240_v36, %v7003_v15  ;;  %v2620_v49 = vmul.f32 %v6138_v34, %v2606_v0 }
 0x592   :  { %v2601_v53 = vpop.permute.xlu1 %2600  ;;  %v2435_v63 = vadd.f32 %v2418_v45, %v2381_v39  ;;  %v2436_v3 = vadd.f32 %v2422_v17, %v2382_v6  ;;  %v6213_v60 = vadd.f32 %v2449_v28, %v2409_v50  ;;  %v2612_v27 = vmul.f32 %v6135_v41, %v2607_v32 }
 0x593   :  { %v6206_v47 = vpop.permute.xlu0 %2632  ;;  %v2242_v5 = vmul.f32 %v2241_v19, %v7004_v54  ;;  %v2475_v7 = vsel %vm616_vm6, %v2469_v20, %v6116_v33  ;;  %v2476_v35 = vsel %vm616_vm6, %v6082_v46, %v2469_v20  ;;  %v2621_v36 = vmul.f32 %v6138_v34, %v2607_v32  ;;  %v7005_v19 = vld [vmem:[#allocation48_spill] sm:$0xff]  ;;  %v7006_v20 = vld [vmem:[#allocation53_spill] sm:$0xff] }
 0x594   :  { %v2462_v0 = vadd.f32 %v2445_v56, %v2408_v2  ;;  %v6224_v38 = vadd.f32 %v2426_v4, %v2383_v29  ;;  %v6226_v45 = vadd.f32 %v2430_v31, %v2384_v18  ;;  %v2615_v17 = vadd.f32 %v2611_v44, %v5935_v11 }
 0x595   :  { %v2248_v28 = vmul.f32 %v6145_v48, %v2243_v26  ;;  %v6230_v50 = vadd.f32 %v2453_v57, %v2410_v16  ;;  %v6232_v6 = vadd.f32 %v2457_v24, %v2411_v10  ;;  %v2478_v58 = vmul.f32 %v2476_v35, %v7005_v19 }
 0x596   :  { %v2631_v61 = vpop.permute.xlu1 %2630  ;;  %v2479_v46 = vmul.f32 %v2475_v7, %v7006_v20  ;;  %v2602_v2 = vsel %vm788_vm4, %v6046_v43, %v2601_v53  ;;  %v2605_v32 = vsel %vm788_vm4, %v2601_v53, %v6016_v14  ;;  %v2624_v11 = vadd.f32 %v2620_v49, %v5939_v1 }
 0x597   :  { %v2265_v39 = vpop.permute.xlu0 %2264  ;;  %v2616_v56 = vadd.f32 %v2612_v27, %v5937_v42  ;;  %v2257_v4 = vmul.f32 %v6148_v21, %v2243_v26  ;;  %v2247_v31 = vmul.f32 %v6145_v48, %v2242_v5  ;;  %v2625_v24 = vadd.f32 %v2621_v36, %v5941_v12 }
 0x598   :  { %v2256_v29 = vmul.f32 %v6148_v21, %v2242_v5  ;;  %v2637_v43 = vsel %vm788_vm4, %v2631_v61, %v6206_v47  ;;  %v2638_v53 = vsel %vm788_vm4, %v6163_v40, %v2631_v61  ;;  %v2608_v42 = vmul.f32 %v2602_v2, %v6906_v9  ;;  %v7008_v61 = vld [vmem:[#allocation55_spill] sm:$0xff] }
 0x599   :  { %v2609_v14 = vmul.f32 %v2605_v32, %v6907_v8  ;;  %v6265_v18 = vadd.f32 %v2248_v28, %v6009_v62  ;;  %v2483_v16 = vmul.f32 %v6151_v30, %v2478_v58  ;;  %v2484_v10 = vmul.f32 %v6151_v30, %v2479_v46 }
 0x59a   :  { %v2235_v57 = vpop.permute.xlu1 %2234  ;;  %v2492_v44 = vmul.f32 %v6154_v23, %v2478_v58  ;;  %v6271_v49 = vadd.f32 %v2257_v4, %v6012_v37  ;;  %v2251_v27 = vadd.f32 %v2247_v31, %v5975_v13  ;;  %v2641_v5 = vmul.f32 %v2637_v43, %v6999_v52  ;;  %v7009_v31 = vld [vmem:[#allocation60_spill] sm:$0xff] }
 0x59b   :  { %v6254_v1 = vpop.permute.xlu0 %2270  ;;  %v2238_v12 = vsel %vm336_vm5, %v2235_v57, %v6112_v55  ;;  %v2239_v26 = vsel %vm336_vm5, %v6052_v51, %v2235_v57  ;;  %v2640_v55 = vmul.f32 %v2638_v53, %v6995_v25  ;;  %v2260_v62 = vadd.f32 %v2256_v29, %v5978_v59  ;;  %v7007_v51 = vld [vmem:[#allocation54_spill] sm:$0xff] }
 0x59c   :  { %v2244_v35 = vmul.f32 %v2239_v26, %v7007_v51  ;;  %v2245_v36 = vmul.f32 %v2238_v12, %v7008_v61  ;;  %v2275_v58 = vsel %vm336_vm5, %v6254_v1, %v2265_v39  ;;  %v2493_v13 = vmul.f32 %v6154_v23, %v2479_v46  ;;  %v7010_v12 = vld [vmem:[#allocation56_spill] sm:$0xff] }
 0x59d   :  { %v2613_v25 = vmul.f32 %v6135_v41, %v2608_v42  ;;  %v2614_v52 = vmul.f32 %v6135_v41, %v2609_v14  ;;  %v2622_v28 = vmul.f32 %v6138_v34, %v2608_v42  ;;  %v2487_v2 = vadd.f32 %v2483_v16, %v2435_v63 }
 0x59e   :  { %v6276_v7 = vpop.permute.xlu1 %2266  ;;  %v2488_v59 = vadd.f32 %v2484_v10, %v2436_v3  ;;  %v2496_v32 = vadd.f32 %v2492_v44, %v2462_v0  ;;  %v2623_v4 = vmul.f32 %v6138_v34, %v2609_v14  ;;  %v2645_v57 = vmul.f32 %v7009_v31, %v2640_v55  ;;  %v7011_v14 = vld [vmem:[#allocation83_spill] sm:$0xff]  ;;  %v7014_v44 = vld [vmem:[#allocation74_spill] sm:$0xff] }
 0x59f   :  { %v6284_v37 = vpop.permute.xlu0 %2500  ;;  %v2646_v29 = vmul.f32 %v7009_v31, %v2641_v5  ;;  %v2276_v43 = vmul.f32 %v2275_v58, %v7004_v54  ;;  %v2274_v46 = vsel %vm336_vm5, %v2265_v39, %v6276_v7  ;;  %v2654_v41 = vmul.f32 %v7010_v12, %v2640_v55  ;;  %v7012_v54 = vld [vmem:[#allocation14_spill] sm:$0xff]  ;;  %v7013_v39 = vld [vmem:[#allocation73_spill] sm:$0xff] }
 0x5a0   :  { %v2655_v42 = vmul.f32 %v7010_v12, %v2641_v5  ;;  %v2249_v63 = vmul.f32 %v6145_v48, %v2244_v35  ;;  %v2250_v3 = vmul.f32 %v6145_v48, %v2245_v36  ;;  %v2497_v0 = vadd.f32 %v2493_v13, %v6213_v60  ;;  %v7015_v13 = vld [vmem:[#allocation78_spill] sm:$0xff] }
 0x5a1   :  { %v6305_v26 = vadd.f32 %v2613_v25, %v7011_v14  ;;  %v6308_v16 = vadd.f32 %v2614_v52, %v7012_v54  ;;  %v6311_v10 = vadd.f32 %v2622_v28, %v7013_v39  ;;  %v6314_v55 = vadd.f32 %v2623_v4, %v7014_v44  ;;  %v7016_v52 = vld [vmem:[#allocation79_spill] sm:$0xff]  ;;  %v7017_v4 = vld [vmem:[#allocation77_spill] sm:$0xff] }
 0x5a2   :  { %v2473_v53 = vpop.permute.xlu1 %2472  ;;  %v2258_v5 = vmul.f32 %v6148_v21, %v2244_v35  ;;  %v2259_v48 = vmul.f32 %v6148_v21, %v2245_v36  ;;  %v2277_v58 = vmul.f32 %v2274_v46, %v7003_v15  ;;  %v6319_v61 = vadd.f32 %v2645_v57, %v2615_v17  ;;  %v7018_v35 = vld [vmem:[#allocation75_spill] sm:$0xff]  ;;  %v7021_v57 = vld [vmem:[#allocation36_spill] sm:$0xff] }
 0x5a3   :  { %v6301_v34 = vpop.permute.xlu0 %2504  ;;  %v6321_v60 = vadd.f32 %v2646_v29, %v2616_v56  ;;  %v2281_v25 = vmul.f32 %v7015_v13, %v2276_v43  ;;  %v2290_v14 = vmul.f32 %v7016_v52, %v2276_v43  ;;  %v6325_v28 = vadd.f32 %v2654_v41, %v2624_v11  ;;  %v7020_v56 = vld [vmem:[#allocation64_spill] sm:$0xff] }
 0x5a4   :  { %v6327_v39 = vadd.f32 %v2655_v42, %v2625_v24  ;;  %v6330_v44 = vadd.f32 %v2249_v63, %v7017_v4  ;;  %v6333_v21 = vadd.f32 %v2250_v3, %v7018_v35  ;;  %v2474_v17 = vsel %vm616_vm6, %v6116_v33, %v2473_v53  ;;  %v7023_v43 = vld [vmem:[#allocation76_spill] sm:$0xff]  ;;  %v7025_v35 = vld [vmem:[#allocation59_spill] sm:$0xff] }
 0x5a5   :  { %v2477_v36 = vsel %vm616_vm6, %v2473_v53, %v7020_v56  ;;  %v6350_v29 = vadd.f32 %v2258_v5, %v7021_v57  ;;  %v6353_v46 = vadd.f32 %v2259_v48, %v7023_v43  ;;  %v2282_v33 = vmul.f32 %v7015_v13, %v2277_v58 }
 0x5a6   :  { %v2503_v54 = vpop.permute.xlu1 %2502  ;;  %7019 = vst [vmem:[#allocation43_spill] sm:$0xff] %v6333_v21  ;;  %v2291_v41 = vmul.f32 %v7016_v52, %v2277_v58  ;;  %v2285_v42 = vadd.f32 %v2281_v25, %v2251_v27  ;;  %v2294_v53 = vadd.f32 %v2290_v14, %v2260_v62  ;;  %v2480_v56 = vmul.f32 %v2474_v17, %v7025_v35  ;;  %v7027_v27 = vld [vmem:[#allocation63_spill] sm:$0xff]  ;;  %v7028_v25 = vld [vmem:[#allocation57_spill] sm:$0xff] }
 0x5a7   :  { %v6335_v15 = vpop.permute.xlu0 %2662  ;;  %v2509_v11 = vsel %vm616_vm6, %v2503_v54, %v6301_v34  ;;  %v2510_v24 = vsel %vm616_vm6, %v6284_v37, %v2503_v54  ;;  %7022 = vst [vmem:[#allocation32_spill] sm:$0xff] %v6350_v29  ;;  %7024 = vst [vmem:[#allocation47_spill] sm:$0xff] %v6353_v46  ;;  %v7026_v54 = vld [vmem:[#allocation62_spill] sm:$0xff]  ;;  %v2286_v17 = vadd.f32 %v2282_v33, %v6265_v18 }
 0x5a8   :  { %v2512_v63 = vmul.f32 %v2510_v24, %v7005_v19  ;;  %v2513_v3 = vmul.f32 %v2509_v11, %v7006_v20  ;;  %v2481_v21 = vmul.f32 %v2477_v36, %v7026_v54  ;;  %v2295_v36 = vadd.f32 %v2291_v41, %v6271_v49 }
 0x5a9   :  { %v2485_v46 = vmul.f32 %v6151_v30, %v2480_v56 }
 0x5aa   :  { %v2635_v4 = vpop.permute.xlu1 %2634  ;;  %v2517_v62 = vmul.f32 %v7027_v27, %v2512_v63  ;;  %v2518_v19 = vmul.f32 %v7027_v27, %v2513_v3  ;;  %v2526_v20 = vmul.f32 %v7028_v25, %v2512_v63  ;;  %v2527_v14 = vmul.f32 %v7028_v25, %v2513_v3 }
 0x5ab   :  { %v2636_v5 = vsel %vm788_vm4, %v6206_v47, %v2635_v4  ;;  %v2639_v48 = vsel %vm788_vm4, %v2635_v4, %v6163_v40  ;;  %v2667_v58 = vpop.permute.xlu0 %2666  ;;  %v2486_v29 = vmul.f32 %v6151_v30, %v2481_v21  ;;  %v2494_v63 = vmul.f32 %v6154_v23, %v2480_v56  ;;  %v7030_v56 = vld [vmem:[#allocation68_spill] sm:$0xff] }
 0x5ac   :  { %v2642_v11 = vmul.f32 %v2636_v5, %v6906_v9  ;;  %v2643_v47 = vmul.f32 %v2639_v48, %v6907_v8  ;;  %v2521_v24 = vadd.f32 %v2517_v62, %v2487_v2  ;;  %v2522_v57 = vadd.f32 %v2518_v19, %v2488_v59 }
 0x5ad   :  { %v2530_v40 = vadd.f32 %v2526_v20, %v2496_v32  ;;  %v2531_v43 = vadd.f32 %v2527_v14, %v2497_v0  ;;  %v2495_v3 = vmul.f32 %v6154_v23, %v2481_v21  ;;  %v2489_v62 = vadd.f32 %v2485_v46, %v6224_v38 }
 0x5ae   :  { %v2665_v4 = vpop.permute.xlu1 %2664  ;;  %v6379_v33 = vadd.f32 %v2521_v24, %v2285_v42  ;;  %v6381_v49 = vadd.f32 %v2522_v57, %v2286_v17  ;;  %v2647_v2 = vmul.f32 %v7009_v31, %v2642_v11  ;;  %v2648_v59 = vmul.f32 %v7009_v31, %v2643_v47  ;;  %v7029_v42 = vld [vmem:[#allocation65_spill] sm:$0xff]  ;;  %v7031_v17 = vld [vmem:[#allocation58_spill] sm:$0xff] }
 0x5af   :  { %v2507_v18 = vpop.permute.xlu0 %2506  ;;  %v6383_v9 = vadd.f32 %v2530_v40, %v2294_v53  ;;  %v6385_v8 = vadd.f32 %v2531_v43, %v2295_v36  ;;  %v2656_v32 = vmul.f32 %v7010_v12, %v2642_v11  ;;  %v2657_v30 = vmul.f32 %v7010_v12, %v2643_v47  ;;  %v7032_v47 = vld [vmem:[#allocation80_spill] sm:$0xff] }
 0x5b0   :  { %v2671_v23 = vsel %vm878_vm7, %v2665_v4, %v2667_v58  ;;  %v2672_v0 = vsel %vm878_vm7, %v6335_v15, %v2665_v4  ;;  %v2508_v21 = vsel %vm616_vm6, %v6301_v34, %v2507_v18  ;;  %v2511_v41 = vsel %vm616_vm6, %v2507_v18, %v6284_v37 }
 0x5b1   :  { %v2674_v53 = vmul.f32 %v2672_v0, %v7029_v42  ;;  %v2675_v12 = vmul.f32 %v2671_v23, %v7030_v56  ;;  %v2514_v5 = vmul.f32 %v2508_v21, %v7025_v35  ;;  %v2515_v48 = vmul.f32 %v2511_v41, %v7026_v54  ;;  %v7037_v21 = vld [vmem:[#allocation32_spill] sm:$0xff] }
 0x5b2   :  { %v2269_v31 = vpop.permute.xlu1 %2268  ;;  %v2490_v19 = vadd.f32 %v2486_v29, %v6226_v45  ;;  %v2498_v20 = vadd.f32 %v2494_v63, %v6230_v50  ;;  %v2499_v34 = vadd.f32 %v2495_v3, %v6232_v6  ;;  %v2651_v14 = vadd.f32 %v2647_v2, %v6305_v26  ;;  %v7035_v3 = vld [vmem:[#allocation70_spill] sm:$0xff] }
 0x5b3   :  { %v2652_v37 = vadd.f32 %v2648_v59, %v6308_v16  ;;  %v2679_v36 = vmul.f32 %v7031_v17, %v2674_v53  ;;  %v2680_v11 = vmul.f32 %v7031_v17, %v2675_v12  ;;  %v2688_v35 = vmul.f32 %v7032_v47, %v2674_v53  ;;  %v2697_v4 = vpop.permute.xlu0 %2696 }
 0x5b4   :  { %v2689_v54 = vmul.f32 %v7032_v47, %v2675_v12  ;;  %v2272_v38 = vsel %vm336_vm5, %v2269_v31, %v6254_v1  ;;  %v2273_v45 = vsel %vm336_vm5, %v6276_v7, %v2269_v31  ;;  %v2660_v6 = vadd.f32 %v2656_v32, %v6311_v10  ;;  %v7033_v7 = vld [vmem:[#allocation55_spill] sm:$0xff] }
 0x5b5   :  { %v2661_v26 = vadd.f32 %v2657_v30, %v6314_v55  ;;  %v2519_v16 = vmul.f32 %v7027_v27, %v2514_v5  ;;  %v2520_v29 = vmul.f32 %v7027_v27, %v2515_v48  ;;  %v2683_v46 = vadd.f32 %v2679_v36, %v6319_v61  ;;  %v7034_v27 = vld [vmem:[#allocation69_spill] sm:$0xff]  ;;  %v7038_v31 = vld [vmem:[#allocation47_spill] sm:$0xff] }
 0x5b6   :  { %v2669_v50 = vpop.permute.xlu1 %2668  ;;  %v2684_v24 = vadd.f32 %v2680_v11, %v6321_v60  ;;  %v2528_v57 = vmul.f32 %v7028_v25, %v2514_v5  ;;  %v2529_v1 = vmul.f32 %v7028_v25, %v2515_v48  ;;  %v2278_v40 = vmul.f32 %v2273_v45, %v7007_v51 }
 0x5b7   :  { %v2279_v43 = vmul.f32 %v2272_v38, %v7033_v7  ;;  %v2670_v10 = vsel %vm878_vm7, %v2667_v58, %v2669_v50  ;;  %v2673_v55 = vsel %vm878_vm7, %v2669_v50, %v6335_v15  ;;  %v2692_v61 = vadd.f32 %v2688_v35, %v6325_v28 }
 0x5b8   :  { %v2693_v60 = vadd.f32 %v2689_v54, %v6327_v39  ;;  %v2676_v63 = vmul.f32 %v2670_v10, %v7034_v27  ;;  %v2677_v25 = vmul.f32 %v2673_v55, %v7035_v3  ;;  %v2283_v51 = vmul.f32 %v7015_v13, %v2278_v40  ;;  %v7036_v39 = vld [vmem:[#allocation43_spill] sm:$0xff] }
 0x5b9   :  { %v2284_v2 = vmul.f32 %v7015_v13, %v2279_v43  ;;  %v2292_v59 = vmul.f32 %v7016_v52, %v2278_v40  ;;  %v2293_v58 = vmul.f32 %v7016_v52, %v2279_v43  ;;  %v2523_v32 = vadd.f32 %v2519_v16, %v2489_v62  ;;  %v7040_v43 = vld [vmem:[#allocation46_spill] sm:$0xff] }
 0x5ba   :  { %v2699_v18 = vpop.permute.xlu1 %2698  ;;  %v2524_v30 = vadd.f32 %v2520_v29, %v2490_v19  ;;  %v2532_v15 = vadd.f32 %v2528_v57, %v2498_v20  ;;  %v2533_v23 = vadd.f32 %v2529_v1, %v2499_v34  ;;  %v2287_v28 = vadd.f32 %v2283_v51, %v6330_v44  ;;  %v2701_v44 = vpop.permute.xlu0 %2700  ;;  %v7039_v1 = vld [vmem:[#allocation81_spill] sm:$0xff] }
 0x5bb   :  { %v2288_v0 = vadd.f32 %v2284_v2, %v7036_v39  ;;  %v2296_v41 = vadd.f32 %v2292_v59, %v7037_v21  ;;  %v2297_v53 = vadd.f32 %v2293_v58, %v7038_v31  ;;  %v2681_v12 = vmul.f32 %v7031_v17, %v2676_v63 }
 0x5bc   :  { %v2682_v13 = vmul.f32 %v7031_v17, %v2677_v25  ;;  %v2690_v5 = vmul.f32 %v7032_v47, %v2676_v63  ;;  %v2691_v52 = vmul.f32 %v7032_v47, %v2677_v25  ;;  %v2732_v62 = vadd.f32 %v2523_v32, %v2287_v28 }
 0x5bd   :  { %v2733_v19 = vadd.f32 %v2524_v30, %v2288_v0  ;;  %v2740_v20 = vadd.f32 %v2532_v15, %v2296_v41  ;;  %v2741_v34 = vadd.f32 %v2533_v23, %v2297_v53  ;;  %v2705_v36 = vsel %vm878_vm7, %v2699_v18, %v2701_v44 }
 0x5be   :  { %v2703_v48 = vpop.permute.xlu1 %2702  ;;  %v2706_v11 = vsel %vm878_vm7, %v2697_v4, %v2699_v18  ;;  %v2709_v54 = vmul.f32 %v2705_v36, %v7030_v56  ;;  %v2685_v50 = vadd.f32 %v2681_v12, %v2651_v14  ;;  %v2686_v16 = vadd.f32 %v2682_v13, %v2652_v37 }
 0x5bf   :  { %v2704_v35 = vsel %vm878_vm7, %v2701_v44, %v2703_v48  ;;  %v2707_v17 = vsel %vm878_vm7, %v2703_v48, %v2697_v4  ;;  %v2708_v47 = vmul.f32 %v2706_v11, %v7029_v42  ;;  %v2694_v29 = vadd.f32 %v2690_v5, %v2660_v6 }
 0x5c0   :  { %v2710_v38 = vmul.f32 %v2704_v35, %v7034_v27  ;;  %v2711_v45 = vmul.f32 %v2707_v17, %v7035_v3  ;;  %v2695_v57 = vadd.f32 %v2691_v52, %v2661_v26  ;;  %v2714_v7 = vmul.f32 %v7039_v1, %v2709_v54 }
 0x5c1   :  { %v2713_v40 = vmul.f32 %v7039_v1, %v2708_v47  ;;  %v2722_v10 = vmul.f32 %v7040_v43, %v2708_v47  ;;  %v2723_v22 = vmul.f32 %v7040_v43, %v2709_v54 }
 0x5c2   :  { %v2715_v42 = vmul.f32 %v7039_v1, %v2710_v38  ;;  %v2716_v56 = vmul.f32 %v7039_v1, %v2711_v45  ;;  %v2724_v4 = vmul.f32 %v7040_v43, %v2710_v38  ;;  %v2725_v55 = vmul.f32 %v7040_v43, %v2711_v45 }
 0x5c3   :  { %v2717_v14 = vadd.f32 %v2713_v40, %v2683_v46  ;;  %v2718_v37 = vadd.f32 %v2714_v7, %v2684_v24  ;;  %v2726_v6 = vadd.f32 %v2722_v10, %v2692_v61  ;;  %v2727_v26 = vadd.f32 %v2723_v22, %v2693_v60 }
 0x5c4   :  { %v2719_v27 = vadd.f32 %v2715_v42, %v2685_v50  ;;  %v2720_v63 = vadd.f32 %v2716_v56, %v2686_v16  ;;  %v2728_v3 = vadd.f32 %v2724_v4, %v2694_v29  ;;  %v2729_v25 = vadd.f32 %v2725_v55, %v2695_v57 }
 0x5c5   :  { %v2734_v18 = vadd.f32 %v6379_v33, %v2717_v14  ;;  %v2735_v51 = vadd.f32 %v6381_v49, %v2718_v37  ;;  %v2742_v2 = vadd.f32 %v6383_v9, %v2726_v6  ;;  %v2743_v59 = vadd.f32 %v6385_v8, %v2727_v26 }
 0x5c6   :  { %v2736_v58 = vadd.f32 %v2732_v62, %v2719_v27  ;;  %v2744_v32 = vadd.f32 %v2740_v20, %v2728_v3  ;;  %v2745_v30 = vadd.f32 %v2741_v34, %v2729_v25  ;;  %v2737_v15 = vadd.f32 %v2733_v19, %v2720_v63 }
 0x5c7   :  { %v2825_v46 = vsel %vm976_vm8, %v2742_v2, 0.0  ;;  %v2826_v24 = vsel %vm976_vm8, %v2743_v59, 0.0  ;;  %v2746_v61 = vsel %vm976_vm8, %v2734_v18, 0.0  ;;  %v2747_v60 = vsel %vm976_vm8, %v2735_v51, 0.0 }
 0x5c8   :  { %v2827_v23 = vadd.f32 %v2826_v24, %v2825_v46  ;;  %v2828_v33 = vsel %vm976_vm8, %v2744_v32, 0.0  ;;  %v2748_v49 = vadd.f32 %v2747_v60, %v2746_v61  ;;  %v2749_v9 = vsel %vm976_vm8, %v2736_v58, 0.0 }
 0x5c9   :  { %v2830_v39 = vsel %vm976_vm8, %v2745_v30, 0.0  ;;  %v2751_v0 = vsel %vm976_vm8, %v2737_v15, 0.0  ;;  %v2776_v3 = vstv %s3038_s21 }
 0x5ca   :  { %v2829_v28 = vadd.f32 %v2828_v33, %v2827_v23  ;;  %v2750_v8 = vadd.f32 %v2749_v9, %v2748_v49  ;;  %v2861_v33 = vstv %s3041_s0 }
 0x5cc   :  { %v2831_v21 = vadd.f32 %v2830_v39, %v2829_v28  ;;  %v2752_v41 = vadd.f32 %v2751_v0, %v2750_v8  ;;  %v7041_v39 = vld [vmem:[#allocation66_spill] sm:$0xff] }
 0x5ce   :  { %2832 = vadd.xlane.f32.xlu1 %v2831_v21  ;;  %2753 = vadd.xlane.f32.xlu0 %v2752_v41  ;;  %v7042_v21 = vld [vmem:[#allocation61_spill] sm:$0xff] }
 0x657   :  { %v2833_v31 = vpop.xlane.xlu1 %2832  ;;  %v2754_v53 = vpop.xlane.xlu0 %2753 }
 0x658   :  { %v2834_v12 = vmul.f32 0.001953125, %v2833_v31  ;;  %v2755_v13 = vmul.f32 0.001953125, %v2754_v53  ;;  %v7043_v31 = vld [vmem:[#allocation72_spill] sm:$0xff] }
 0x65a   :  { %v2835_v5 = vsub.f32 %v2742_v2, %v2834_v12  ;;  %v2836_v52 = vsub.f32 %v2743_v59, %v2834_v12  ;;  %v2837_v48 = vsub.f32 %v2744_v32, %v2834_v12  ;;  %v2756_v62 = vsub.f32 %v2734_v18, %v2755_v13 }
 0x65b   :  { %v2757_v19 = vsub.f32 %v2735_v51, %v2755_v13  ;;  %v2758_v20 = vsub.f32 %v2736_v58, %v2755_v13  ;;  %v2759_v34 = vsub.f32 %v2737_v15, %v2755_v13  ;;  %v2838_v47 = vsub.f32 %v2745_v30, %v2834_v12  ;;  %v7044_v12 = vld [vmem:[#allocation67_spill] sm:$0xff] }
 0x65c   :  { %v2839_v44 = vmul.f32 %v2835_v5, %v2835_v5  ;;  %v2840_v36 = vmul.f32 %v2836_v52, %v2836_v52  ;;  %v2760_v11 = vmul.f32 %v2756_v62, %v2756_v62  ;;  %v2841_v29 = vmul.f32 %v2837_v48, %v2837_v48 }
 0x65d   :  { %v2761_v35 = vmul.f32 %v2757_v19, %v2757_v19  ;;  %v2762_v17 = vmul.f32 %v2758_v20, %v2758_v20  ;;  %v2763_v45 = vmul.f32 %v2759_v34, %v2759_v34  ;;  %v2842_v10 = vmul.f32 %v2838_v47, %v2838_v47 }
 0x65e   :  { %v2843_v54 = vsel %vm976_vm8, %v2839_v44, 0.0  ;;  %v2844_v38 = vsel %vm976_vm8, %v2840_v36, 0.0  ;;  %v2764_v50 = vsel %vm976_vm8, %v2760_v11, 0.0  ;;  %v2846_v22 = vsel %vm976_vm8, %v2841_v29, 0.0 }
 0x65f   :  { %v2765_v16 = vsel %vm976_vm8, %v2761_v35, 0.0  ;;  %v2845_v1 = vadd.f32 %v2844_v38, %v2843_v54  ;;  %v2767_v40 = vsel %vm976_vm8, %v2762_v17, 0.0  ;;  %v2769_v43 = vsel %vm976_vm8, %v2763_v45, 0.0  ;;  %v7048_v38 = vld [vmem:[#allocation52_spill] sm:$0xff] }
 0x660   :  { %v2766_v57 = vadd.f32 %v2765_v16, %v2764_v50  ;;  %v2848_v4 = vsel %vm976_vm8, %v2842_v10, 0.0  ;;  %v2855_v51 = vstv %s3039_s22  ;;  %v2782_v2 = vstv %s3040_s23 }
 0x661   :  { %v2847_v56 = vadd.f32 %v2846_v22, %v2845_v1 }
 0x662   :  { %v2768_v7 = vadd.f32 %v2767_v40, %v2766_v57 }
 0x663   :  { %v2849_v55 = vadd.f32 %v2848_v4, %v2847_v56 }
 0x664   :  { %v2770_v42 = vadd.f32 %v2769_v43, %v2768_v7  ;;  %v7049_v7 = vld [vmem:[#allocation37_spill] sm:$0xff] }
 0x666   :  { %2771 = vadd.xlane.f32.xlu0 %v2770_v42 }
 0x66a   :  { %2850 = vadd.xlane.f32.xlu0 %v2849_v55 }
 0x6ef   :  { %v2772_v14 = vpop.xlane.xlu0 %2771 }
 0x6f0   :  { %v2773_v37 = vmul.f32 0.001953125, %v2772_v14 }
 0x6f2   :  { %v2774_v6 = vadd.f32 1e-05, %v2773_v37 }
 0x6f3   :  { %v2851_v26 = vpop.xlane.xlu0 %2850 }
 0x6f4   :  { %3067 = vrsqrt.f32 %v2774_v6  ;;  %v2852_v27 = vmul.f32 0.001953125, %v2851_v26 }
 0x6f6   :  { %v2853_v63 = vadd.f32 1e-05, %v2852_v27 }
 0x6f8   :  { %3069 = vrsqrt.f32 %v2853_v63 }
 0x701   :  { %v3068_v25 = vpop.eup %3067 }
 0x702   :  { %v2777_v18 = vmul.f32 %v3068_v25, %v2776_v3 }
 0x704   :  { %v2778_v59 = vmul.f32 %v2777_v18, %v2756_v62  ;;  %v2779_v58 = vmul.f32 %v2777_v18, %v2757_v19  ;;  %v2780_v32 = vmul.f32 %v2777_v18, %v2758_v20  ;;  %v2781_v30 = vmul.f32 %v2777_v18, %v2759_v34 }
 0x705   :  { %v3070_v15 = vpop.eup %3069 }
 0x706   :  { %v2856_v46 = vmul.f32 %v3070_v15, %v2855_v51  ;;  %v2783_v24 = vadd.f32 %v2782_v2, %v2778_v59  ;;  %v2784_v61 = vadd.f32 %v2782_v2, %v2779_v58  ;;  %v2785_v60 = vadd.f32 %v2782_v2, %v2780_v32 }
 0x707   :  { %v2786_v23 = vadd.f32 %v2782_v2, %v2781_v30 }
 0x708   :  { %v2857_v49 = vmul.f32 %v2856_v46, %v2835_v5  ;;  %v2858_v9 = vmul.f32 %v2856_v46, %v2836_v52  ;;  %v2859_v28 = vmul.f32 %v2856_v46, %v2837_v48  ;;  %v2860_v8 = vmul.f32 %v2856_v46, %v2838_v47  ;;  %v7045_v5 = vld [vmem:[#allocation51_spill] sm:$0xff]  ;;  %v7047_v47 = vld [vmem:[#allocation82_spill] sm:$0xff] }
 0x709   :  { %v2787_v0 = vadd.f32 %v2783_v24, %v7041_v39  ;;  %v2788_v41 = vadd.f32 %v2784_v61, %v7042_v21  ;;  %v2789_v53 = vadd.f32 %v2785_v60, %v7043_v31  ;;  %v2790_v13 = vadd.f32 %v2786_v23, %v7044_v12  ;;  %v7046_v48 = vld [vmem:[#allocation71_spill] sm:$0xff] }
 0x70a   :  { %v2862_v62 = vadd.f32 %v2861_v33, %v2857_v49  ;;  %v2863_v19 = vadd.f32 %v2861_v33, %v2858_v9  ;;  %v2864_v20 = vadd.f32 %v2861_v33, %v2859_v28  ;;  %v2865_v34 = vadd.f32 %v2861_v33, %v2860_v8 }
 0x70b   :  { %v2791_v44 = vmax.f32 %v2787_v0, 0.0  ;;  %v2792_v36 = vmax.f32 %v2788_v41, 0.0  ;;  %v2793_v11 = vmax.f32 %v2789_v53, 0.0  ;;  %v2794_v35 = vmax.f32 %v2790_v13, 0.0 }
 0x70c   :  { %v2866_v52 = vadd.f32 %v2862_v62, %v7045_v5  ;;  %v2867_v17 = vadd.f32 %v2863_v19, %v7046_v48  ;;  %v2868_v54 = vadd.f32 %v2864_v20, %v7047_v47  ;;  %v2869_v45 = vadd.f32 %v2865_v34, %v7048_v38 }
 0x70d   :  { %v2799_v50 = vcombine.low %v2791_v44, %v2792_v36  ;;  %v2800_v16 = vcombine.low %v2793_v11, %v2794_v35 }
 0x70e   :  { %v2870_v29 = vmax.f32 %v2866_v52, 0.0  ;;  %v2871_v57 = vmax.f32 %v2867_v17, 0.0  ;;  %v2872_v1 = vmax.f32 %v2868_v54, 0.0  ;;  %v2873_v40 = vmax.f32 %v2869_v45, 0.0 }
 0x70f   :  { %v2807_v43 = vrot.slane %v2799_v50, %v7049_v7  ;;  %v2814_v10 = vrot.slane %v2800_v16, %v7049_v7 }
 0x710   :  { %v2878_v22 = vcombine.low %v2870_v29, %v2871_v57  ;;  %v2879_v42 = vcombine.low %v2872_v1, %v2873_v40 }
 0x711   :  { %v2815_v56 = vcombine.low %v2807_v43, %v2814_v10 }
 0x712   :  { %v2886_v4 = vrot.slane %v2878_v22, %v7049_v7  ;;  %v2893_v55 = vrot.slane %v2879_v42, %v7049_v7 }
 0x713   :  { %v2822_v14 = vrot.slane %v2815_v56, %v7049_v7 }
 0x714   :  { %v2894_v37 = vcombine.low %v2886_v4, %v2893_v55 }
 0x715   :  { %2824 = vst.msk [vmem:[#allocation9] sm:$0xf] %vm4380_vm9, %v2822_v14 }
 0x716   :  { %v2901_v26 = vrot.slane %v2894_v37, %v7049_v7 }
 0x718   :  { %2903 = vst.msk [vmem:[#allocation9 + $0x4] sm:$0xf] %vm4380_vm9, %v2901_v26 }
 0x719   :  { %3130 = shalt.err (!%p3127_p0)
}
 0x71a   :  { %s7051_s8 = smov 4   ;;  %s7052_s9 = smov 64  }
 0x71b   :  { %2915 = dma.vmem_to_hbm [thread:$0]  %s2910_s27, 128, %s6520_s3, [#allocation4], %s7052_s9, %s7052_s9, %s7051_s8  }
 0x71c   :  { %3145 = dma.done.wait [#allocation4], 128  }
 0x71d   :  { %3146 = vsyncadd [#allocation4], 4294967168 }
 0x71e   :  { %2919 = vsyncpa [#allocation3], 1 }
 0x71f   :  { %2920 = vsyncpa [#allocation8], 1 }
 0x720   :  { %2921 = vsyncpa [#allocation4], 1 }
 0x721   :  { %2922 = vsyncpa [#allocation5], 1 }

</bundles_post_ra>
